<compile_context>
chip_gen: v6e
topology: v6e:2x2x1
jax: 0.10.0
libtpu: 0.0.40
codegen_flags: <defaults>
</compile_context>

<pallas_src>
import math
from functools import partial

import jax
import jax.numpy as jnp
from jax import lax
from jax.experimental import pallas as pl
from jax.experimental.pallas import tpu as pltpu


def _fused_attn_kernel(x_ref, wqkv_ref, wo_ref, bo_ref, o_ref, *,
                       batches_per_step, n_head, d_k, d_v, causal, mxu_dtype):
    """One grid step: QKV proj -> causal MHA -> head-combine + fc + bias, all in
    VMEM, for `batches_per_step` batch elements."""
    H, dk, dv = n_head, d_k, d_v
    T = x_ref.shape[1]
    E = x_ref.shape[2]

    w_qkv = wqkv_ref[...].astype(mxu_dtype)   # [H, E, 2*dk+dv]; Q cols pre-scaled by 1/sqrt(dk)
    wo3 = wo_ref[...].astype(mxu_dtype)       # [H, dv, E]  (head-major fc weight)
    bo = bo_ref[...]                          # [1, E]      (f32)

    # Causal additive mask: built once per grid step, shared across batches/heads.
    if causal:
        row = lax.broadcasted_iota(jnp.int32, (T, T), 0)
        col = lax.broadcasted_iota(jnp.int32, (T, T), 1)
        mask_add = jnp.where(col <= row, jnp.float32(0.0), jnp.float32(-1e30))

    for b in range(batches_per_step):         # tiny static unroll (1 or 2)
        x_b = x_ref[b].astype(mxu_dtype)      # [T, E]
        # Head-batched projection: one dot_general with H as leading batch dim.
        xh = jnp.broadcast_to(x_b[None], (H, T, E))                     # [H, T, E]
        qkv = jnp.einsum("hte,hec->htc", xh, w_qkv,
                         preferred_element_type=jnp.float32)            # [H, T, 2dk+dv]
        q = qkv[:, :, :dk].astype(mxu_dtype)                            # [H, T, dk]
        k = qkv[:, :, dk:2 * dk].astype(mxu_dtype)                      # [H, T, dk]
        v = qkv[:, :, 2 * dk:].astype(mxu_dtype)                        # [H, T, dv]

        # Scores for all heads at once (no per-head slices, no k transpose).
        s = jnp.einsum("hqd,hkd->hqk", q, k,
                       preferred_element_type=jnp.float32)              # [H, T, T]
        if causal:
            s = s + mask_add                                            # bcast over H

        m = jnp.max(s, axis=-1, keepdims=True)
        p = jnp.exp(s - m)
        denom = jnp.sum(p, axis=-1, keepdims=True)

        a = jnp.einsum("hqk,hkd->hqd", p.astype(mxu_dtype), v,
                       preferred_element_type=jnp.float32)              # [H, T, dv]
        a = a / denom     # exact divide (numerical parity with PyTorch softmax)

        # concat(heads) @ Wo  ==  sum_h  a_h @ Wo[h]  (head-batched, then reduce)
        per_head = jnp.einsum("hqd,hde->hqe", a.astype(mxu_dtype), wo3,
                              preferred_element_type=jnp.float32)       # [H, T, E]
        out_b = jnp.sum(per_head, axis=0) + bo                          # [T, E]
        o_ref[b] = out_b.astype(o_ref.dtype)


def prepare_params(wq, wk, wv, wo, bo):
    """One-time parameter folding — call at init / checkpoint load, NOT per forward.

    * Folds all heads' Q/K/V weights into one stacked [H, E, 2*d_k + d_v] slab
      (single weight DMA + single head-batched projection in the kernel).
    * Pre-scales the Q columns by 1/sqrt(d_k) so the kernel never applies the
      softmax scale to q or to the [T, T] scores.
    * Reshapes the fc weight to head-major [H, d_v, E] so the head "concat" +
      fc becomes a head-batched matmul plus a cheap reduce over H.
    """
    H, E, d_k = wq.shape
    d_v = wv.shape[-1]
    w_qkv = jnp.concatenate([wq * jnp.float32(1.0 / math.sqrt(d_k)), wk, wv], axis=-1)
    wo3 = jnp.reshape(wo, (H, d_v, E))
    return {"w_qkv": w_qkv, "wo": wo3, "bo": bo,
            "n_head": int(H), "d_k": int(d_k), "d_v": int(d_v)}


def _tensorcores_per_device():
    """Best-effort TensorCore count per device (used only to pick the grid)."""
    try:
        kind = jax.devices()[0].device_kind.lower()
    except Exception:
        return 1
    # v7x (and the 2-TC / megacore chips) expose 2 TensorCores worth of
    # parallelism per device; v5e / v6e are single-TC.
    return 2 if any(tag in kind for tag in ("v7", "7x", "v5p", "v4", "v3", "v2")) else 1


def self_attention_layer_forward(x, params, *, causal=True,
                                 batches_per_step=None,
                                 mxu_dtype=jnp.float32):
    """Equivalent of SelfAttentionLayer.forward(x, decode_step=None, decode_idx=None)."""
    B, T, E = x.shape
    H, d_k, d_v = params["n_head"], params["d_k"], params["d_v"]
    w_qkv, wo3, bo = params["w_qkv"], params["wo"], params["bo"]
    qkv_cols = w_qkv.shape[-1]                # 2*d_k + d_v

    if batches_per_step is None:
        # v7x (2 TCs): keep a B-wide parallel grid so both cores get work.
        # v5e/v6e (1 TC): collapse the batch into a single grid step — removes
        # ~0.35us/step serial overhead and fills more MXU rows.
        batches_per_step = 1 if (_tensorcores_per_device() >= 2 and B > 1) else B
    bb = batches_per_step
    assert B % bb == 0, "batches_per_step must divide the batch size"

    flops = int(B * H * (2 * T * E * qkv_cols
                         + 2 * T * T * d_k + 2 * T * T * d_v
                         + 2 * T * d_v * E))
    transcendentals = int(B * H * T * T)
    bytes_accessed = int(4 * (x.size + w_qkv.size + wo3.size + bo.size + B * T * E))

    kernel = partial(_fused_attn_kernel, batches_per_step=bb, n_head=H,
                     d_k=d_k, d_v=d_v, causal=causal, mxu_dtype=mxu_dtype)

    return pl.pallas_call(
        kernel,
        out_shape=jax.ShapeDtypeStruct((B, T, E), x.dtype),
        grid=(B // bb,),
        in_specs=[
            pl.BlockSpec((bb, T, E), lambda g: (g, 0, 0)),          # x block (per grid step)
            pl.BlockSpec((H, E, qkv_cols), lambda g: (0, 0, 0)),    # fused QKV slab
            pl.BlockSpec((H, d_v, E), lambda g: (0, 0, 0)),         # head-major fc weight
            pl.BlockSpec((1, E), lambda g: (0, 0)),                 # fc bias
        ],
        out_specs=pl.BlockSpec((bb, T, E), lambda g: (g, 0, 0)),
        compiler_params=pltpu.CompilerParams(
            dimension_semantics=("parallel",)),
        cost_estimate=pl.CostEstimate(flops=flops,
                                      transcendentals=transcendentals,
                                      bytes_accessed=bytes_accessed),
    )(x, w_qkv, wo3, bo)


if __name__ == "__main__":
    # Module config: shape=(16,), seq_len=16, embd_dim=32, proj_dim=32,
    # n_head=4, n_layer=2, causal=True, attn_type='full', attn_dropout=0.0.
    B, T, E = 2, 16, 32
    n_head, n_layer = 4, 2
    proj_dim = 32
    d_k = d_v = proj_dim // n_head
    causal = True

    key = jax.random.PRNGKey(0)
    k1, k2, k3, k4, k5, kx = jax.random.split(key, 6)
    # Deterministic init mirroring the module's __init__ (normal, same stds).
    wq = jax.random.normal(k1, (n_head, E, d_k), jnp.float32) / math.sqrt(E)
    wk = jax.random.normal(k2, (n_head, E, d_k), jnp.float32) / math.sqrt(E)
    wv = jax.random.normal(k3, (n_head, E, d_v), jnp.float32) / math.sqrt(E)
    wo = jax.random.normal(k4, (n_head * d_v, E), jnp.float32) / math.sqrt(E * n_layer)
    bo = jax.random.normal(k5, (1, E), jnp.float32) * 0.01
    x = jax.random.normal(kx, (B, T, E), jnp.float32)

    # One-time parameter folding (hoisted out of the forward path).
    params = prepare_params(wq, wk, wv, wo, bo)

    # Force true-f32 matmuls on both sides of the comparison (TPU's default f32
    # dot may use bf16 operands); with the exact softmax divide this gives a
    # tight, apples-to-apples parity check. For throughput at larger shapes
    # pass mxu_dtype=jnp.bfloat16 (accumulation stays f32).
    with jax.default_matmul_precision("float32"):
        out = self_attention_layer_forward(x, params, causal=causal,
                                           mxu_dtype=jnp.float32)
        out = jax.block_until_ready(out)

        # Pure-JAX reference for correctness (matches the PyTorch module's
        # inference path with attn_dropout=0, decode_step=None).
        q = jnp.einsum("bte,hek->bhtk", x, wq)
        k_ = jnp.einsum("bte,hek->bhtk", x, wk)
        v_ = jnp.einsum("bte,hed->bhtd", x, wv)
        s = jnp.einsum("bhqk,bhmk->bhqm", q, k_) / math.sqrt(d_k)
        mask = jnp.tril(jnp.ones((T, T), dtype=bool))
        s = jnp.where(mask, s, -jnp.inf)
        p = jax.nn.softmax(s, axis=-1)
        a_ref = jnp.einsum("bhqm,bhmd->bhqd", p, v_)
        a_ref = jnp.transpose(a_ref, (0, 2, 1, 3)).reshape(B, T, n_head * d_v)
        ref = a_ref @ wo + bo

    assert out.shape == (B, T, E)
    assert jnp.allclose(out, ref, atol=1e-4, rtol=1e-4), (
        "mismatch vs JAX reference: max abs err = "
        f"{float(jnp.max(jnp.abs(out - ref)))}")
    print("KERNEL_OK")
</pallas_src>

<mosaic_0001>
module attributes {stable_mosaic.version = 11 : i64} {
  func.func @_fused_attn_kernel(%arg0: i32, %arg1: memref<2x16x32xf32, #tpu.memory_space<vmem>>, %arg2: memref<4x32x24xf32, #tpu.memory_space<vmem>>, %arg3: memref<4x8x32xf32, #tpu.memory_space<vmem>>, %arg4: memref<1x32xf32, #tpu.memory_space<vmem>>, %arg5: memref<2x16x32xf32, #tpu.memory_space<vmem>>) attributes {dimension_semantics = [#tpu.dimension_semantics<parallel>], iteration_bounds = array<i64: 1>, scalar_prefetch = 0 : i64, scratch_operands = 0 : i64, tpu.core_type = #tpu.core_type<tc>, window_params = [{transform_indices = @transform_0, window_bounds = array<i64: 2, 16, 32>}, {pipeline_mode = #tpu.pipeline_mode<synchronous>, transform_indices = @transform_1, window_bounds = array<i64: 4, 32, 24>}, {pipeline_mode = #tpu.pipeline_mode<synchronous>, transform_indices = @transform_2, window_bounds = array<i64: 4, 8, 32>}, {pipeline_mode = #tpu.pipeline_mode<synchronous>, transform_indices = @transform_3, window_bounds = array<i64: 1, 32>}, {transform_indices = @transform_4, window_bounds = array<i64: 2, 16, 32>}]} {
    %c0 = arith.constant 0 : index
    %c0_0 = arith.constant 0 : index
    %c0_1 = arith.constant 0 : index
    %0 = vector.load %arg2[%c0, %c0_0, %c0_1] : memref<4x32x24xf32, #tpu.memory_space<vmem>>, vector<4x32x24xf32>
    %c0_2 = arith.constant 0 : index
    %c0_3 = arith.constant 0 : index
    %c0_4 = arith.constant 0 : index
    %1 = vector.load %arg3[%c0_2, %c0_3, %c0_4] : memref<4x8x32xf32, #tpu.memory_space<vmem>>, vector<4x8x32xf32>
    %c0_5 = arith.constant 0 : index
    %c0_6 = arith.constant 0 : index
    %2 = vector.load %arg4[%c0_5, %c0_6] : memref<1x32xf32, #tpu.memory_space<vmem>>, vector<1x32xf32>
    %3 = tpu.iota {dimensions = array<i32: 0>} : vector<16x16xi32>
    %4 = tpu.iota {dimensions = array<i32: 1>} : vector<16x16xi32>
    %5 = arith.cmpi sle, %4, %3 : vector<16x16xi32>
    %cst = arith.constant 0.000000e+00 : f32
    %cst_7 = arith.constant -1.000000e+30 : f32
    %6 = vector.broadcast %cst : f32 to vector<16x16xf32>
    %7 = vector.broadcast %cst_7 : f32 to vector<16x16xf32>
    %8 = arith.select %5, %6, %7 : vector<16x16xi1>, vector<16x16xf32>
    %c0_8 = arith.constant 0 : index
    %c0_9 = arith.constant 0 : index
    %c0_10 = arith.constant 0 : index
    %9 = vector.load %arg1[%c0_8, %c0_9, %c0_10] : memref<2x16x32xf32, #tpu.memory_space<vmem>>, vector<1x16x32xf32>
    %10 = vector.shape_cast %9 : vector<1x16x32xf32> to vector<16x32xf32>
    %11 = vector.shape_cast %10 : vector<16x32xf32> to vector<1x16x32xf32>
    %12 = vector.shape_cast %11 : vector<1x16x32xf32> to vector<1x16x32xf32>
    %13 = vector.broadcast %12 : vector<1x16x32xf32> to vector<4x16x32xf32>
    "tpu.trace_start"() <{level = 10 : i32, message = "hte,hec->htc"}> : () -> ()
    %cst_11 = arith.constant dense<0.000000e+00> : vector<4x16x24xf32>
    %14 = tpu.matmul %13, %0, %cst_11 {dimension_numbers = #tpu.dot_dimension_numbers<[2], [1], [1], [2], [0, 0, 0, 1, 1, 2], [0], [0]>, precision = #tpu.contract_precision<fp32>} : vector<4x16x32xf32>, vector<4x32x24xf32>, vector<4x16x24xf32> -> vector<4x16x24xf32>
    "tpu.trace_stop"() : () -> ()
    %15 = vector.extract_strided_slice %14 {offsets = [0, 0, 0], sizes = [4, 16, 8], strides = [1, 1, 1]} : vector<4x16x24xf32> to vector<4x16x8xf32>
    %16 = vector.extract_strided_slice %14 {offsets = [0, 0, 8], sizes = [4, 16, 8], strides = [1, 1, 1]} : vector<4x16x24xf32> to vector<4x16x8xf32>
    %17 = vector.extract_strided_slice %14 {offsets = [0, 0, 16], sizes = [4, 16, 8], strides = [1, 1, 1]} : vector<4x16x24xf32> to vector<4x16x8xf32>
    "tpu.trace_start"() <{level = 10 : i32, message = "hqd,hkd->hqk"}> : () -> ()
    %cst_12 = arith.constant dense<0.000000e+00> : vector<4x16x16xf32>
    %18 = tpu.matmul %15, %16, %cst_12 {dimension_numbers = #tpu.dot_dimension_numbers<[2], [2], [1], [1], [0, 0, 0, 1, 1, 1], [0], [0]>, precision = #tpu.contract_precision<fp32>} : vector<4x16x8xf32>, vector<4x16x8xf32>, vector<4x16x16xf32> -> vector<4x16x16xf32>
    "tpu.trace_stop"() : () -> ()
    %19 = vector.shape_cast %8 : vector<16x16xf32> to vector<1x16x16xf32>
    %20 = vector.broadcast %19 : vector<1x16x16xf32> to vector<4x16x16xf32>
    %21 = arith.addf %18, %20 : vector<4x16x16xf32>
    %cst_13 = arith.constant dense<0xFF800000> : vector<4x16xf32>
    %22 = vector.multi_reduction <maximumf>, %21, %cst_13 [2] : vector<4x16x16xf32> to vector<4x16xf32>
    %23 = vector.shape_cast %22 : vector<4x16xf32> to vector<4x16x1xf32>
    %24 = vector.broadcast %23 : vector<4x16x1xf32> to vector<4x16x16xf32>
    %25 = arith.subf %21, %24 : vector<4x16x16xf32>
    %26 = math.exp %25 : vector<4x16x16xf32>
    %cst_14 = arith.constant dense<0.000000e+00> : vector<4x16xf32>
    %27 = vector.multi_reduction <add>, %26, %cst_14 [2] : vector<4x16x16xf32> to vector<4x16xf32>
    %28 = vector.shape_cast %27 : vector<4x16xf32> to vector<4x16x1xf32>
    "tpu.trace_start"() <{level = 10 : i32, message = "hqk,hkd->hqd"}> : () -> ()
    %cst_15 = arith.constant dense<0.000000e+00> : vector<4x16x8xf32>
    %29 = tpu.matmul %26, %17, %cst_15 {dimension_numbers = #tpu.dot_dimension_numbers<[2], [1], [1], [2], [0, 0, 0, 1, 1, 2], [0], [0]>, precision = #tpu.contract_precision<fp32>} : vector<4x16x16xf32>, vector<4x16x8xf32>, vector<4x16x8xf32> -> vector<4x16x8xf32>
    "tpu.trace_stop"() : () -> ()
    %30 = vector.broadcast %28 : vector<4x16x1xf32> to vector<4x16x8xf32>
    %31 = arith.divf %29, %30 : vector<4x16x8xf32>
    "tpu.trace_start"() <{level = 10 : i32, message = "hqd,hde->hqe"}> : () -> ()
    %cst_16 = arith.constant dense<0.000000e+00> : vector<4x16x32xf32>
    %32 = tpu.matmul %31, %1, %cst_16 {dimension_numbers = #tpu.dot_dimension_numbers<[2], [1], [1], [2], [0, 0, 0, 1, 1, 2], [0], [0]>, precision = #tpu.contract_precision<fp32>} : vector<4x16x8xf32>, vector<4x8x32xf32>, vector<4x16x32xf32> -> vector<4x16x32xf32>
    "tpu.trace_stop"() : () -> ()
    %cst_17 = arith.constant dense<0.000000e+00> : vector<16x32xf32>
    %33 = vector.multi_reduction <add>, %32, %cst_17 [0] : vector<4x16x32xf32> to vector<16x32xf32>
    %34 = vector.broadcast %2 : vector<1x32xf32> to vector<16x32xf32>
    %35 = arith.addf %33, %34 : vector<16x32xf32>
    %c0_18 = arith.constant 0 : index
    %c0_19 = arith.constant 0 : index
    %c0_20 = arith.constant 0 : index
    %36 = vector.load %arg5[%c0_18, %c0_19, %c0_20] : memref<2x16x32xf32, #tpu.memory_space<vmem>>, vector<1x16x32xf32>
    %37 = vector.shape_cast %36 : vector<1x16x32xf32> to vector<16x32xf32>
    %38 = vector.shape_cast %35 : vector<16x32xf32> to vector<1x16x32xf32>
    tpu.vector_store %arg5[%c0_18, %c0_19, %c0_20], %38 {strides = array<i32>} : memref<2x16x32xf32, #tpu.memory_space<vmem>>, vector<1x16x32xf32>,
    %c1 = arith.constant 1 : index
    %c0_21 = arith.constant 0 : index
    %c0_22 = arith.constant 0 : index
    %39 = vector.load %arg1[%c1, %c0_21, %c0_22] : memref<2x16x32xf32, #tpu.memory_space<vmem>>, vector<1x16x32xf32>
    %40 = vector.shape_cast %39 : vector<1x16x32xf32> to vector<16x32xf32>
    %41 = vector.shape_cast %40 : vector<16x32xf32> to vector<1x16x32xf32>
    %42 = vector.shape_cast %41 : vector<1x16x32xf32> to vector<1x16x32xf32>
    %43 = vector.broadcast %42 : vector<1x16x32xf32> to vector<4x16x32xf32>
    "tpu.trace_start"() <{level = 10 : i32, message = "hte,hec->htc"}> : () -> ()
    %cst_23 = arith.constant dense<0.000000e+00> : vector<4x16x24xf32>
    %44 = tpu.matmul %43, %0, %cst_23 {dimension_numbers = #tpu.dot_dimension_numbers<[2], [1], [1], [2], [0, 0, 0, 1, 1, 2], [0], [0]>, precision = #tpu.contract_precision<fp32>} : vector<4x16x32xf32>, vector<4x32x24xf32>, vector<4x16x24xf32> -> vector<4x16x24xf32>
    "tpu.trace_stop"() : () -> ()
    %45 = vector.extract_strided_slice %44 {offsets = [0, 0, 0], sizes = [4, 16, 8], strides = [1, 1, 1]} : vector<4x16x24xf32> to vector<4x16x8xf32>
    %46 = vector.extract_strided_slice %44 {offsets = [0, 0, 8], sizes = [4, 16, 8], strides = [1, 1, 1]} : vector<4x16x24xf32> to vector<4x16x8xf32>
    %47 = vector.extract_strided_slice %44 {offsets = [0, 0, 16], sizes = [4, 16, 8], strides = [1, 1, 1]} : vector<4x16x24xf32> to vector<4x16x8xf32>
    "tpu.trace_start"() <{level = 10 : i32, message = "hqd,hkd->hqk"}> : () -> ()
    %cst_24 = arith.constant dense<0.000000e+00> : vector<4x16x16xf32>
    %48 = tpu.matmul %45, %46, %cst_24 {dimension_numbers = #tpu.dot_dimension_numbers<[2], [2], [1], [1], [0, 0, 0, 1, 1, 1], [0], [0]>, precision = #tpu.contract_precision<fp32>} : vector<4x16x8xf32>, vector<4x16x8xf32>, vector<4x16x16xf32> -> vector<4x16x16xf32>
    "tpu.trace_stop"() : () -> ()
    %49 = vector.shape_cast %8 : vector<16x16xf32> to vector<1x16x16xf32>
    %50 = vector.broadcast %49 : vector<1x16x16xf32> to vector<4x16x16xf32>
    %51 = arith.addf %48, %50 : vector<4x16x16xf32>
    %cst_25 = arith.constant dense<0xFF800000> : vector<4x16xf32>
    %52 = vector.multi_reduction <maximumf>, %51, %cst_25 [2] : vector<4x16x16xf32> to vector<4x16xf32>
    %53 = vector.shape_cast %52 : vector<4x16xf32> to vector<4x16x1xf32>
    %54 = vector.broadcast %53 : vector<4x16x1xf32> to vector<4x16x16xf32>
    %55 = arith.subf %51, %54 : vector<4x16x16xf32>
    %56 = math.exp %55 : vector<4x16x16xf32>
    %cst_26 = arith.constant dense<0.000000e+00> : vector<4x16xf32>
    %57 = vector.multi_reduction <add>, %56, %cst_26 [2] : vector<4x16x16xf32> to vector<4x16xf32>
    %58 = vector.shape_cast %57 : vector<4x16xf32> to vector<4x16x1xf32>
    "tpu.trace_start"() <{level = 10 : i32, message = "hqk,hkd->hqd"}> : () -> ()
    %cst_27 = arith.constant dense<0.000000e+00> : vector<4x16x8xf32>
    %59 = tpu.matmul %56, %47, %cst_27 {dimension_numbers = #tpu.dot_dimension_numbers<[2], [1], [1], [2], [0, 0, 0, 1, 1, 2], [0], [0]>, precision = #tpu.contract_precision<fp32>} : vector<4x16x16xf32>, vector<4x16x8xf32>, vector<4x16x8xf32> -> vector<4x16x8xf32>
    "tpu.trace_stop"() : () -> ()
    %60 = vector.broadcast %58 : vector<4x16x1xf32> to vector<4x16x8xf32>
    %61 = arith.divf %59, %60 : vector<4x16x8xf32>
    "tpu.trace_start"() <{level = 10 : i32, message = "hqd,hde->hqe"}> : () -> ()
    %cst_28 = arith.constant dense<0.000000e+00> : vector<4x16x32xf32>
    %62 = tpu.matmul %61, %1, %cst_28 {dimension_numbers = #tpu.dot_dimension_numbers<[2], [1], [1], [2], [0, 0, 0, 1, 1, 2], [0], [0]>, precision = #tpu.contract_precision<fp32>} : vector<4x16x8xf32>, vector<4x8x32xf32>, vector<4x16x32xf32> -> vector<4x16x32xf32>
    "tpu.trace_stop"() : () -> ()
    %cst_29 = arith.constant dense<0.000000e+00> : vector<16x32xf32>
    %63 = vector.multi_reduction <add>, %62, %cst_29 [0] : vector<4x16x32xf32> to vector<16x32xf32>
    %64 = vector.broadcast %2 : vector<1x32xf32> to vector<16x32xf32>
    %65 = arith.addf %63, %64 : vector<16x32xf32>
    %c1_30 = arith.constant 1 : index
    %c0_31 = arith.constant 0 : index
    %c0_32 = arith.constant 0 : index
    %66 = vector.load %arg5[%c1_30, %c0_31, %c0_32] : memref<2x16x32xf32, #tpu.memory_space<vmem>>, vector<1x16x32xf32>
    %67 = vector.shape_cast %66 : vector<1x16x32xf32> to vector<16x32xf32>
    %68 = vector.shape_cast %65 : vector<16x32xf32> to vector<1x16x32xf32>
    tpu.vector_store %arg5[%c1_30, %c0_31, %c0_32], %68 {strides = array<i32>} : memref<2x16x32xf32, #tpu.memory_space<vmem>>, vector<1x16x32xf32>,
    return
  }
  func.func @transform_0(%arg0: i32) -> (i32, i32, i32) {
    %c0_i32 = arith.constant 0 : i32
    %c0_i32_0 = arith.constant 0 : i32
    %c0_i32_1 = arith.constant 0 : i32
    return %arg0, %c0_i32, %c0_i32_0 : i32, i32, i32
  }
  func.func @transform_1(%arg0: i32) -> (i32, i32, i32) {
    %c0_i32 = arith.constant 0 : i32
    %c0_i32_0 = arith.constant 0 : i32
    %c0_i32_1 = arith.constant 0 : i32
    %c0_i32_2 = arith.constant 0 : i32
    return %c0_i32, %c0_i32_0, %c0_i32_1 : i32, i32, i32
  }
  func.func @transform_2(%arg0: i32) -> (i32, i32, i32) {
    %c0_i32 = arith.constant 0 : i32
    %c0_i32_0 = arith.constant 0 : i32
    %c0_i32_1 = arith.constant 0 : i32
    %c0_i32_2 = arith.constant 0 : i32
    return %c0_i32, %c0_i32_0, %c0_i32_1 : i32, i32, i32
  }
  func.func @transform_3(%arg0: i32) -> (i32, i32) {
    %c0_i32 = arith.constant 0 : i32
    %c0_i32_0 = arith.constant 0 : i32
    %c0_i32_1 = arith.constant 0 : i32
    return %c0_i32, %c0_i32_0 : i32, i32
  }
  func.func @transform_4(%arg0: i32) -> (i32, i32, i32) {
    %c0_i32 = arith.constant 0 : i32
    %c0_i32_0 = arith.constant 0 : i32
    %c0_i32_1 = arith.constant 0 : i32
    return %arg0, %c0_i32, %c0_i32_0 : i32, i32, i32
  }
}

</mosaic_0001>

<bundles_post_ra>
// kernel: tpu_custom_call.1
= control target key start
LH: loop header
LB: loop body
LE: loop exit
PB: predicated region body
PF: predicated region fallthrough
CT: control target
= control target key end

     0   :  { %vm50_vm0 = vcmask 261120   ;;  %s20820_s0 = inlined_call_operand.vmem [shape: f32[2,16,32], index: 0, kind: input, shape index: {}]   ;;  %s20821_s1 = inlined_call_operand.vmem [shape: f32[4,32,24], index: 1, kind: input, shape index: {}]   ;;  %s20822_s2 = inlined_call_operand.vmem [shape: f32[4,8,32], index: 2, kind: input, shape index: {}]   ;;  %s20823_s3 = inlined_call_operand.vmem [shape: f32[1,32], index: 3, kind: input, shape index: {}]   ;;  %s20824_s4 = inlined_call_operand.hbm [shape: f32[2,16,32], index: 4, kind: output, shape index: {}]  }
   0x1   :  { %v21_v0 = vld [vmem:[%s20821_s1 + $0x18] sm:$0xff]  ;;  %v20_v1 = vld [vmem:[%s20821_s1 + $0x10] sm:$0xff]  ;;  %v19_v2 = vld [vmem:[%s20821_s1 + $0x8] sm:$0xff] }
   0x2   :  { %v19119_v3 = vand.u32 4294901760, %v21_v0  ;;  %v19121_v4 = vand.u32 4294901760, %v20_v1  ;;  %v19123_v5 = vand.u32 4294901760, %v19_v2  ;;  %v18_v6 = vld [vmem:[%s20821_s1] sm:$0xff]  ;;  %v49_v8 = vld [vmem:[%s20820_s0 + $0x8] sm:$0xff] }
   0x3   :  { %v48_v7 = vld [vmem:[%s20820_s0] sm:$0xff]  ;;  %v19134_v9 = vand.u32 4294901760, %v18_v6  ;;  %v55_v11 = vsel %vm50_vm0, %v49_v8, 0 }
   0x4   :  { %v52_v10 = vsel %vm50_vm0, %v48_v7, 0  ;;  %17546 = vmatprep.subr.mxu0 %v19119_v3  ;;  %v19140_v12 = vsub.f32 %v21_v0, %v19119_v3  ;;  %v19145_v14 = vsub.f32 %v20_v1, %v19121_v4  ;;  %v19147_v15 = vand.u32 4294901760, %v55_v11 }
   0x5   :  { %v19142_v13 = vand.u32 4294901760, %v52_v10  ;;  %17547 = vmatpush3.msra.mxu0 %v19119_v3  ;;  %v19151_v16 = vsub.f32 %v19_v2, %v19123_v5  ;;  %v19154_v17 = vsub.f32 %v18_v6, %v19134_v9 }
   0x6   :  { %17548 = vmatprep.subr.mxu0 %v19121_v4  ;;  %v19158_v18 = vand.u32 4294901760, %v19140_v12  ;;  %v19164_v20 = vand.u32 4294901760, %v19145_v14  ;;  %v19167_v21 = vsub.f32 %v55_v11, %v19147_v15 }
   0x7   :  { %v19161_v19 = vsub.f32 %v52_v10, %v19142_v13  ;;  %17565 = vmatprep.mubr.f32.mxu1 %v19142_v13  ;;  %17549 = vmatpush3.msra.mxu0 %v19121_v4  ;;  %v19172_v22 = vand.u32 4294901760, %v19151_v16  ;;  %v19175_v23 = vand.u32 4294901760, %v19154_v17 }
   0x8   :  { %9 = vsyncpa [#allocation3], 0  ;;  %17550 = vmatprep.subr.mxu0 %v19123_v5  ;;  %v174_v24 = vsub.f32 %v19140_v12, %v19158_v18  ;;  %v181_v26 = vsub.f32 %v19145_v14, %v19164_v20  ;;  %v19186_v27 = vand.u32 4294901760, %v19167_v21  ;;  %v25_v38 = vld [vmem:[%s20821_s1 + $0x38] sm:$0xff]  ;;  %v24_v39 = vld [vmem:[%s20821_s1 + $0x30] sm:$0xff]  ;;  %vm2175_vm1 = vcmask 64512  }
   0x9   :  { %v19181_v25 = vand.u32 4294901760, %v19161_v19  ;;  %17551 = vmatpush3.msra.mxu0 %v19123_v5  ;;  %v188_v28 = vsub.f32 %v19151_v16, %v19172_v22  ;;  %v195_v29 = vsub.f32 %v19154_v17, %v19175_v23  ;;  %v19236_v40 = vand.u32 4294901760, %v25_v38  ;;  %v23_v42 = vld [vmem:[%s20821_s1 + $0x28] sm:$0xff]  ;;  %v22_v43 = vld [vmem:[%s20821_s1 + $0x20] sm:$0xff]  ;;  %v29_v62 = vld [vmem:[%s20821_s1 + $0x58] sm:$0xff]  ;;  %s19080_s25 = smov 112  }
   0xa   :  { %17552 = vmatprep.subr.mxu0 %v19134_v9  ;;  %v19194_v30 = vand.u32 4294901760, %v174_v24  ;;  %v19198_v32 = vand.u32 4294901760, %v181_v26  ;;  %v139_v33 = vsub.f32 %v19167_v21, %v19186_v27  ;;  %v19242_v41 = vand.u32 4294901760, %v24_v39  ;;  %v28_v63 = vld [vmem:[%s20821_s1 + $0x50] sm:$0xff]  ;;  %v27_v2 = vld [vmem:[%s20821_s1 + $0x48] sm:$0xff]  ;;  %v26_v6 = vld [vmem:[%s20821_s1 + $0x40] sm:$0xff] }
   0xb   :  { %v129_v31 = vsub.f32 %v19161_v19, %v19181_v25  ;;  %17553 = vmatpush3.msra.mxu0 %v19134_v9  ;;  %v19209_v36 = vand.u32 4294901760, %v188_v28  ;;  %v19214_v37 = vand.u32 4294901760, %v195_v29  ;;  %v19255_v44 = vsub.f32 %v25_v38, %v19236_v40  ;;  %s19082_s12 = smov [#allocation2]  }
   0xc   :  { %17557 = vmatprep.subr.mxu1 %v19194_v30  ;;  %17568 = vmatprep.subr.mxu0 %v19140_v12  ;;  %v19207_v35 = vand.u32 4294901760, %v139_v33  ;;  %v19259_v45 = vand.u32 4294901760, %v23_v42  ;;  %v19264_v46 = vsub.f32 %v24_v39, %v19242_v41  ;;  %v19268_v47 = vand.u32 4294901760, %v22_v43  ;;  %s16716_s13 = sshll.u32 %s19082_s12, 4  ;;  %s16717_s13 = int_to_ptr.vmem [resolvable:$true] %s16716_s13 }
   0xd   :  { %v19204_v34 = vand.u32 4294901760, %v129_v31  ;;  %17558 = vmatpush3.msra.mxu1 %v19194_v30  ;;  %v19273_v48 = vand.u32 4294901760, %v19255_v44  ;;  %v19356_v0 = vand.u32 4294901760, %v29_v62  ;;  %v19362_v1 = vand.u32 4294901760, %v28_v63  ;;  %s19057_s16 = scalar_lea.vmem %s16717_s13, 512  ;;  %p19062_p1 = scmp.lt.s32.totalorder %s16717_s13, %s16717_s13 }
   0xe   :  { %17559 = vmatprep.subr.mxu1 %v19198_v32  ;;  %20916 = vst [vmem:[#allocation5_spill] sm:$0xff] %v19264_v46  ;;  %v19278_v49 = vsub.f32 %v23_v42, %v19259_v45  ;;  %v19283_v50 = vand.u32 4294901760, %v19264_v46  ;;  %v19288_v51 = vsub.f32 %v22_v43, %v19268_v47  ;;  %v19379_v8 = vand.u32 4294901760, %v27_v2  ;;  %p19058_p0 = scmp.ne.s32.totalorder %s16717_s13, %s19057_s16  ;;  %p19063_p2 = scmp.lt.s32.totalorder %s19057_s16, %s19057_s16 }
   0xf   :  { %17554 = vmatprep.mubr.f32.mxu0 %v19204_v34  ;;  %17560 = vmatpush3.msra.mxu1 %v19198_v32  ;;  %20917 = vst [vmem:[#allocation6_spill] sm:$0xff] %v19273_v48  ;;  %v702_v52 = vsub.f32 %v19255_v44, %v19273_v48  ;;  %20923 = vst [vmem:[#allocation12_spill] sm:$0xff] %v19356_v0  ;;  %v19375_v7 = vsub.f32 %v29_v62, %v19356_v0  ;;  %v19388_v11 = vand.u32 4294901760, %v26_v6  ;;  %v33_v62 = vld [vmem:[%s20821_s1 + $0x78] sm:$0xff]  ;;  %vm4234_vm4 = vcmask 130048  }
  0x10   :  { %17555 = vmatmul.mubr.f32.vlgmr.msra.gmra.mxu0 %v19207_v35  ;;  %17561 = vmatprep.subr.mxu1 %v19209_v36  ;;  %20918 = vst [vmem:[#allocation7_spill] sm:$0xff] %v19278_v49  ;;  %20919 = vst [vmem:[#allocation8_spill] sm:$0xff] %v19283_v50  ;;  %v19297_v53 = vand.u32 4294901760, %v19278_v49  ;;  %v709_v54 = vsub.f32 %v19264_v46, %v19283_v50  ;;  %v19306_v55 = vand.u32 4294901760, %v19288_v51  ;;  %p19064_p3 = por %p19063_p2, %p19062_p1 }
  0x11   :  { %17569 = vmatpush3.msra.mxu0 %v19140_v12  ;;  %17562 = vmatpush3.msra.mxu1 %v19209_v36  ;;  %20920 = vst [vmem:[#allocation9_spill] sm:$0xff] %v19288_v51  ;;  %v19310_v56 = vand.u32 4294901760, %v702_v52  ;;  %20924 = vst [vmem:[#allocation13_spill] sm:$0xff] %v19362_v1  ;;  %v19384_v10 = vsub.f32 %v28_v63, %v19362_v1  ;;  %v19393_v24 = vand.u32 4294901760, %v19375_v7  ;;  %v32_v63 = vld [vmem:[%s20821_s1 + $0x70] sm:$0xff] }
  0x12   :  { %17570 = vmatprep.subr.mxu0 %v19145_v14  ;;  %17563 = vmatprep.subr.mxu1 %v19214_v37  ;;  %20921 = vst [vmem:[#allocation10_spill] sm:$0xff] %v19297_v53  ;;  %20922 = vst [vmem:[#allocation11_spill] sm:$0xff] %v19306_v55  ;;  %v716_v57 = vsub.f32 %v19278_v49, %v19297_v53  ;;  %v19318_v58 = vand.u32 4294901760, %v709_v54  ;;  %v723_v59 = vsub.f32 %v19288_v51, %v19306_v55  ;;  %p19065_p4 = pnand %p19064_p3, %p19058_p0 }
  0x13   :  { %17571 = vmatpush3.msra.mxu0 %v19145_v14  ;;  %17564 = vmatpush3.msra.mxu1 %v19214_v37  ;;  %20925 = vst [vmem:[#allocation14_spill] sm:$0xff] %v19375_v7  ;;  %20926 = vst [vmem:[#allocation15_spill] sm:$0xff] %v19379_v8  ;;  %v19398_v26 = vsub.f32 %v27_v2, %v19379_v8  ;;  %v19403_v28 = vand.u32 4294901760, %v19384_v10  ;;  %v19408_v29 = vsub.f32 %v26_v6, %v19388_v11  ;;  %v31_v6 = vld [vmem:[%s20821_s1 + $0x68] sm:$0xff] }
  0x14   :  { %17572 = vmatprep.subr.mxu0 %v19151_v16  ;;  %17566 = vmatmul.mubr.f32.vlgmr.msra.gmra.mxu1 %v19147_v15  ;;  %v19328_v60 = vand.u32 4294901760, %v716_v57  ;;  %v19334_v61 = vand.u32 4294901760, %v723_v59  ;;  %20927 = vst [vmem:[#allocation16_spill] sm:$0xff] %v19384_v10  ;;  %20928 = vst [vmem:[#allocation17_spill] sm:$0xff] %v19388_v11  ;;  %v1230_v31 = vsub.f32 %v19375_v7, %v19393_v24  ;;  %v19474_v2 = vand.u32 4294901760, %v33_v62 }
  0x15   :  { %17573 = vmatpush3.msra.mxu0 %v19151_v16  ;;  %17579 = vmatprep.subr.mxu1 %v19119_v3  ;;  %20929 = vst [vmem:[#allocation18_spill] sm:$0xff] %v19393_v24  ;;  %20930 = vst [vmem:[#allocation19_spill] sm:$0xff] %v19398_v26  ;;  %v19417_v33 = vand.u32 4294901760, %v19398_v26  ;;  %v1237_v38 = vsub.f32 %v19384_v10, %v19403_v28  ;;  %v19426_v39 = vand.u32 4294901760, %v19408_v29 }
  0x16   :  { %17574 = vmatprep.subr.mxu0 %v19154_v17  ;;  %17576 = vmatprep.mubr.f32.mxu0 %v19161_v19  ;;  %20931 = vst [vmem:[#allocation20_spill] sm:$0xff] %v19403_v28  ;;  %20932 = vst [vmem:[#allocation21_spill] sm:$0xff] %v19408_v29  ;;  %v19430_v42 = vand.u32 4294901760, %v1230_v31  ;;  %v19483_v31 = vand.u32 4294901760, %v32_v63 }
  0x17   :  { %17575 = vmatpush3.msra.mxu0 %v19154_v17  ;;  %17580 = vmatpush3.msra.mxu1 %v19119_v3  ;;  %20933 = vst [vmem:[#allocation22_spill] sm:$0xff] %v19417_v33  ;;  %20934 = vst [vmem:[#allocation23_spill] sm:$0xff] %v19426_v39  ;;  %v1244_v43 = vsub.f32 %v19398_v26, %v19417_v33  ;;  %v19438_v52 = vand.u32 4294901760, %v1237_v38  ;;  %v1251_v54 = vsub.f32 %v19408_v29, %v19426_v39  ;;  %v30_v38 = vld [vmem:[%s20821_s1 + $0x60] sm:$0xff]  ;;  %s19079_s1 = smov 120  }
  0x18   :  { %17577 = vmatmul.mubr.f32.vlgmr.msra.gmra.mxu0 %v19167_v21  ;;  %17581 = vmatprep.subr.mxu1 %v19121_v4  ;;  %20935 = vst [vmem:[#allocation24_spill] sm:$0xff] %v19430_v42  ;;  %20939 = vst [vmem:[#allocation28_spill] sm:$0xff] %v19474_v2 }
  0x19   :  { %17590 = vmatprep.subr.mxu0 %v19158_v18  ;;  %17582 = vmatpush3.msra.mxu1 %v19121_v4  ;;  %20936 = vst [vmem:[#allocation25_spill] sm:$0xff] %v19438_v52  ;;  %v19448_v57 = vand.u32 4294901760, %v1244_v43  ;;  %v19454_v59 = vand.u32 4294901760, %v1251_v54  ;;  %20940 = vst [vmem:[#allocation29_spill] sm:$0xff] %v19483_v31  ;;  %v19493_v43 = vsub.f32 %v33_v62, %v19474_v2  ;;  %v19495_v54 = vand.u32 4294901760, %v31_v6 }
  0x1a   :  { %17591 = vmatpush3.msra.mxu0 %v19158_v18  ;;  %17583 = vmatprep.subr.mxu1 %v19123_v5 }
  0x1b   :  { %17592 = vmatprep.subr.mxu0 %v19164_v20  ;;  %17584 = vmatpush3.msra.mxu1 %v19123_v5  ;;  %20937 = vst [vmem:[#allocation26_spill] sm:$0xff] %v19448_v57  ;;  %20938 = vst [vmem:[#allocation27_spill] sm:$0xff] %v19454_v59  ;;  %v19511_v62 = vand.u32 4294901760, %v19493_v43 }
  0x1c   :  { %17593 = vmatpush3.msra.mxu0 %v19164_v20  ;;  %17585 = vmatprep.subr.mxu1 %v19134_v9  ;;  %20941 = vst [vmem:[#allocation30_spill] sm:$0xff] %v19493_v43  ;;  %20942 = vst [vmem:[#allocation31_spill] sm:$0xff] %v19495_v54 }
  0x1d   :  { %17594 = vmatprep.subr.mxu0 %v19172_v22  ;;  %17586 = vmatpush3.msra.mxu1 %v19134_v9  ;;  %20945 = vst [vmem:[#allocation34_spill] sm:$0xff] %v19511_v62 }
  0x1e   :  { %17587 = vmatprep.mubr.f32.mxu1 %v19181_v25  ;;  %17595 = vmatpush3.msra.mxu0 %v19172_v22 }
  0x1f   :  { %17588 = vmatmul.mubr.f32.vlgmr.msra.gmra.mxu1 %v19186_v27  ;;  %17596 = vmatprep.subr.mxu0 %v19175_v23 }
  0x20   :  { %17601 = vmatprep.subr.mxu1 %v19119_v3  ;;  %17597 = vmatpush3.msra.mxu0 %v19175_v23 }
  0x21   :  { %17598 = vmatprep.mubr.f32.mxu0 %v19142_v13  ;;  %17602 = vmatpush3.msra.mxu1 %v19119_v3 }
  0x22   :  { %17599 = vmatmul.mubr.f32.vlgmr.msra.gmra.mxu0 %v19147_v15  ;;  %17603 = vmatprep.subr.mxu1 %v19121_v4 }
  0x23   :  { %17612 = vmatprep.subr.mxu0 %v19236_v40  ;;  %17604 = vmatpush3.msra.mxu1 %v19121_v4 }
  0x24   :  { %17613 = vmatpush3.msra.mxu0 %v19236_v40  ;;  %17605 = vmatprep.subr.mxu1 %v19123_v5 }
  0x25   :  { %17614 = vmatprep.subr.mxu0 %v19242_v41  ;;  %17606 = vmatpush3.msra.mxu1 %v19123_v5 }
  0x26   :  { %17615 = vmatpush3.msra.mxu0 %v19242_v41  ;;  %17607 = vmatprep.subr.mxu1 %v19134_v9 }
  0x27   :  { %17616 = vmatprep.subr.mxu0 %v19259_v45  ;;  %17608 = vmatpush3.msra.mxu1 %v19134_v9 }
  0x28   :  { %17609 = vmatprep.mubr.f32.mxu1 %v19142_v13  ;;  %17617 = vmatpush3.msra.mxu0 %v19259_v45 }
  0x29   :  { %17610 = vmatmul.mubr.f32.vlgmr.msra.gmra.mxu1 %v19147_v15  ;;  %17618 = vmatprep.subr.mxu0 %v19268_v47 }
  0x2a   :  { %17623 = vmatprep.subr.mxu1 %v19310_v56  ;;  %17619 = vmatpush3.msra.mxu0 %v19268_v47 }
  0x2b   :  { %17624 = vmatpush3.msra.mxu1 %v19310_v56  ;;  %17620 = vmatprep.mubr.f32.mxu0 %v19204_v34 }
  0x2c   :  { %17625 = vmatprep.subr.mxu1 %v19318_v58  ;;  %17634 = vmatprep.subr.mxu0 %v19255_v44 }
  0x2d   :  { %17621 = vmatmul.mubr.f32.vlgmr.msra.gmra.mxu0 %v19207_v35  ;;  %17626 = vmatpush3.msra.mxu1 %v19318_v58 }
  0x2e   :  { %17635 = vmatpush3.msra.mxu0 %v19255_v44  ;;  %17627 = vmatprep.subr.mxu1 %v19328_v60 }
  0x2f   :  { %17636 = vmatprep.subr.mxu0 %v19264_v46  ;;  %17628 = vmatpush3.msra.mxu1 %v19328_v60 }
  0x30   :  { %17637 = vmatpush3.msra.mxu0 %v19264_v46  ;;  %17629 = vmatprep.subr.mxu1 %v19334_v61 }
  0x31   :  { %17638 = vmatprep.subr.mxu0 %v19278_v49  ;;  %17630 = vmatpush3.msra.mxu1 %v19334_v61 }
  0x32   :  { %17631 = vmatprep.mubr.f32.mxu1 %v19142_v13  ;;  %17639 = vmatpush3.msra.mxu0 %v19278_v49 }
  0x33   :  { %17632 = vmatmul.mubr.f32.vlgmr.msra.gmra.mxu1 %v19147_v15  ;;  %17640 = vmatprep.subr.mxu0 %v19288_v51 }
  0x34   :  { %17645 = vmatprep.subr.mxu1 %v19236_v40  ;;  %17641 = vmatpush3.msra.mxu0 %v19288_v51 }
  0x35   :  { %17642 = vmatprep.mubr.f32.mxu0 %v19161_v19  ;;  %17646 = vmatpush3.msra.mxu1 %v19236_v40 }
  0x36   :  { %17643 = vmatmul.mubr.f32.vlgmr.msra.gmra.mxu0 %v19167_v21  ;;  %17647 = vmatprep.subr.mxu1 %v19242_v41 }
  0x37   :  { %17656 = vmatprep.subr.mxu0 %v19273_v48  ;;  %17648 = vmatpush3.msra.mxu1 %v19242_v41 }
  0x38   :  { %17657 = vmatpush3.msra.mxu0 %v19273_v48  ;;  %17649 = vmatprep.subr.mxu1 %v19259_v45 }
  0x39   :  { %17658 = vmatprep.subr.mxu0 %v19283_v50  ;;  %17650 = vmatpush3.msra.mxu1 %v19259_v45 }
  0x3a   :  { %17659 = vmatpush3.msra.mxu0 %v19283_v50  ;;  %17651 = vmatprep.subr.mxu1 %v19268_v47 }
  0x3b   :  { %17660 = vmatprep.subr.mxu0 %v19297_v53  ;;  %17652 = vmatpush3.msra.mxu1 %v19268_v47 }
  0x3c   :  { %17653 = vmatprep.mubr.f32.mxu1 %v19181_v25  ;;  %17661 = vmatpush3.msra.mxu0 %v19297_v53 }
  0x3d   :  { %17654 = vmatmul.mubr.f32.vlgmr.msra.gmra.mxu1 %v19186_v27  ;;  %17662 = vmatprep.subr.mxu0 %v19306_v55 }
  0x3e   :  { %17667 = vmatprep.subr.mxu1 %v19236_v40  ;;  %17663 = vmatpush3.msra.mxu0 %v19306_v55 }
  0x3f   :  { %17664 = vmatprep.mubr.f32.mxu0 %v19142_v13  ;;  %17668 = vmatpush3.msra.mxu1 %v19236_v40 }
  0x40   :  { %17665 = vmatmul.mubr.f32.vlgmr.msra.gmra.mxu0 %v19147_v15  ;;  %17669 = vmatprep.subr.mxu1 %v19242_v41 }
  0x41   :  { %17678 = vmatprep.subr.mxu0 %v19356_v0  ;;  %17670 = vmatpush3.msra.mxu1 %v19242_v41 }
  0x42   :  { %17679 = vmatpush3.msra.mxu0 %v19356_v0  ;;  %17671 = vmatprep.subr.mxu1 %v19259_v45 }
  0x43   :  { %17680 = vmatprep.subr.mxu0 %v19362_v1  ;;  %17672 = vmatpush3.msra.mxu1 %v19259_v45 }
  0x44   :  { %17681 = vmatpush3.msra.mxu0 %v19362_v1  ;;  %17673 = vmatprep.subr.mxu1 %v19268_v47 }
  0x45   :  { %17682 = vmatprep.subr.mxu0 %v19379_v8  ;;  %17674 = vmatpush3.msra.mxu1 %v19268_v47 }
  0x46   :  { %17675 = vmatprep.mubr.f32.mxu1 %v19142_v13  ;;  %17683 = vmatpush3.msra.mxu0 %v19379_v8 }
  0x47   :  { %17676 = vmatmul.mubr.f32.vlgmr.msra.gmra.mxu1 %v19147_v15  ;;  %17684 = vmatprep.subr.mxu0 %v19388_v11 }
  0x48   :  { %17689 = vmatprep.subr.mxu1 %v19430_v42  ;;  %17685 = vmatpush3.msra.mxu0 %v19388_v11 }
  0x49   :  { %17690 = vmatpush3.msra.mxu1 %v19430_v42  ;;  %17686 = vmatprep.mubr.f32.mxu0 %v19204_v34 }
  0x4a   :  { %17691 = vmatprep.subr.mxu1 %v19438_v52  ;;  %17700 = vmatprep.subr.mxu0 %v19375_v7 }
  0x4b   :  { %17687 = vmatmul.mubr.f32.vlgmr.msra.gmra.mxu0 %v19207_v35  ;;  %17692 = vmatpush3.msra.mxu1 %v19438_v52 }
  0x4c   :  { %17701 = vmatpush3.msra.mxu0 %v19375_v7  ;;  %17693 = vmatprep.subr.mxu1 %v19448_v57 }
  0x4d   :  { %17702 = vmatprep.subr.mxu0 %v19384_v10  ;;  %17694 = vmatpush3.msra.mxu1 %v19448_v57 }
  0x4e   :  { %17703 = vmatpush3.msra.mxu0 %v19384_v10  ;;  %17695 = vmatprep.subr.mxu1 %v19454_v59 }
  0x4f   :  { %17704 = vmatprep.subr.mxu0 %v19398_v26  ;;  %17696 = vmatpush3.msra.mxu1 %v19454_v59 }
  0x50   :  { %17697 = vmatprep.mubr.f32.mxu1 %v19142_v13  ;;  %17705 = vmatpush3.msra.mxu0 %v19398_v26  ;;  %v19504_v26 = vand.u32 4294901760, %v30_v38 }
  0x51   :  { %17698 = vmatmul.mubr.f32.vlgmr.msra.gmra.mxu1 %v19147_v15  ;;  %17706 = vmatprep.subr.mxu0 %v19408_v29 }
  0x52   :  { %17711 = vmatprep.subr.mxu1 %v19356_v0  ;;  %17707 = vmatpush3.msra.mxu0 %v19408_v29  ;;  %v19502_v29 = vsub.f32 %v32_v63, %v19483_v31  ;;  %20944 = vst [vmem:[#allocation33_spill] sm:$0xff] %v19504_v26 }
  0x53   :  { %17708 = vmatprep.mubr.f32.mxu0 %v19161_v19  ;;  %17712 = vmatpush3.msra.mxu1 %v19356_v0 }
  0x54   :  { %17709 = vmatmul.mubr.f32.vlgmr.msra.gmra.mxu0 %v19167_v21  ;;  %17713 = vmatprep.subr.mxu1 %v19362_v1  ;;  %20943 = vst [vmem:[#allocation32_spill] sm:$0xff] %v19502_v29  ;;  %v19521_v63 = vand.u32 4294901760, %v19502_v29 }
  0x55   :  { %17722 = vmatprep.subr.mxu0 %v19393_v24  ;;  %17714 = vmatpush3.msra.mxu1 %v19362_v1 }
  0x56   :  { %17723 = vmatpush3.msra.mxu0 %v19393_v24  ;;  %17715 = vmatprep.subr.mxu1 %v19379_v8  ;;  %v19514_v24 = vsub.f32 %v31_v6, %v19495_v54  ;;  %20947 = vst [vmem:[#allocation36_spill] sm:$0xff] %v19521_v63  ;;  %v1758_v6 = vsub.f32 %v19493_v43, %v19511_v62 }
  0x57   :  { %17724 = vmatprep.subr.mxu0 %v19403_v28  ;;  %17716 = vmatpush3.msra.mxu1 %v19379_v8 }
  0x58   :  { %17725 = vmatpush3.msra.mxu0 %v19403_v28  ;;  %17717 = vmatprep.subr.mxu1 %v19388_v11  ;;  %20946 = vst [vmem:[#allocation35_spill] sm:$0xff] %v19514_v24  ;;  %v19524_v28 = vsub.f32 %v30_v38, %v19504_v26  ;;  %v1765_v38 = vsub.f32 %v19502_v29, %v19521_v63  ;;  %v19548_v10 = vand.u32 4294901760, %v1758_v6 }
  0x59   :  { %17726 = vmatprep.subr.mxu0 %v19417_v33  ;;  %17718 = vmatpush3.msra.mxu1 %v19388_v11 }
  0x5a   :  { %17719 = vmatprep.mubr.f32.mxu1 %v19181_v25  ;;  %17727 = vmatpush3.msra.mxu0 %v19417_v33  ;;  %20948 = vst [vmem:[#allocation37_spill] sm:$0xff] %v19524_v28  ;;  %v19533_v33 = vand.u32 4294901760, %v19514_v24  ;;  %20951 = vst [vmem:[#allocation40_spill] sm:$0xff] %v19548_v10  ;;  %v19556_v59 = vand.u32 4294901760, %v1765_v38 }
  0x5b   :  { %17720 = vmatmul.mubr.f32.vlgmr.msra.gmra.mxu1 %v19186_v27  ;;  %17728 = vmatprep.subr.mxu0 %v19426_v39 }
  0x5c   :  { %17733 = vmatprep.subr.mxu1 %v19356_v0  ;;  %17729 = vmatpush3.msra.mxu0 %v19426_v39  ;;  %20949 = vst [vmem:[#allocation38_spill] sm:$0xff] %v19533_v33  ;;  %v19542_v39 = vand.u32 4294901760, %v19524_v28  ;;  %v1772_v7 = vsub.f32 %v19514_v24, %v19533_v33  ;;  %20952 = vst [vmem:[#allocation41_spill] sm:$0xff] %v19556_v59 }
  0x5d   :  { %17730 = vmatprep.mubr.f32.mxu0 %v19142_v13  ;;  %17734 = vmatpush3.msra.mxu1 %v19356_v0 }
  0x5e   :  { %17731 = vmatmul.mubr.f32.vlgmr.msra.gmra.mxu0 %v19147_v15  ;;  %17735 = vmatprep.subr.mxu1 %v19362_v1  ;;  %20950 = vst [vmem:[#allocation39_spill] sm:$0xff] %v19542_v39  ;;  %v1779_v57 = vsub.f32 %v19524_v28, %v19542_v39  ;;  %v19564_v6 = vand.u32 4294901760, %v1772_v7 }
  0x5f   :  { %17744 = vmatprep.subr.mxu0 %v19474_v2  ;;  %17736 = vmatpush3.msra.mxu1 %v19362_v1 }
  0x60   :  { %17741 = vmatprep.mubr.f32.mxu1 %v19142_v13  ;;  %17737 = vmatprep.subr.mxu1 %v19379_v8  ;;  %20953 = vst [vmem:[#allocation42_spill] sm:$0xff] %v19564_v6  ;;  %v19570_v38 = vand.u32 4294901760, %v1779_v57 }
  0x61   :  { %17745 = vmatpush3.msra.mxu0 %v19474_v2  ;;  %17738 = vmatpush3.msra.mxu1 %v19379_v8 }
  0x62   :  { %17746 = vmatprep.subr.mxu0 %v19483_v31  ;;  %17739 = vmatprep.subr.mxu1 %v19388_v11  ;;  %20954 = vst [vmem:[#allocation43_spill] sm:$0xff] %v19570_v38 }
  0x63   :  { %17747 = vmatpush3.msra.mxu0 %v19483_v31  ;;  %17740 = vmatpush3.msra.mxu1 %v19388_v11 }
  0x64   :  { %17748 = vmatprep.subr.mxu0 %v19495_v54  ;;  %17742 = vmatmul.mubr.f32.vlgmr.msra.gmra.mxu1 %v19147_v15 }
  0x65   :  { %17755 = vmatprep.subr.mxu1 %v19548_v10  ;;  %17749 = vmatpush3.msra.mxu0 %v19495_v54 }
  0x66   :  { %17756 = vmatpush3.msra.mxu1 %v19548_v10  ;;  %17750 = vmatprep.subr.mxu0 %v19504_v26 }
  0x67   :  { %17757 = vmatprep.subr.mxu1 %v19556_v59  ;;  %17751 = vmatpush3.msra.mxu0 %v19504_v26 }
  0x68   :  { %17758 = vmatpush3.msra.mxu1 %v19556_v59  ;;  %17752 = vmatprep.mubr.f32.mxu0 %v19204_v34 }
  0x69   :  { %17759 = vmatprep.subr.mxu1 %v19564_v6  ;;  %17766 = vmatprep.subr.mxu0 %v19493_v43 }
  0x6a   :  { %17760 = vmatpush3.msra.mxu1 %v19564_v6  ;;  %17753 = vmatmul.mubr.f32.vlgmr.msra.gmra.mxu0 %v19207_v35 }
  0x6b   :  { %17761 = vmatprep.subr.mxu1 %v19570_v38  ;;  %17767 = vmatpush3.msra.mxu0 %v19493_v43 }
  0x6c   :  { %17762 = vmatpush3.msra.mxu1 %v19570_v38  ;;  %17763 = vmatprep.mubr.f32.mxu1 %v19142_v13 }
  0x6d   :  { %17768 = vmatprep.subr.mxu0 %v19502_v29  ;;  %17777 = vmatprep.subr.mxu1 %v19474_v2 }
  0x6e   :  { %17764 = vmatmul.mubr.f32.vlgmr.msra.gmra.mxu1 %v19147_v15  ;;  %17769 = vmatpush3.msra.mxu0 %v19502_v29 }
  0x6f   :  { %17778 = vmatpush3.msra.mxu1 %v19474_v2  ;;  %17770 = vmatprep.subr.mxu0 %v19514_v24 }
  0x70   :  { %17779 = vmatprep.subr.mxu1 %v19483_v31  ;;  %17771 = vmatpush3.msra.mxu0 %v19514_v24 }
  0x71   :  { %17780 = vmatpush3.msra.mxu1 %v19483_v31  ;;  %17772 = vmatprep.subr.mxu0 %v19524_v28 }
  0x72   :  { %17781 = vmatprep.subr.mxu1 %v19495_v54  ;;  %17773 = vmatpush3.msra.mxu0 %v19524_v28 }
  0x73   :  { %17782 = vmatpush3.msra.mxu1 %v19495_v54  ;;  %17774 = vmatprep.mubr.f32.mxu0 %v19161_v19 }
  0x74   :  { %17783 = vmatprep.subr.mxu1 %v19504_v26  ;;  %17788 = vmatprep.subr.mxu0 %v19511_v62 }
  0x75   :  { %17775 = vmatmul.mubr.f32.vlgmr.msra.gmra.mxu0 %v19167_v21  ;;  %17784 = vmatpush3.msra.mxu1 %v19504_v26 }
  0x76   :  { %17789 = vmatpush3.msra.mxu0 %v19511_v62  ;;  %17785 = vmatprep.mubr.f32.mxu1 %v19181_v25 }
  0x77   :  { %17790 = vmatprep.subr.mxu0 %v19521_v63  ;;  %17799 = vmatprep.subr.mxu1 %v19474_v2 }
  0x78   :  { %17786 = vmatmul.mubr.f32.vlgmr.msra.gmra.mxu1 %v19186_v27  ;;  %17791 = vmatpush3.msra.mxu0 %v19521_v63 }
  0x79   :  { %17800 = vmatpush3.msra.mxu1 %v19474_v2  ;;  %17792 = vmatprep.subr.mxu0 %v19533_v33 }
  0x7a   :  { %17801 = vmatprep.subr.mxu1 %v19483_v31  ;;  %17793 = vmatpush3.msra.mxu0 %v19533_v33 }
  0x7b   :  { %17802 = vmatpush3.msra.mxu1 %v19483_v31  ;;  %17794 = vmatprep.subr.mxu0 %v19542_v39 }
  0x7c   :  { %17803 = vmatprep.subr.mxu1 %v19495_v54  ;;  %17795 = vmatpush3.msra.mxu0 %v19542_v39 }
  0x7d   :  { %17796 = vmatprep.mubr.f32.mxu0 %v19142_v13  ;;  %17804 = vmatpush3.msra.mxu1 %v19495_v54 }
  0x7e   :  { %17797 = vmatmul.mubr.f32.vlgmr.msra.gmra.mxu0 %v19147_v15  ;;  %17805 = vmatprep.subr.mxu1 %v19504_v26 }
  0x7f   :  { %17807 = vmatprep.mubr.f32.mxu1 %v19142_v13  ;;  %17806 = vmatpush3.msra.mxu1 %v19504_v26 }
  0x80   :  { %17808 = vmatmul.mubr.f32.vlgmr.msra.gmra.mxu1 %v19147_v15 }
  0xd0   :  { %v17556_v19 = vpop.f32.mrf.mxu0 }
  0xd2   :  { %v132_v21 = vpop.f32.mrf.mxu0 }
  0xd4   :  { %v17567_v25 = vpop.f32.mrf.mxu1 }
  0xd5   :  { %v240_v35 = vadd.f32 %v17567_v25, %v17556_v19 }
  0xd6   :  { %v233_v27 = vpop.f32.mrf.mxu1 }
  0xd7   :  { %v234_v57 = vadd.f32 %v233_v27, %v132_v21 }
  0xd8   :  { %v17578_v34 = vpop.f32.mrf.mxu0 }
  0xd9   :  { %v327_v33 = vadd.f32 %v17578_v34, %v240_v35 }
  0xda   :  { %v319_v39 = vpop.f32.mrf.mxu0 }
  0xdb   :  { %v320_v28 = vadd.f32 %v319_v39, %v234_v57 }
  0xdf   :  { %v17589_v7 = vpop.f32.mrf.mxu1 }
  0xe0   :  { %v412_v24 = vadd.f32 %v17589_v7, %v327_v33 }
  0xe1   :  { %v403_v63 = vpop.f32.mrf.mxu1 }
  0xe2   :  { %v17600_v62 = vpop.f32.mrf.mxu0  ;;  %v404_v29 = vadd.f32 %v403_v63, %v320_v28 }
  0xe3   :  { %v501_v43 = vadd.f32 %v17600_v62, %v412_v24 }
  0xe4   :  { %v494_v13 = vpop.f32.mrf.mxu0 }
  0xe5   :  { %v495_v6 = vadd.f32 %v494_v13, %v404_v29 }
  0xe9   :  { %v17611_v38 = vpop.f32.mrf.mxu1 }
  0xea   :  { %v19622_v15 = vadd.f32 %v17611_v38, %v501_v43 }
  0xeb   :  { %v575_v26 = vpop.f32.mrf.mxu1 }
  0xec   :  { %v19624_v59 = vadd.f32 %v575_v26, %v495_v6  ;;  %2173 = vrot.lane.b32.xlu0 %v19622_v15, %s19079_s1 }
  0xed   :  { %v17622_v28 = vpop.f32.mrf.mxu0 }
  0xee   :  { %v2176_v19 = vsel %vm2175_vm1, %v19624_v59, 0 }
  0xef   :  { %v19630_v39 = vand.u32 4294901760, %v2176_v19  ;;  %v660_v43 = vpop.f32.mrf.mxu0 }
  0xf0   :  { %2171 = vrot.lane.b32.xlu0 %v19624_v59, %s19079_s1 }
  0xf1   :  { %v19635_v24 = vsub.f32 %v2176_v19, %v19630_v39  ;;  %17821 = vmatprep.mubr.f32.mxu1 %v19630_v39 }
  0xf3   :  { %v20875_v26 = vand.u32 4294901760, %v19635_v24  ;;  %v17633_v62 = vpop.f32.mrf.mxu1 }
  0xf4   :  { %v768_v63 = vadd.f32 %v17633_v62, %v17622_v28 }
  0xf5   :  { %v2254_v29 = vsub.f32 %v19635_v24, %v20875_v26  ;;  %v761_v6 = vpop.f32.mrf.mxu1 }
  0xf6   :  { %v17644_v38 = vpop.f32.mrf.mxu0  ;;  %v762_v25 = vadd.f32 %v761_v6, %v660_v43 }
  0xf7   :  { %v2255_v33 = vand.u32 4294901760, %v2254_v29  ;;  %v855_v27 = vadd.f32 %v17644_v38, %v768_v63 }
  0xf8   :  { %v847_v34 = vpop.f32.mrf.mxu0 }
  0xf9   :  { %17814 = vmatprep.mubr.f32.mxu0 %v2255_v33  ;;  %v848_v13 = vadd.f32 %v847_v34, %v762_v25 }
  0xfd   :  { %v17655_v21 = vpop.f32.mrf.mxu1 }
  0xfe   :  { %v940_v35 = vadd.f32 %v17655_v21, %v855_v27 }
  0xff   :  { %v931_v7 = vpop.f32.mrf.mxu1 }
 0x100   :  { %v17666_v57 = vpop.f32.mrf.mxu0  ;;  %v932_v19 = vadd.f32 %v931_v7, %v848_v13 }
 0x101   :  { %v1029_v54 = vadd.f32 %v17666_v57, %v940_v35 }
 0x102   :  { %v1022_v10 = vpop.f32.mrf.mxu0 }
 0x103   :  { %v1023_v2 = vadd.f32 %v1022_v10, %v932_v19 }
 0x107   :  { %v17677_v31 = vpop.f32.mrf.mxu1 }
 0x108   :  { %v19642_v26 = vadd.f32 %v17677_v31, %v1029_v54 }
 0x109   :  { %v1103_v29 = vpop.f32.mrf.mxu1 }
 0x10a   :  { %2690 = vrot.lane.b32.xlu1 %v19642_v26, %s19079_s1  ;;  %v19646_v28 = vadd.f32 %v1103_v29, %v1023_v2 }
 0x10b   :  { %v17688_v33 = vpop.f32.mrf.mxu0 }
 0x10d   :  { %v1188_v43 = vpop.f32.mrf.mxu0 }
 0x10e   :  { %2688 = vrot.lane.b32.xlu1 %v19646_v28, %s19079_s1 }
 0x111   :  { %v17699_v62 = vpop.f32.mrf.mxu1 }
 0x112   :  { %v1296_v38 = vadd.f32 %v17699_v62, %v17688_v33 }
 0x113   :  { %v1289_v63 = vpop.f32.mrf.mxu1 }
 0x114   :  { %v17710_v6 = vpop.f32.mrf.mxu0  ;;  %v1290_v25 = vadd.f32 %v1289_v63, %v1188_v43 }
 0x115   :  { %v1383_v54 = vadd.f32 %v17710_v6, %v1296_v38 }
 0x116   :  { %v1375_v31 = vpop.f32.mrf.mxu0 }
 0x117   :  { %v1376_v34 = vadd.f32 %v1375_v31, %v1290_v25 }
 0x11b   :  { %v17721_v21 = vpop.f32.mrf.mxu1 }
 0x11c   :  { %v1468_v35 = vadd.f32 %v17721_v21, %v1383_v54 }
 0x11d   :  { %v1459_v27 = vpop.f32.mrf.mxu1 }
 0x11e   :  { %v17732_v10 = vpop.f32.mrf.mxu0  ;;  %v1460_v7 = vadd.f32 %v1459_v27, %v1376_v34 }
 0x11f   :  { %v1557_v57 = vadd.f32 %v17732_v10, %v1468_v35 }
 0x120   :  { %v1550_v2 = vpop.f32.mrf.mxu0 }
 0x121   :  { %v1551_v19 = vadd.f32 %v1550_v2, %v1460_v7 }
 0x124   :  { %v17743_v13 = vpop.f32.mrf.mxu1 }
 0x125   :  { %v19650_v29 = vadd.f32 %v17743_v13, %v1557_v57 }
 0x126   :  { %v1631_v11 = vpop.f32.mrf.mxu1 }
 0x127   :  { %v19652_v52 = vadd.f32 %v1631_v11, %v1551_v19  ;;  %3206 = vrot.lane.b32.xlu0 %v19650_v29, %s19079_s1 }
 0x129   :  { %3204 = vrot.lane.b32.xlu1 %v19652_v52, %s19079_s1 }
 0x12a   :  { %v17754_v33 = vpop.f32.mrf.mxu0 }
 0x12c   :  { %v1716_v62 = vpop.f32.mrf.mxu0 }
 0x12e   :  { %v17765_v43 = vpop.f32.mrf.mxu1 }
 0x12f   :  { %v1824_v6 = vadd.f32 %v17765_v43, %v17754_v33 }
 0x130   :  { %v1817_v63 = vpop.f32.mrf.mxu1 }
 0x131   :  { %v1818_v38 = vadd.f32 %v1817_v63, %v1716_v62 }
 0x135   :  { %v17776_v21 = vpop.f32.mrf.mxu0 }
 0x136   :  { %v1911_v25 = vadd.f32 %v17776_v21, %v1824_v6 }
 0x137   :  { %v1903_v31 = vpop.f32.mrf.mxu0 }
 0x138   :  { %v17787_v54 = vpop.f32.mrf.mxu1  ;;  %v1904_v27 = vadd.f32 %v1903_v31, %v1818_v38 }
 0x139   :  { %v1996_v11 = vadd.f32 %v17787_v54, %v1911_v25 }
 0x13a   :  { %v1987_v10 = vpop.f32.mrf.mxu1 }
 0x13b   :  { %v1988_v34 = vadd.f32 %v1987_v10, %v1904_v27 }
 0x13e   :  { %v17798_v35 = vpop.f32.mrf.mxu0 }
 0x13f   :  { %v2085_v7 = vadd.f32 %v17798_v35, %v1996_v11  ;;  %v2692_v11 = vsel %vm2175_vm1, %v19646_v28, 0 }
 0x140   :  { %v2078_v2 = vpop.f32.mrf.mxu0  ;;  %v17809_v13 = vpop.f32.mrf.mxu1 }
 0x141   :  { %v2079_v57 = vadd.f32 %v2078_v2, %v1988_v34  ;;  %v19658_v19 = vadd.f32 %v17809_v13, %v2085_v7  ;;  %v19681_v2 = vand.u32 4294901760, %v2692_v11 }
 0x142   :  { %v2159_v8 = vpop.f32.mrf.mxu1 }
 0x143   :  { %v19660_v42 = vadd.f32 %v2159_v8, %v2079_v57  ;;  %3722 = vrot.lane.b32.xlu0 %v19658_v19, %s19079_s1  ;;  %v2178_v8 = vsel %vm2175_vm1, %v19622_v15, 0 }
 0x144   :  { %v19674_v33 = vand.u32 4294901760, %v2178_v8 }
 0x145   :  { %3720 = vrot.lane.b32.xlu1 %v19660_v42, %s19079_s1 }
 0x146   :  { %v2262_v43 = vsub.f32 %v2178_v8, %v19674_v33  ;;  %v19685_v8 = vsub.f32 %v2692_v11, %v19681_v2 }
 0x147   :  { %4307 = vrot.lane.b32.xlu0 %v19624_v59, %s19080_s25 }
 0x148   :  { %v2263_v38 = vand.u32 4294901760, %v2262_v43 }
 0x149   :  { %4309 = vrot.lane.b32.xlu1 %v19622_v15, %s19080_s25 }
 0x14a   :  { %v2264_v54 = vsub.f32 %v2262_v43, %v2263_v38 }
 0x14c   :  { %v2265_v34 = vand.u32 4294901760, %v2264_v54 }
 0x14d   :  { %4823 = vrot.lane.b32.xlu1 %v19642_v26, %s19080_s25 }
 0x15e   :  { %v2174_v62 = vpop.permute.xlu0 %2173 }
 0x15f   :  { %v2182_v63 = vsel %vm2175_vm1, %v2174_v62, 0  ;;  %v2769_v62 = vand.u32 4294901760, %v19685_v8 }
 0x160   :  { %v2213_v6 = vand.u32 4294901760, %v2182_v63 }
 0x162   :  { %v2301_v21 = vsub.f32 %v2182_v63, %v2213_v6  ;;  %17810 = vmatprep.subr.mxu0 %v2213_v6  ;;  %v2172_v59 = vpop.permute.xlu0 %2171  ;;  %v2694_v63 = vsel %vm2175_vm1, %v19642_v26, 0 }
 0x163   :  { %v2180_v25 = vsel %vm2175_vm1, %v2172_v59, 0  ;;  %17811 = vmatpush3.xpose.msra.mxu0 %v2213_v6  ;;  %v19694_v59 = vand.u32 4294901760, %v2694_v63 }
 0x164   :  { %v2216_v31 = vand.u32 4294901760, %v2180_v25  ;;  %v2302_v27 = vand.u32 4294901760, %v2301_v21 }
 0x165   :  { %v19700_v26 = vsub.f32 %v2694_v63, %v19694_v59 }
 0x166   :  { %v2308_v10 = vsub.f32 %v2180_v25, %v2216_v31  ;;  %17812 = vmatprep.subr.mxu0 %v2216_v31  ;;  %v2303_v15 = vsub.f32 %v2301_v21, %v2302_v27 }
 0x167   :  { %17813 = vmatpush3.xpose.msra.mxu0 %v2216_v31 }
 0x168   :  { %17824 = vmatprep.subr.mxu0 %v2301_v21  ;;  %v2304_v35 = vand.u32 4294901760, %v2303_v15  ;;  %v2309_v7 = vand.u32 4294901760, %v2308_v10 }
 0x16a   :  { %17815 = vmatmul.mubr.f32.vlgmr.msra.gmra.mxu0 %v2265_v34  ;;  %17817 = vmatprep.subr.mxu1 %v2304_v35  ;;  %v2310_v57 = vsub.f32 %v2308_v10, %v2309_v7 }
 0x16b   :  { %17818 = vmatpush3.xpose.msra.mxu1 %v2304_v35  ;;  %17825 = vmatpush3.xpose.msra.mxu0 %v2301_v21  ;;  %v20955_v21 = vand.u32 4294901760, %v19635_v24 }
 0x16c   :  { %17828 = vmatprep.mubr.f32.mxu0 %v19635_v24  ;;  %17826 = vmatprep.subr.mxu0 %v2308_v10  ;;  %v2311_v13 = vand.u32 4294901760, %v2310_v57 }
 0x16e   :  { %17819 = vmatprep.subr.mxu1 %v2311_v13 }
 0x16f   :  { %17820 = vmatpush3.xpose.msra.mxu1 %v2311_v13  ;;  %17827 = vmatpush3.xpose.msra.mxu0 %v2308_v10  ;;  %v2779_v10 = vand.u32 4294901760, %v19700_v26 }
 0x170   :  { %17831 = vmatprep.subr.mxu1 %v2213_v6  ;;  %17838 = vmatprep.subr.mxu0 %v2302_v27 }
 0x172   :  { %17822 = vmatmul.mubr.f32.vlgmr.msra.gmra.mxu1 %v19674_v33  ;;  %17829 = vmatmul.mubr.f32.vlgmr.msra.gmra.mxu0 %v2262_v43  ;;  %v2770_v43 = vsub.f32 %v19685_v8, %v2769_v62 }
 0x173   :  { %17832 = vmatpush3.xpose.msra.mxu1 %v2213_v6  ;;  %17835 = vmatprep.mubr.f32.mxu1 %v20955_v21 }
 0x174   :  { %17839 = vmatpush3.xpose.msra.mxu0 %v2302_v27  ;;  %17842 = vmatprep.mubr.f32.mxu0 %v19630_v39  ;;  %v2771_v24 = vand.u32 4294901760, %v2770_v43 }
 0x175   :  { %17833 = vmatprep.subr.mxu1 %v2216_v31  ;;  %17840 = vmatprep.subr.mxu0 %v2309_v7 }
 0x177   :  { %17834 = vmatpush3.xpose.msra.mxu1 %v2216_v31 }
 0x178   :  { %17841 = vmatpush3.xpose.msra.mxu0 %v2309_v7  ;;  %17845 = vmatprep.subr.mxu1 %v2213_v6 }
 0x17a   :  { %17836 = vmatmul.mubr.f32.vlgmr.msra.gmra.mxu1 %v2263_v38 }
 0x17b   :  { %17843 = vmatmul.mubr.f32.vlgmr.msra.gmra.mxu0 %v19674_v33  ;;  %17846 = vmatpush3.xpose.msra.mxu1 %v2213_v6  ;;  %v2780_v6 = vsub.f32 %v19700_v26, %v2779_v10 }
 0x17c   :  { %v2691_v25 = vpop.permute.xlu1 %2690  ;;  %17849 = vmatprep.mubr.f32.mxu1 %v19630_v39  ;;  %17856 = vmatprep.mubr.f32.mxu0 %v2771_v24 }
 0x17d   :  { %v2698_v54 = vsel %vm2175_vm1, %v2691_v25, 0  ;;  %17847 = vmatprep.subr.mxu1 %v2216_v31  ;;  %v2781_v57 = vand.u32 4294901760, %v2780_v6 }
 0x17e   :  { %v2729_v27 = vand.u32 4294901760, %v2698_v54 }
 0x17f   :  { %17848 = vmatpush3.xpose.msra.mxu1 %v2216_v31  ;;  %v3208_v31 = vsel %vm2175_vm1, %v19652_v52, 0 }
 0x180   :  { %v2817_v15 = vsub.f32 %v2698_v54, %v2729_v27  ;;  %v2689_v11 = vpop.permute.xlu1 %2688  ;;  %17852 = vmatprep.subr.mxu0 %v2729_v27  ;;  %v19712_v21 = vand.u32 4294901760, %v3208_v31  ;;  %v3210_v54 = vsel %vm2175_vm1, %v19650_v29, 0 }
 0x181   :  { %v2696_v38 = vsel %vm2175_vm1, %v2689_v11, 0  ;;  %17853 = vmatpush3.xpose.msra.mxu0 %v2729_v27 }
 0x182   :  { %v2732_v34 = vand.u32 4294901760, %v2696_v38  ;;  %17850 = vmatmul.mubr.f32.vlgmr.msra.gmra.mxu1 %v19674_v33  ;;  %v2818_v39 = vand.u32 4294901760, %v2817_v15  ;;  %v19716_v24 = vsub.f32 %v3208_v31, %v19712_v21 }
 0x183   :  { %17863 = vmatprep.mubr.f32.mxu1 %v19681_v2 }
 0x184   :  { %v2824_v35 = vsub.f32 %v2696_v38, %v2732_v34  ;;  %17854 = vmatprep.subr.mxu0 %v2732_v34  ;;  %v2819_v7 = vsub.f32 %v2817_v15, %v2818_v39  ;;  %v3285_v25 = vand.u32 4294901760, %v19716_v24 }
 0x185   :  { %17855 = vmatpush3.xpose.msra.mxu0 %v2732_v34 }
 0x186   :  { %17866 = vmatprep.subr.mxu0 %v2817_v15  ;;  %v2820_v13 = vand.u32 4294901760, %v2819_v7  ;;  %v2825_v63 = vand.u32 4294901760, %v2824_v35 }
 0x188   :  { %17857 = vmatmul.mubr.f32.vlgmr.msra.gmra.mxu0 %v2781_v57  ;;  %17859 = vmatprep.subr.mxu1 %v2820_v13  ;;  %v2826_v33 = vsub.f32 %v2824_v35, %v2825_v63 }
 0x189   :  { %17860 = vmatpush3.xpose.msra.mxu1 %v2820_v13  ;;  %17867 = vmatpush3.xpose.msra.mxu0 %v2817_v15  ;;  %v19726_v15 = vand.u32 4294901760, %v3210_v54 }
 0x18a   :  { %17870 = vmatprep.mubr.f32.mxu0 %v19685_v8  ;;  %17868 = vmatprep.subr.mxu0 %v2824_v35  ;;  %v2827_v43 = vand.u32 4294901760, %v2826_v33 }
 0x18b   :  { %v19732_v11 = vsub.f32 %v3210_v54, %v19726_v15 }
 0x18c   :  { %17861 = vmatprep.subr.mxu1 %v2827_v43 }
 0x18d   :  { %17862 = vmatpush3.xpose.msra.mxu1 %v2827_v43  ;;  %17869 = vmatpush3.xpose.msra.mxu0 %v2824_v35  ;;  %v3295_v35 = vand.u32 4294901760, %v19732_v11 }
 0x18e   :  { %17873 = vmatprep.subr.mxu1 %v2729_v27  ;;  %17880 = vmatprep.subr.mxu0 %v2818_v39 }
 0x190   :  { %17864 = vmatmul.mubr.f32.vlgmr.msra.gmra.mxu1 %v19694_v59  ;;  %17871 = vmatmul.mubr.f32.vlgmr.msra.gmra.mxu0 %v19700_v26  ;;  %v3286_v26 = vsub.f32 %v19716_v24, %v3285_v25 }
 0x191   :  { %17874 = vmatpush3.xpose.msra.mxu1 %v2729_v27  ;;  %17877 = vmatprep.mubr.f32.mxu1 %v2769_v62 }
 0x192   :  { %17881 = vmatpush3.xpose.msra.mxu0 %v2818_v39  ;;  %17884 = vmatprep.mubr.f32.mxu0 %v19681_v2  ;;  %v3287_v8 = vand.u32 4294901760, %v3286_v26 }
 0x193   :  { %17875 = vmatprep.subr.mxu1 %v2732_v34  ;;  %17882 = vmatprep.subr.mxu0 %v2825_v63 }
 0x195   :  { %17876 = vmatpush3.xpose.msra.mxu1 %v2732_v34 }
 0x196   :  { %17883 = vmatpush3.xpose.msra.mxu0 %v2825_v63  ;;  %17887 = vmatprep.subr.mxu1 %v2729_v27 }
 0x198   :  { %17878 = vmatmul.mubr.f32.vlgmr.msra.gmra.mxu1 %v2779_v10 }
 0x199   :  { %17885 = vmatmul.mubr.f32.vlgmr.msra.gmra.mxu0 %v19694_v59  ;;  %17888 = vmatpush3.xpose.msra.mxu1 %v2729_v27  ;;  %v3207_v62 = vpop.permute.xlu0 %3206 }
 0x19a   :  { %17891 = vmatprep.mubr.f32.mxu1 %v19681_v2  ;;  %17898 = vmatprep.mubr.f32.mxu0 %v3287_v8  ;;  %v3214_v38 = vsel %vm2175_vm1, %v3207_v62, 0  ;;  %v3296_v2 = vsub.f32 %v19732_v11, %v3295_v35  ;;  %v3726_v62 = vsel %vm2175_vm1, %v19658_v19, 0 }
 0x19b   :  { %17889 = vmatprep.subr.mxu1 %v2732_v34  ;;  %v3245_v6 = vand.u32 4294901760, %v3214_v38  ;;  %v3205_v39 = vpop.permute.xlu1 %3204 }
 0x19c   :  { %v3212_v7 = vsel %vm2175_vm1, %v3205_v39, 0  ;;  %v3297_v33 = vand.u32 4294901760, %v3296_v2  ;;  %v19762_v39 = vand.u32 4294901760, %v3726_v62 }
 0x19d   :  { %17890 = vmatpush3.xpose.msra.mxu1 %v2732_v34  ;;  %v3333_v31 = vsub.f32 %v3214_v38, %v3245_v6  ;;  %v19739_v10 = vand.u32 4294901760, %v3212_v7  ;;  %17894 = vmatprep.subr.mxu0 %v3245_v6  ;;  %v3724_v34 = vsel %vm2175_vm1, %v19660_v42, 0 }
 0x19e   :  { %17895 = vmatpush3.xpose.msra.mxu0 %v3245_v6  ;;  %v19749_v26 = vand.u32 4294901760, %v3724_v34 }
 0x19f   :  { %v3340_v27 = vsub.f32 %v3212_v7, %v19739_v10  ;;  %17896 = vmatprep.subr.mxu0 %v19739_v10  ;;  %v3334_v57 = vand.u32 4294901760, %v3333_v31 }
 0x1a0   :  { %17892 = vmatmul.mubr.f32.vlgmr.msra.gmra.mxu1 %v19694_v59  ;;  %v19753_v8 = vsub.f32 %v3724_v34, %v19749_v26 }
 0x1a1   :  { %17905 = vmatprep.mubr.f32.mxu1 %v19712_v21  ;;  %v3335_v13 = vsub.f32 %v3333_v31, %v3334_v57  ;;  %v3341_v63 = vand.u32 4294901760, %v3340_v27 }
 0x1a2   :  { %17897 = vmatpush3.xpose.msra.mxu0 %v19739_v10  ;;  %v3801_v38 = vand.u32 4294901760, %v19753_v8 }
 0x1a3   :  { %17908 = vmatprep.subr.mxu0 %v3333_v31  ;;  %v3336_v43 = vand.u32 4294901760, %v3335_v13  ;;  %v3342_v54 = vsub.f32 %v3340_v27, %v3341_v63 }
 0x1a4   :  { %v3802_v7 = vsub.f32 %v19753_v8, %v3801_v38 }
 0x1a5   :  { %17899 = vmatmul.mubr.f32.vlgmr.msra.gmra.mxu0 %v3297_v33  ;;  %17901 = vmatprep.subr.mxu1 %v3336_v43  ;;  %v3343_v59 = vand.u32 4294901760, %v3342_v54 }
 0x1a6   :  { %17902 = vmatpush3.xpose.msra.mxu1 %v3336_v43  ;;  %17909 = vmatpush3.xpose.msra.mxu0 %v3333_v31 }
 0x1a7   :  { %17912 = vmatprep.mubr.f32.mxu0 %v19716_v24  ;;  %17903 = vmatprep.subr.mxu1 %v3343_v59 }
 0x1a8   :  { %17910 = vmatprep.subr.mxu0 %v3340_v27 }
 0x1aa   :  { %17904 = vmatpush3.xpose.msra.mxu1 %v3343_v59  ;;  %17911 = vmatpush3.xpose.msra.mxu0 %v3340_v27 }
 0x1ab   :  { %17915 = vmatprep.subr.mxu1 %v3245_v6  ;;  %17922 = vmatprep.subr.mxu0 %v3334_v57 }
 0x1ad   :  { %17906 = vmatmul.mubr.f32.vlgmr.msra.gmra.mxu1 %v19726_v15  ;;  %17913 = vmatmul.mubr.f32.vlgmr.msra.gmra.mxu0 %v19732_v11  ;;  %v19771_v11 = vsub.f32 %v3726_v62, %v19762_v39 }
 0x1ae   :  { %17916 = vmatpush3.xpose.msra.mxu1 %v3245_v6  ;;  %17919 = vmatprep.mubr.f32.mxu1 %v3285_v25  ;;  %v3803_v25 = vand.u32 4294901760, %v3802_v7 }
 0x1af   :  { %17923 = vmatpush3.xpose.msra.mxu0 %v3334_v57  ;;  %17926 = vmatprep.mubr.f32.mxu0 %v19712_v21  ;;  %v3811_v57 = vand.u32 4294901760, %v19771_v11 }
 0x1b0   :  { %17917 = vmatprep.subr.mxu1 %v19739_v10  ;;  %17924 = vmatprep.subr.mxu0 %v3341_v63 }
 0x1b2   :  { %17918 = vmatpush3.xpose.msra.mxu1 %v19739_v10 }
 0x1b3   :  { %17925 = vmatpush3.xpose.msra.mxu0 %v3341_v63  ;;  %17929 = vmatprep.subr.mxu1 %v3245_v6 }
 0x1b5   :  { %v3723_v24 = vpop.permute.xlu0 %3722  ;;  %17920 = vmatmul.mubr.f32.vlgmr.msra.gmra.mxu1 %v3295_v35 }
 0x1b6   :  { %v3730_v31 = vsel %vm2175_vm1, %v3723_v24, 0  ;;  %17927 = vmatmul.mubr.f32.vlgmr.msra.gmra.mxu0 %v19726_v15  ;;  %17930 = vmatpush3.xpose.msra.mxu1 %v3245_v6  ;;  %v3812_v6 = vsub.f32 %v19771_v11, %v3811_v57 }
 0x1b7   :  { %v3761_v27 = vand.u32 4294901760, %v3730_v31  ;;  %v3721_v2 = vpop.permute.xlu1 %3720  ;;  %17933 = vmatprep.mubr.f32.mxu1 %v19712_v21  ;;  %17940 = vmatprep.mubr.f32.mxu0 %v3803_v25 }
 0x1b8   :  { %v3728_v13 = vsel %vm2175_vm1, %v3721_v2, 0  ;;  %17931 = vmatprep.subr.mxu1 %v19739_v10  ;;  %v3813_v54 = vand.u32 4294901760, %v3812_v6 }
 0x1b9   :  { %v3849_v63 = vsub.f32 %v3730_v31, %v3761_v27  ;;  %v3764_v34 = vand.u32 4294901760, %v3728_v13  ;;  %17936 = vmatprep.subr.mxu0 %v3761_v27  ;;  %v4308_v24 = vpop.permute.xlu0 %4307 }
 0x1ba   :  { %17937 = vmatpush3.xpose.msra.mxu0 %v3761_v27  ;;  %17932 = vmatpush3.xpose.msra.mxu1 %v19739_v10  ;;  %v19786_v25 = vand.u32 4294901760, %v4308_v24 }
 0x1bb   :  { %v3856_v35 = vsub.f32 %v3728_v13, %v3764_v34  ;;  %17938 = vmatprep.subr.mxu0 %v3764_v34  ;;  %v3850_v33 = vand.u32 4294901760, %v3849_v63  ;;  %v4310_v10 = vpop.permute.xlu1 %4309 }
 0x1bc   :  { %v19797_v2 = vsub.f32 %v4308_v24, %v19786_v25 }
 0x1bd   :  { %17934 = vmatmul.mubr.f32.vlgmr.msra.gmra.mxu1 %v19726_v15  ;;  %v3851_v21 = vsub.f32 %v3849_v63, %v3850_v33  ;;  %v3857_v43 = vand.u32 4294901760, %v3856_v35  ;;  %v19784_v15 = vand.u32 4294901760, %v4310_v10 }
 0x1be   :  { %17939 = vmatpush3.xpose.msra.mxu0 %v3764_v34  ;;  %17947 = vmatprep.mubr.f32.mxu1 %v19749_v26 }
 0x1bf   :  { %v3852_v59 = vand.u32 4294901760, %v3851_v21  ;;  %17950 = vmatprep.subr.mxu0 %v3849_v63  ;;  %v3858_v62 = vsub.f32 %v3856_v35, %v3857_v43  ;;  %v19789_v31 = vsub.f32 %v4310_v10, %v19784_v15  ;;  %v19081_v21 = vmov -1e+30  }
 0x1c1   :  { %17941 = vmatmul.mubr.f32.vlgmr.msra.gmra.mxu0 %v3813_v54  ;;  %17943 = vmatprep.subr.mxu1 %v3852_v59  ;;  %v3859_v7 = vand.u32 4294901760, %v3858_v62  ;;  %v19800_v13 = vand.u32 4294901760, %v19789_v31 }
 0x1c2   :  { %17944 = vmatpush3.xpose.msra.mxu1 %v3852_v59  ;;  %17951 = vmatpush3.xpose.msra.mxu0 %v3849_v63 }
 0x1c3   :  { %17954 = vmatprep.mubr.f32.mxu0 %v19753_v8  ;;  %17945 = vmatprep.subr.mxu1 %v3859_v7  ;;  %v4438_v8 = vsub.f32 %v19789_v31, %v19800_v13 }
 0x1c4   :  { %17952 = vmatprep.subr.mxu0 %v3856_v35 }
 0x1c6   :  { %17946 = vmatpush3.xpose.msra.mxu1 %v3859_v7  ;;  %17953 = vmatpush3.xpose.msra.mxu0 %v3856_v35 }
 0x1c7   :  { %17957 = vmatprep.subr.mxu1 %v3761_v27  ;;  %17964 = vmatprep.subr.mxu0 %v3850_v33 }
 0x1c9   :  { %17948 = vmatmul.mubr.f32.vlgmr.msra.gmra.mxu1 %v19762_v39  ;;  %17955 = vmatmul.mubr.f32.vlgmr.msra.gmra.mxu0 %v19771_v11  ;;  %v4439_v11 = vand.u32 4294901760, %v4438_v8 }
 0x1ca   :  { %17958 = vmatpush3.xpose.msra.mxu1 %v3761_v27  ;;  %17961 = vmatprep.mubr.f32.mxu1 %v3801_v38  ;;  %v19806_v38 = vand.u32 4294901760, %v19797_v2 }
 0x1cb   :  { %17965 = vmatpush3.xpose.msra.mxu0 %v3850_v33  ;;  %17968 = vmatprep.mubr.f32.mxu0 %v19749_v26 }
 0x1cc   :  { %17959 = vmatprep.subr.mxu1 %v3764_v34  ;;  %17966 = vmatprep.subr.mxu0 %v3857_v43 }
 0x1ce   :  { %17960 = vmatpush3.xpose.msra.mxu1 %v3764_v34 }
 0x1cf   :  { %17967 = vmatpush3.xpose.msra.mxu0 %v3857_v43  ;;  %17971 = vmatprep.subr.mxu1 %v3761_v27 }
 0x1d0   :  { %17978 = vmatprep.subr.mxu0 %v19784_v15 }
 0x1d1   :  { %17962 = vmatmul.mubr.f32.vlgmr.msra.gmra.mxu1 %v3811_v57  ;;  %v4445_v57 = vsub.f32 %v19797_v2, %v19806_v38 }
 0x1d2   :  { %17969 = vmatmul.mubr.f32.vlgmr.msra.gmra.mxu0 %v19762_v39  ;;  %17972 = vmatpush3.xpose.msra.mxu1 %v3761_v27 }
 0x1d3   :  { %17975 = vmatprep.mubr.f32.mxu1 %v19749_v26  ;;  %17979 = vmatpush3.msra.mxu0 %v19784_v15  ;;  %v4446_v27 = vand.u32 4294901760, %v4445_v57  ;;  %v39_v26 = vlaneseq }
 0x1d4   :  { %17973 = vmatprep.subr.mxu1 %v3764_v34  ;;  %17980 = vmatprep.subr.mxu0 %v19786_v25 }
 0x1d5   :  { %17981 = vmatpush3.msra.mxu0 %v19786_v25  ;;  %v40_v63 = vshrl.u32 %v39_v26, 7  ;;  %v43_v6 = vand.u32 127, %v39_v26 }
 0x1d6   :  { %17992 = vmatprep.subr.mxu0 %v19789_v31  ;;  %17974 = vmatpush3.xpose.msra.mxu1 %v3764_v34 }
 0x1d7   :  { %17985 = vmatprep.subr.mxu1 %v4439_v11  ;;  %v41_v35 = vadd.s32 8, %v40_v63  ;;  %vm44_vm3 = vcmp.le.s32.totalorder %v43_v6, %v40_v63 }
 0x1d8   :  { %v19820_v54 = vsel %vm44_vm3, 0.0, %v19081_v21 }
 0x1d9   :  { %17976 = vmatmul.mubr.f32.vlgmr.msra.gmra.mxu1 %v19762_v39  ;;  %vm45_vm2 = vcmp.le.s32.totalorder %v43_v6, %v41_v35 }
 0x1da   :  { %17986 = vmatpush3.msra.mxu1 %v4439_v11  ;;  %v19818_v43 = vsel %vm45_vm2, 0.0, %v19081_v21 }
 0x1db   :  { %17987 = vmatprep.subr.mxu1 %v4446_v27 }
 0x1dc   :  { %17988 = vmatpush3.msra.mxu1 %v4446_v27 }
 0x1dd   :  { %17999 = vmatprep.subr.mxu1 %v19784_v15 }
 0x22a   :  { %v17816_v33 = vpop.f32.mrf.mxu0 }
 0x22b   :  { %v2268_v59 = vadd.f32 %v17816_v33, %v19818_v43 }
 0x22c   :  { %v2257_v39 = vpop.f32.mrf.mxu0 }
 0x22d   :  { %v2258_v7 = vadd.f32 %v2257_v39, %v19820_v54 }
 0x232   :  { %v17823_v34 = vpop.f32.mrf.mxu1  ;;  %v17830_v24 = vpop.f32.mrf.mxu0 }
 0x233   :  { %v2355_v10 = vadd.f32 %v17823_v34, %v2268_v59 }
 0x234   :  { %v2348_v62 = vpop.f32.mrf.mxu1  ;;  %v2430_v27 = vpop.f32.mrf.mxu0 }
 0x235   :  { %v2349_v8 = vadd.f32 %v2348_v62, %v2258_v7  ;;  %v2438_v57 = vadd.f32 %v17830_v24, %v2355_v10 }
 0x237   :  { %v2431_v63 = vadd.f32 %v2430_v27, %v2349_v8 }
 0x23a   :  { %v17837_v11 = vpop.f32.mrf.mxu1 }
 0x23b   :  { %v2521_v35 = vadd.f32 %v17837_v11, %v2438_v57  ;;  %v17844_v6 = vpop.f32.mrf.mxu0 }
 0x23c   :  { %v2512_v26 = vpop.f32.mrf.mxu1 }
 0x23d   :  { %v2513_v1 = vadd.f32 %v2512_v26, %v2431_v63  ;;  %v2604_v0 = vadd.f32 %v17844_v6, %v2521_v35  ;;  %v2597_v21 = vpop.f32.mrf.mxu0 }
 0x23f   :  { %v2598_v53 = vadd.f32 %v2597_v21, %v2513_v1 }
 0x242   :  { %v17851_v55 = vpop.f32.mrf.mxu1 }
 0x243   :  { %v19824_v33 = vadd.f32 %v17851_v55, %v2604_v0 }
 0x244   :  { %v2676_v50 = vpop.f32.mrf.mxu1 }
 0x245   :  { %v19826_v39 = vadd.f32 %v2676_v50, %v2598_v53  ;;  %v4238_v34 = vsel %vm4234_vm4, %v19824_v33, -inf }
 0x246   :  { %4239 = vmax.xlane.f32.xlu1 %v4238_v34 }
 0x247   :  { %v4235_v59 = vsel %vm4234_vm4, %v19826_v39, -inf }
 0x248   :  { %4236 = vmax.xlane.f32.xlu0 %v4235_v59  ;;  %v17858_v62 = vpop.f32.mrf.mxu0 }
 0x249   :  { %v2784_v24 = vadd.f32 %v17858_v62, %v19818_v43 }
 0x24a   :  { %v2773_v10 = vpop.f32.mrf.mxu0 }
 0x24b   :  { %v2774_v55 = vadd.f32 %v2773_v10, %v19820_v54 }
 0x250   :  { %v17865_v7 = vpop.f32.mrf.mxu1  ;;  %v17872_v1 = vpop.f32.mrf.mxu0 }
 0x251   :  { %v2871_v0 = vadd.f32 %v17865_v7, %v2784_v24 }
 0x252   :  { %v2864_v8 = vpop.f32.mrf.mxu1  ;;  %v2946_v57 = vpop.f32.mrf.mxu0 }
 0x253   :  { %v2865_v50 = vadd.f32 %v2864_v8, %v2774_v55  ;;  %v2954_v11 = vadd.f32 %v17872_v1, %v2871_v0 }
 0x255   :  { %v2947_v26 = vadd.f32 %v2946_v57, %v2865_v50 }
 0x257   :  { %5337 = vrot.lane.b32.xlu1 %v19650_v29, %s19080_s25 }
 0x258   :  { %v17879_v53 = vpop.f32.mrf.mxu1 }
 0x259   :  { %v3037_v63 = vadd.f32 %v17879_v53, %v2954_v11  ;;  %v17886_v35 = vpop.f32.mrf.mxu0 }
 0x25a   :  { %v3028_v27 = vpop.f32.mrf.mxu1 }
 0x25b   :  { %v3029_v6 = vadd.f32 %v3028_v27, %v2947_v26  ;;  %v3120_v21 = vadd.f32 %v17886_v35, %v3037_v63  ;;  %v3113_v34 = vpop.f32.mrf.mxu0 }
 0x25d   :  { %v3114_v62 = vadd.f32 %v3113_v34, %v3029_v6 }
 0x260   :  { %v17893_v59 = vpop.f32.mrf.mxu1 }
 0x261   :  { %v19836_v48 = vadd.f32 %v17893_v59, %v3120_v21 }
 0x262   :  { %v3192_v7 = vpop.f32.mrf.mxu1 }
 0x263   :  { %v19838_v10 = vadd.f32 %v3192_v7, %v3114_v62  ;;  %v4244_v29 = vsel %vm4234_vm4, %v19836_v48, -inf }
 0x264   :  { %4245 = vmax.xlane.f32.xlu0 %v4244_v29 }
 0x265   :  { %v4241_v24 = vsel %vm4234_vm4, %v19838_v10, -inf  ;;  %v17900_v8 = vpop.f32.mrf.mxu0 }
 0x266   :  { %v3300_v1 = vadd.f32 %v17900_v8, %v19818_v43 }
 0x267   :  { %v3289_v0 = vpop.f32.mrf.mxu0 }
 0x268   :  { %4242 = vmax.xlane.f32.xlu0 %v4241_v24  ;;  %v3290_v53 = vadd.f32 %v3289_v0, %v19820_v54 }
 0x26d   :  { %v17907_v55 = vpop.f32.mrf.mxu1  ;;  %v17914_v57 = vpop.f32.mrf.mxu0 }
 0x26e   :  { %v3387_v11 = vadd.f32 %v17907_v55, %v3300_v1 }
 0x26f   :  { %v3380_v50 = vpop.f32.mrf.mxu1  ;;  %v3462_v35 = vpop.f32.mrf.mxu0 }
 0x270   :  { %v3381_v27 = vadd.f32 %v3380_v50, %v3290_v53  ;;  %v3470_v63 = vadd.f32 %v17914_v57, %v3387_v11 }
 0x272   :  { %v3463_v21 = vadd.f32 %v3462_v35, %v3381_v27 }
 0x275   :  { %v17921_v26 = vpop.f32.mrf.mxu1 }
 0x276   :  { %v3553_v34 = vadd.f32 %v17921_v26, %v3470_v63  ;;  %v17928_v59 = vpop.f32.mrf.mxu0 }
 0x277   :  { %v3544_v6 = vpop.f32.mrf.mxu1 }
 0x278   :  { %v3545_v62 = vadd.f32 %v3544_v6, %v3463_v21  ;;  %v3636_v7 = vadd.f32 %v17928_v59, %v3553_v34  ;;  %v3629_v29 = vpop.f32.mrf.mxu0 }
 0x27a   :  { %v3630_v51 = vadd.f32 %v3629_v29, %v3545_v62 }
 0x27d   :  { %v17935_v24 = vpop.f32.mrf.mxu1 }
 0x27e   :  { %v19846_v49 = vadd.f32 %v17935_v24, %v3636_v7 }
 0x27f   :  { %v3708_v8 = vpop.f32.mrf.mxu1 }
 0x280   :  { %v19848_v46 = vadd.f32 %v3708_v8, %v3630_v51  ;;  %v4250_v55 = vsel %vm4234_vm4, %v19846_v49, -inf }
 0x281   :  { %4251 = vmax.xlane.f32.xlu0 %v4250_v55  ;;  %v17942_v1 = vpop.f32.mrf.mxu0 }
 0x282   :  { %v4247_v0 = vsel %vm4234_vm4, %v19848_v46, -inf  ;;  %v3816_v51 = vadd.f32 %v17942_v1, %v19818_v43 }
 0x283   :  { %4248 = vmax.xlane.f32.xlu1 %v4247_v0  ;;  %v3805_v53 = vpop.f32.mrf.mxu0 }
 0x284   :  { %v3806_v57 = vadd.f32 %v3805_v53, %v19820_v54 }
 0x289   :  { %v17949_v50 = vpop.f32.mrf.mxu1  ;;  %v17956_v26 = vpop.f32.mrf.mxu0 }
 0x28a   :  { %v3903_v27 = vadd.f32 %v17949_v50, %v3816_v51  ;;  %v4824_v51 = vpop.permute.xlu1 %4823 }
 0x28b   :  { %v3896_v11 = vpop.f32.mrf.mxu1  ;;  %v3978_v21 = vpop.f32.mrf.mxu0 }
 0x28c   :  { %v3897_v35 = vadd.f32 %v3896_v11, %v3806_v57  ;;  %v3986_v6 = vadd.f32 %v17956_v26, %v3903_v27 }
 0x28e   :  { %v3979_v59 = vadd.f32 %v3978_v21, %v3897_v35 }
 0x291   :  { %v17963_v63 = vpop.f32.mrf.mxu1 }
 0x292   :  { %v17970_v62 = vpop.f32.mrf.mxu0 }
 0x293   :  { %v4060_v34 = vpop.f32.mrf.mxu1 }
 0x294   :  { %5335 = vrot.lane.b32.xlu1 %v19652_v52, %s19080_s25  ;;  %v4069_v52 = vadd.f32 %v17963_v63, %v3986_v6  ;;  %v4145_v24 = vpop.f32.mrf.mxu0  ;;  %v19874_v6 = vand.u32 4294901760, %v4824_v51 }
 0x296   :  { %v4152_v29 = vadd.f32 %v17970_v62, %v4069_v52 }
 0x297   :  { %4821 = vrot.lane.b32.xlu0 %v19646_v28, %s19080_s25  ;;  %v4061_v28 = vadd.f32 %v4060_v34, %v3979_v59  ;;  %v19878_v59 = vsub.f32 %v4824_v51, %v19874_v6 }
 0x299   :  { %v17977_v7 = vpop.f32.mrf.mxu1  ;;  %v4146_v55 = vadd.f32 %v4145_v24, %v4061_v28  ;;  %v19882_v28 = vand.u32 4294901760, %v19878_v59 }
 0x29a   :  { %v19860_v0 = vadd.f32 %v17977_v7, %v4152_v29 }
 0x29b   :  { %v4224_v8 = vpop.f32.mrf.mxu1 }
 0x29c   :  { %v19862_v1 = vadd.f32 %v4224_v8, %v4146_v55  ;;  %v4256_v50 = vsel %vm4234_vm4, %v19860_v0, -inf  ;;  %v4952_v55 = vsub.f32 %v19878_v59, %v19882_v28 }
 0x29e   :  { %v4253_v53 = vsel %vm4234_vm4, %v19862_v1, -inf }
 0x2b6   :  { %4257 = vmax.xlane.f32.xlu0 %v4256_v50 }
 0x2b8   :  { %4254 = vmax.xlane.f32.xlu1 %v4253_v53 }
 0x2c9   :  { %5849 = vrot.lane.b32.xlu1 %v19660_v42, %s19080_s25 }
 0x2cc   :  { %5851 = vrot.lane.b32.xlu0 %v19658_v19, %s19080_s25 }
 0x2cf   :  { %v4240_v11 = vpop.xlane.xlu1 %4239 }
 0x2d0   :  { %v4260_v57 = vsub.f32 %v19824_v33, %v4240_v11 }
 0x2d1   :  { %v4237_v27 = vpop.xlane.xlu0 %4236 }
 0x2d2   :  { %v4269_v26 = vmul.f32 1.442695, %v4260_v57  ;;  %v4259_v63 = vsub.f32 %v19826_v39, %v4237_v27  ;;  %v4953_v27 = vand.u32 4294901760, %v4952_v55 }
 0x2d4   :  { %18992 = vpow2.f32 %v4269_v26  ;;  %v4267_v35 = vmul.f32 1.442695, %v4259_v63 }
 0x2d6   :  { %18994 = vpow2.f32 %v4267_v35 }
 0x2e1   :  { %v18993_v21 = vpop.eup %18992 }
 0x2e2   :  { %v4317_v34 = vsel %vm4234_vm4, %v18993_v21, 0  ;;  %v4286_v53 = vsel %vm4234_vm4, %v18993_v21, 0.0 }
 0x2e3   :  { %v18995_v42 = vpop.eup %18994  ;;  %v4396_v19 = vand.u32 4294901760, %v4317_v34 }
 0x2e4   :  { %v4314_v52 = vsel %vm4234_vm4, %v18995_v42, 0  ;;  %v4283_v29 = vsel %vm4234_vm4, %v18995_v42, 0.0 }
 0x2e5   :  { %v4386_v33 = vand.u32 4294901760, %v4314_v52  ;;  %v4397_v62 = vsub.f32 %v4317_v34, %v4396_v19 }
 0x2e7   :  { %17989 = vmatprep.mubr.f32.mxu1 %v4386_v33  ;;  %v4387_v7 = vsub.f32 %v4314_v52, %v4386_v33  ;;  %v4398_v39 = vand.u32 4294901760, %v4397_v62  ;;  %v5338_v52 = vpop.permute.xlu1 %5337 }
 0x2e8   :  { %17990 = vmatmul.mubr.f32.vlgmr.msra.gmra.mxu1 %v4396_v19 }
 0x2e9   :  { %18000 = vmatpush3.msra.mxu1 %v19784_v15  ;;  %v4388_v24 = vand.u32 4294901760, %v4387_v7  ;;  %v4399_v50 = vsub.f32 %v4397_v62, %v4398_v39 }
 0x2ea   :  { %18001 = vmatprep.subr.mxu1 %v19786_v25 }
 0x2eb   :  { %18002 = vmatpush3.msra.mxu1 %v19786_v25  ;;  %18003 = vmatprep.mubr.f32.mxu1 %v4388_v24  ;;  %v4389_v8 = vsub.f32 %v4387_v7, %v4388_v24  ;;  %v4400_v26 = vand.u32 4294901760, %v4399_v50 }
 0x2ec   :  { %4284 = vadd.xlane.f32.xlu0 %v4283_v29  ;;  %18013 = vmatprep.subr.mxu1 %v19784_v15 }
 0x2ed   :  { %v4246_v51 = vpop.xlane.xlu0 %4245  ;;  %18004 = vmatmul.mubr.f32.vlgmr.msra.gmra.mxu1 %v4398_v39  ;;  %v4390_v11 = vand.u32 4294901760, %v4389_v8  ;;  %4287 = vadd.xlane.f32.xlu1 %v4286_v53 }
 0x2ee   :  { %v4262_v57 = vsub.f32 %v19836_v48, %v4246_v51  ;;  %18014 = vmatpush3.msra.mxu1 %v19784_v15  ;;  %18017 = vmatprep.mubr.f32.mxu1 %v4386_v33 }
 0x2ef   :  { %18015 = vmatprep.subr.mxu1 %v19786_v25  ;;  %17982 = vmatprep.mubr.f32.mxu0 %v4390_v11 }
 0x2f0   :  { %v4273_v63 = vmul.f32 1.442695, %v4262_v57  ;;  %18016 = vmatpush3.msra.mxu1 %v19786_v25  ;;  %17983 = vmatmul.mubr.f32.vlgmr.msra.gmra.mxu0 %v4400_v26 }
 0x2f1   :  { %v4243_v35 = vpop.xlane.xlu0 %4242  ;;  %18027 = vmatprep.subr.mxu1 %v4953_v27  ;;  %17993 = vmatpush3.msra.mxu0 %v19789_v31 }
 0x2f2   :  { %18996 = vpow2.f32 %v4273_v63  ;;  %v4261_v21 = vsub.f32 %v19838_v10, %v4243_v35  ;;  %18018 = vmatmul.mubr.f32.vlgmr.msra.gmra.mxu1 %v4396_v19  ;;  %17994 = vmatprep.subr.mxu0 %v19797_v2  ;;  %v19923_v35 = vand.u32 4294901760, %v5338_v52 }
 0x2f3   :  { %18028 = vmatpush3.msra.mxu1 %v4953_v27  ;;  %17996 = vmatprep.mubr.f32.mxu0 %v4387_v7 }
 0x2f4   :  { %v4271_v48 = vmul.f32 1.442695, %v4261_v21  ;;  %17995 = vmatpush3.msra.mxu0 %v19797_v2 }
 0x2f5   :  { %18006 = vmatprep.subr.mxu0 %v19800_v13  ;;  %17997 = vmatmul.mubr.f32.vlgmr.msra.gmra.mxu0 %v4397_v62 }
 0x2f6   :  { %18998 = vpow2.f32 %v4271_v48  ;;  %18007 = vmatpush3.msra.mxu0 %v19800_v13  ;;  %18010 = vmatprep.mubr.f32.mxu0 %v4386_v33  ;;  %v19930_v48 = vsub.f32 %v5338_v52, %v19923_v35 }
 0x2f7   :  { %18008 = vmatprep.subr.mxu0 %v19806_v38 }
 0x2f8   :  { %18009 = vmatpush3.msra.mxu0 %v19806_v38 }
 0x2f9   :  { %18020 = vmatprep.subr.mxu0 %v19874_v6  ;;  %18011 = vmatmul.mubr.f32.vlgmr.msra.gmra.mxu0 %v4396_v19 }
 0x2fa   :  { %18021 = vmatpush3.msra.mxu0 %v19874_v6 }
 0x2ff   :  { %v18997_v15 = vpop.eup %18996 }
 0x300   :  { %v4831_v25 = vsel %vm4234_vm4, %v18997_v15, 0  ;;  %v4292_v19 = vsel %vm4234_vm4, %v18997_v15, 0.0 }
 0x301   :  { %v19907_v31 = vand.u32 4294901760, %v4831_v25 }
 0x303   :  { %v18999_v2 = vpop.eup %18998  ;;  %v19914_v38 = vsub.f32 %v4831_v25, %v19907_v31  ;;  %v19942_v25 = vand.u32 4294901760, %v19930_v48 }
 0x304   :  { %v4289_v10 = vsel %vm4234_vm4, %v18999_v2, 0.0  ;;  %v4828_v13 = vsel %vm4234_vm4, %v18999_v2, 0 }
 0x305   :  { %4290 = vadd.xlane.f32.xlu0 %v4289_v10  ;;  %v19911_v34 = vand.u32 4294901760, %v4828_v13  ;;  %v4912_v62 = vand.u32 4294901760, %v19914_v38 }
 0x307   :  { %18031 = vmatprep.mubr.f32.mxu1 %v19911_v34  ;;  %v4901_v42 = vsub.f32 %v4828_v13, %v19911_v34  ;;  %v4913_v53 = vsub.f32 %v19914_v38, %v4912_v62 }
 0x309   :  { %4293 = vadd.xlane.f32.xlu0 %v4292_v19  ;;  %v4902_v33 = vand.u32 4294901760, %v4901_v42  ;;  %v4914_v26 = vand.u32 4294901760, %v4913_v53  ;;  %v5466_v19 = vsub.f32 %v19930_v48, %v19942_v25 }
 0x30a   :  { %v4252_v7 = vpop.xlane.xlu0 %4251 }
 0x30b   :  { %v4903_v39 = vsub.f32 %v4901_v42, %v4902_v33  ;;  %v4264_v29 = vsub.f32 %v19846_v49, %v4252_v7 }
 0x30c   :  { %v4249_v24 = vpop.xlane.xlu1 %4248 }
 0x30d   :  { %v4904_v8 = vand.u32 4294901760, %v4903_v39  ;;  %v4277_v55 = vmul.f32 1.442695, %v4264_v29  ;;  %v4263_v50 = vsub.f32 %v19848_v46, %v4249_v24 }
 0x30e   :  { %v4822_v51 = vpop.permute.xlu0 %4821 }
 0x30f   :  { %18024 = vmatprep.mubr.f32.mxu0 %v4904_v8  ;;  %19000 = vpow2.f32 %v4277_v55  ;;  %v4865_v11 = vand.u32 4294901760, %v4822_v51  ;;  %v4275_v57 = vmul.f32 1.442695, %v4263_v50 }
 0x310   :  { %v5336_v63 = vpop.permute.xlu1 %5335 }
 0x311   :  { %v4957_v27 = vsub.f32 %v4822_v51, %v4865_v11  ;;  %19002 = vpow2.f32 %v4275_v57  ;;  %18022 = vmatprep.subr.mxu0 %v4865_v11  ;;  %v19927_v46 = vand.u32 4294901760, %v5336_v63 }
 0x312   :  { %18023 = vmatpush3.msra.mxu0 %v4865_v11 }
 0x313   :  { %18034 = vmatprep.subr.mxu0 %v19878_v59  ;;  %18025 = vmatmul.mubr.f32.vlgmr.msra.gmra.mxu0 %v4914_v26  ;;  %v4958_v49 = vand.u32 4294901760, %v4957_v27 }
 0x314   :  { %18035 = vmatpush3.msra.mxu0 %v19878_v59  ;;  %18038 = vmatprep.mubr.f32.mxu0 %v4901_v42  ;;  %v19937_v59 = vsub.f32 %v5336_v63, %v19927_v46 }
 0x315   :  { %18036 = vmatprep.subr.mxu0 %v4957_v27  ;;  %v4959_v21 = vsub.f32 %v4957_v27, %v4958_v49 }
 0x316   :  { %18037 = vmatpush3.msra.mxu0 %v4957_v27  ;;  %v5472_v10 = vand.u32 4294901760, %v19937_v59 }
 0x317   :  { %18048 = vmatprep.subr.mxu0 %v19882_v28  ;;  %v4960_v15 = vand.u32 4294901760, %v4959_v21  ;;  %18039 = vmatmul.mubr.f32.vlgmr.msra.gmra.mxu0 %v19914_v38 }
 0x318   :  { %18049 = vmatpush3.msra.mxu0 %v19882_v28  ;;  %18052 = vmatprep.mubr.f32.mxu0 %v19911_v34  ;;  %v5473_v29 = vsub.f32 %v19937_v59, %v5472_v10 }
 0x319   :  { %18029 = vmatprep.subr.mxu1 %v4960_v15  ;;  %18050 = vmatprep.subr.mxu0 %v4958_v49 }
 0x31a   :  { %18030 = vmatpush3.msra.mxu1 %v4960_v15  ;;  %18051 = vmatpush3.msra.mxu0 %v4958_v49  ;;  %v5474_v50 = vand.u32 4294901760, %v5473_v29 }
 0x31b   :  { %18032 = vmatmul.mubr.f32.vlgmr.msra.gmra.mxu1 %v19907_v31  ;;  %18041 = vmatprep.subr.mxu1 %v19874_v6 }
 0x31c   :  { %v19001_v2 = vpop.eup %19000  ;;  %18042 = vmatpush3.msra.mxu1 %v19874_v6  ;;  %18045 = vmatprep.mubr.f32.mxu1 %v4902_v33 }
 0x31d   :  { %18062 = vmatprep.subr.mxu0 %v19923_v35  ;;  %18043 = vmatprep.subr.mxu1 %v4865_v11  ;;  %v4298_v28 = vsel %vm4234_vm4, %v19001_v2, 0.0  ;;  %v5345_v13 = vsel %vm4234_vm4, %v19001_v2, 0 }
 0x31e   :  { %v19003_v38 = vpop.eup %19002  ;;  %18053 = vmatmul.mubr.f32.vlgmr.msra.gmra.mxu0 %v19907_v31  ;;  %4299 = vadd.xlane.f32.xlu0 %v4298_v28  ;;  %v5424_v42 = vand.u32 4294901760, %v5345_v13 }
 0x31f   :  { %18063 = vmatpush3.msra.mxu0 %v19923_v35  ;;  %18044 = vmatpush3.msra.mxu1 %v4865_v11  ;;  %v5342_v52 = vsel %vm4234_vm4, %v19003_v38, 0  ;;  %v4295_v39 = vsel %vm4234_vm4, %v19003_v38, 0.0 }
 0x320   :  { %18064 = vmatprep.subr.mxu0 %v19927_v46  ;;  %18046 = vmatmul.mubr.f32.vlgmr.msra.gmra.mxu1 %v4912_v62  ;;  %v5414_v33 = vand.u32 4294901760, %v5342_v52  ;;  %v5425_v7 = vsub.f32 %v5345_v13, %v5424_v42  ;;  %v5467_v62 = vand.u32 4294901760, %v5466_v19 }
 0x321   :  { %18055 = vmatprep.subr.mxu1 %v19874_v6  ;;  %18065 = vmatpush3.msra.mxu0 %v19927_v46 }
 0x322   :  { %18056 = vmatpush3.msra.mxu1 %v19874_v6  ;;  %18059 = vmatprep.mubr.f32.mxu1 %v19911_v34  ;;  %v5415_v24 = vsub.f32 %v5342_v52, %v5414_v33  ;;  %v5426_v8 = vand.u32 4294901760, %v5425_v7 }
 0x323   :  { %18076 = vmatprep.subr.mxu0 %v19930_v48  ;;  %18057 = vmatprep.subr.mxu1 %v4865_v11 }
 0x324   :  { %18058 = vmatpush3.msra.mxu1 %v4865_v11  ;;  %4296 = vadd.xlane.f32.xlu1 %v4295_v39  ;;  %v5416_v55 = vand.u32 4294901760, %v5415_v24  ;;  %v5427_v51 = vsub.f32 %v5425_v7, %v5426_v8 }
 0x325   :  { %18060 = vmatmul.mubr.f32.vlgmr.msra.gmra.mxu1 %v19907_v31  ;;  %18069 = vmatprep.subr.mxu1 %v5467_v62 }
 0x326   :  { %18070 = vmatpush3.msra.mxu1 %v5467_v62  ;;  %18073 = vmatprep.mubr.f32.mxu1 %v5414_v33  ;;  %v5417_v53 = vsub.f32 %v5415_v24, %v5416_v55  ;;  %v5428_v34 = vand.u32 4294901760, %v5427_v51 }
 0x327   :  { %18071 = vmatprep.subr.mxu1 %v5474_v50 }
 0x328   :  { %18072 = vmatpush3.msra.mxu1 %v5474_v50  ;;  %v5418_v6 = vand.u32 4294901760, %v5417_v53 }
 0x329   :  { %18074 = vmatmul.mubr.f32.vlgmr.msra.gmra.mxu1 %v5424_v42  ;;  %18083 = vmatprep.subr.mxu1 %v19923_v35 }
 0x32a   :  { %18084 = vmatpush3.msra.mxu1 %v19923_v35  ;;  %18087 = vmatprep.mubr.f32.mxu1 %v5416_v55 }
 0x32b   :  { %18085 = vmatprep.subr.mxu1 %v19927_v46  ;;  %18066 = vmatprep.mubr.f32.mxu0 %v5418_v6 }
 0x32c   :  { %18086 = vmatpush3.msra.mxu1 %v19927_v46  ;;  %18067 = vmatmul.mubr.f32.vlgmr.msra.gmra.mxu0 %v5428_v34 }
 0x32d   :  { %18088 = vmatmul.mubr.f32.vlgmr.msra.gmra.mxu1 %v5426_v8  ;;  %18097 = vmatprep.subr.mxu1 %v19923_v35 }
 0x32e   :  { %18098 = vmatpush3.msra.mxu1 %v19923_v35  ;;  %18101 = vmatprep.mubr.f32.mxu1 %v5414_v33 }
 0x32f   :  { %18099 = vmatprep.subr.mxu1 %v19927_v46  ;;  %18077 = vmatpush3.msra.mxu0 %v19930_v48 }
 0x330   :  { %18100 = vmatpush3.msra.mxu1 %v19927_v46  ;;  %18078 = vmatprep.subr.mxu0 %v19937_v59 }
 0x331   :  { %18080 = vmatprep.mubr.f32.mxu0 %v5415_v24  ;;  %18102 = vmatmul.mubr.f32.vlgmr.msra.gmra.mxu1 %v5424_v42 }
 0x332   :  { %18079 = vmatpush3.msra.mxu0 %v19937_v59 }
 0x333   :  { %18090 = vmatprep.subr.mxu0 %v19942_v25  ;;  %18081 = vmatmul.mubr.f32.vlgmr.msra.gmra.mxu0 %v5425_v7 }
 0x334   :  { %18091 = vmatpush3.msra.mxu0 %v19942_v25  ;;  %18094 = vmatprep.mubr.f32.mxu0 %v5414_v33 }
 0x335   :  { %18092 = vmatprep.subr.mxu0 %v5472_v10 }
 0x336   :  { %18093 = vmatpush3.msra.mxu0 %v5472_v10 }
 0x337   :  { %18095 = vmatmul.mubr.f32.vlgmr.msra.gmra.mxu0 %v5424_v42 }
 0x33f   :  { %v4258_v31 = vpop.xlane.xlu0 %4257 }
 0x340   :  { %v4266_v11 = vsub.f32 %v19860_v0, %v4258_v31 }
 0x341   :  { %v4255_v57 = vpop.xlane.xlu1 %4254 }
 0x342   :  { %v4281_v27 = vmul.f32 1.442695, %v4266_v11  ;;  %v4265_v26 = vsub.f32 %v19862_v1, %v4255_v57  ;;  %v34_v1 = vld [vmem:[%s20822_s2] sm:$0xff] }
 0x343   :  { %v5852_v63 = vpop.permute.xlu0 %5851  ;;  %v19981_v13 = vand.u32 4294901760, %v34_v1 }
 0x344   :  { %19004 = vpow2.f32 %v4281_v27  ;;  %v5890_v35 = vand.u32 4294901760, %v5852_v63  ;;  %v4279_v49 = vmul.f32 1.442695, %v4265_v26 }
 0x345   :  { %v5850_v46 = vpop.permute.xlu1 %5849  ;;  %v19986_v52 = vsub.f32 %v34_v1, %v19981_v13 }
 0x346   :  { %v5978_v21 = vsub.f32 %v5852_v63, %v5890_v35  ;;  %19006 = vpow2.f32 %v4279_v49  ;;  %18104 = vmatprep.subr.mxu0 %v5890_v35  ;;  %v5893_v48 = vand.u32 4294901760, %v5850_v46 }
 0x347   :  { %18105 = vmatpush3.msra.mxu0 %v5890_v35  ;;  %v19991_v62 = vand.u32 4294901760, %v19986_v52 }
 0x348   :  { %v5985_v15 = vsub.f32 %v5850_v46, %v5893_v48  ;;  %18106 = vmatprep.subr.mxu0 %v5893_v48  ;;  %v5979_v59 = vand.u32 4294901760, %v5978_v21 }
 0x349   :  { %18107 = vmatpush3.msra.mxu0 %v5893_v48  ;;  %v6505_v6 = vsub.f32 %v19986_v52, %v19991_v62 }
 0x34a   :  { %18118 = vmatprep.subr.mxu0 %v5978_v21  ;;  %v5980_v0 = vsub.f32 %v5978_v21, %v5979_v59  ;;  %v5986_v25 = vand.u32 4294901760, %v5985_v15 }
 0x34b   :  { %v19995_v57 = vand.u32 4294901760, %v6505_v6 }
 0x34c   :  { %v5981_v2 = vand.u32 4294901760, %v5980_v0  ;;  %v5987_v28 = vsub.f32 %v5985_v15, %v5986_v25  ;;  %v35_v0 = vld [vmem:[%s20822_s2 + $0x8] sm:$0xff] }
 0x34e   :  { %18111 = vmatprep.subr.mxu1 %v5981_v2  ;;  %v5988_v10 = vand.u32 4294901760, %v5987_v28 }
 0x34f   :  { %18112 = vmatpush3.msra.mxu1 %v5981_v2 }
 0x350   :  { %18113 = vmatprep.subr.mxu1 %v5988_v10 }
 0x351   :  { %v19005_v38 = vpop.eup %19004  ;;  %18114 = vmatpush3.msra.mxu1 %v5988_v10 }
 0x352   :  { %v4304_v42 = vsel %vm4234_vm4, %v19005_v38, 0.0  ;;  %18125 = vmatprep.subr.mxu1 %v5890_v35  ;;  %v5859_v19 = vsel %vm4234_vm4, %v19005_v38, 0  ;;  %v20006_v38 = vand.u32 4294901760, %v35_v0 }
 0x353   :  { %v19007_v33 = vpop.eup %19006  ;;  %4305 = vadd.xlane.f32.xlu0 %v4304_v42  ;;  %v5938_v7 = vand.u32 4294901760, %v5859_v19 }
 0x354   :  { %v4301_v39 = vsel %vm4234_vm4, %v19007_v33, 0.0  ;;  %v5856_v29 = vsel %vm4234_vm4, %v19007_v33, 0 }
 0x355   :  { %4302 = vadd.xlane.f32.xlu1 %v4301_v39  ;;  %v5928_v24 = vand.u32 4294901760, %v5856_v29  ;;  %v5939_v8 = vsub.f32 %v5859_v19, %v5938_v7 }
 0x357   :  { %18115 = vmatprep.mubr.f32.mxu1 %v5928_v24  ;;  %v5929_v55 = vsub.f32 %v5856_v29, %v5928_v24  ;;  %v5940_v50 = vand.u32 4294901760, %v5939_v8 }
 0x358   :  { %18116 = vmatmul.mubr.f32.vlgmr.msra.gmra.mxu1 %v5938_v7 }
 0x359   :  { %18126 = vmatpush3.msra.mxu1 %v5890_v35  ;;  %v5930_v53 = vand.u32 4294901760, %v5929_v55  ;;  %v5941_v51 = vsub.f32 %v5939_v8, %v5940_v50 }
 0x35a   :  { %18127 = vmatprep.subr.mxu1 %v5893_v48 }
 0x35b   :  { %18128 = vmatpush3.msra.mxu1 %v5893_v48  ;;  %18129 = vmatprep.mubr.f32.mxu1 %v5930_v53  ;;  %v5931_v34 = vsub.f32 %v5929_v55, %v5930_v53  ;;  %v5942_v11 = vand.u32 4294901760, %v5941_v51 }
 0x35c   :  { %18139 = vmatprep.subr.mxu1 %v5890_v35  ;;  %18130 = vmatmul.mubr.f32.vlgmr.msra.gmra.mxu1 %v5940_v50 }
 0x35d   :  { %18140 = vmatpush3.msra.mxu1 %v5890_v35  ;;  %18143 = vmatprep.mubr.f32.mxu1 %v5928_v24  ;;  %v5932_v31 = vand.u32 4294901760, %v5931_v34 }
 0x35e   :  { %18141 = vmatprep.subr.mxu1 %v5893_v48 }
 0x35f   :  { %18142 = vmatpush3.msra.mxu1 %v5893_v48  ;;  %18108 = vmatprep.mubr.f32.mxu0 %v5932_v31 }
 0x360   :  { %18109 = vmatmul.mubr.f32.vlgmr.msra.gmra.mxu0 %v5942_v11  ;;  %18144 = vmatmul.mubr.f32.vlgmr.msra.gmra.mxu1 %v5938_v7 }
 0x361   :  { %18119 = vmatpush3.msra.mxu0 %v5978_v21  ;;  %18122 = vmatprep.mubr.f32.mxu0 %v5929_v55 }
 0x362   :  { %18120 = vmatprep.subr.mxu0 %v5985_v15  ;;  %18151 = vmatprep.subr.mxu1 %v19995_v57 }
 0x363   :  { %18121 = vmatpush3.msra.mxu0 %v5985_v15  ;;  %18152 = vmatpush3.msra.mxu1 %v19995_v57 }
 0x364   :  { %18132 = vmatprep.subr.mxu0 %v5979_v59  ;;  %18123 = vmatmul.mubr.f32.vlgmr.msra.gmra.mxu0 %v5939_v8  ;;  %v20009_v8 = vsub.f32 %v35_v0, %v20006_v38 }
 0x365   :  { %18133 = vmatpush3.msra.mxu0 %v5979_v59  ;;  %18136 = vmatprep.mubr.f32.mxu0 %v5928_v24 }
 0x366   :  { %18134 = vmatprep.subr.mxu0 %v5986_v25  ;;  %18161 = vmatprep.subr.mxu1 %v19981_v13  ;;  %v20013_v11 = vand.u32 4294901760, %v20009_v8 }
 0x367   :  { %18135 = vmatpush3.msra.mxu0 %v5986_v25 }
 0x368   :  { %18137 = vmatmul.mubr.f32.vlgmr.msra.gmra.mxu0 %v5938_v7  ;;  %18146 = vmatprep.subr.mxu0 %v19981_v13 }
 0x369   :  { %18147 = vmatpush3.msra.mxu0 %v19981_v13 }
 0x36a   :  { %18156 = vmatprep.subr.mxu0 %v19986_v52 }
 0x375   :  { %v4285_v35 = vpop.xlane.xlu0 %4284 }
 0x376   :  { %v4288_v26 = vpop.xlane.xlu1 %4287 }
 0x377   :  { %19008 = vrcp.f32 %v4288_v26 }
 0x378   :  { %19010 = vrcp.f32 %v4285_v35 }
 0x384   :  { %v19009_v55 = vpop.eup %19008 }
 0x385   :  { %v19011_v6 = vpop.eup %19010 }
 0x3a8   :  { %v17991_v27 = vpop.f32.mrf.mxu1 }
 0x3aa   :  { %v4483_v63 = vpop.f32.mrf.mxu1 }
 0x3ad   :  { %v18005_v49 = vpop.f32.mrf.mxu1 }
 0x3af   :  { %v4647_v15 = vpop.f32.mrf.mxu1 }
 0x3b0   :  { %v17984_v46 = vpop.f32.mrf.mxu0 }
 0x3b1   :  { %v4490_v48 = vadd.f32 %v17991_v27, %v17984_v46 }
 0x3b2   :  { %v4392_v21 = vpop.f32.mrf.mxu0  ;;  %v18019_v42 = vpop.f32.mrf.mxu1 }
 0x3b3   :  { %v4484_v25 = vadd.f32 %v4483_v63, %v4392_v21 }
 0x3b4   :  { %v4811_v50 = vpop.f32.mrf.mxu1 }
 0x3b5   :  { %v17998_v59 = vpop.f32.mrf.mxu0 }
 0x3b6   :  { %v4573_v1 = vadd.f32 %v17998_v59, %v4490_v48 }
 0x3b7   :  { %v4565_v2 = vpop.f32.mrf.mxu0 }
 0x3b8   :  { %v4566_v28 = vadd.f32 %v4565_v2, %v4484_v25  ;;  %v4656_v10 = vadd.f32 %v18005_v49, %v4573_v1  ;;  %v7000_v49 = vsub.f32 %v20009_v8, %v20013_v11  ;;  %v4291_v2 = vpop.xlane.xlu0 %4290 }
 0x3b9   :  { %v18012_v19 = vpop.f32.mrf.mxu0 }
 0x3ba   :  { %v4739_v33 = vadd.f32 %v18012_v19, %v4656_v10  ;;  %v4648_v7 = vadd.f32 %v4647_v15, %v4566_v28  ;;  %v20020_v59 = vand.u32 4294901760, %v7000_v49 }
 0x3bb   :  { %v4732_v39 = vpop.f32.mrf.mxu0 }
 0x3bc   :  { %v4818_v29 = vadd.f32 %v18019_v42, %v4739_v33  ;;  %v4733_v24 = vadd.f32 %v4732_v39, %v4648_v7  ;;  %v4294_v42 = vpop.xlane.xlu0 %4293 }
 0x3bd   :  { %19012 = vrcp.f32 %v4294_v42 }
 0x3be   :  { %v6366_v53 = vmul.f32 %v19009_v55, %v4818_v29  ;;  %v4812_v51 = vadd.f32 %v4811_v50, %v4733_v24  ;;  %19014 = vrcp.f32 %v4291_v2  ;;  %v36_v50 = vld [vmem:[%s20822_s2 + $0x10] sm:$0xff] }
 0x3c0   :  { %v6383_v34 = vsel %vm2175_vm1, %v6366_v53, 0  ;;  %v6364_v31 = vmul.f32 %v19011_v6, %v4812_v51 }
 0x3c1   :  { %v6461_v27 = vand.u32 4294901760, %v6383_v34 }
 0x3c2   :  { %v6380_v26 = vsel %vm2175_vm1, %v6364_v31, 0 }
 0x3c3   :  { %v6462_v63 = vsub.f32 %v6383_v34, %v6461_v27  ;;  %v6451_v35 = vand.u32 4294901760, %v6380_v26 }
 0x3c5   :  { %18153 = vmatprep.mubr.f32.mxu1 %v6451_v35  ;;  %v6452_v46 = vsub.f32 %v6380_v26, %v6451_v35  ;;  %v6463_v21 = vand.u32 4294901760, %v6462_v63 }
 0x3c6   :  { %18154 = vmatmul.mubr.f32.vlgmr.msra.gmra.mxu1 %v6461_v27 }
 0x3c7   :  { %18162 = vmatpush3.msra.mxu1 %v19981_v13  ;;  %v6453_v48 = vand.u32 4294901760, %v6452_v46  ;;  %v6464_v15 = vsub.f32 %v6462_v63, %v6463_v21 }
 0x3c8   :  { %18171 = vmatprep.subr.mxu1 %v19981_v13 }
 0x3c9   :  { %18163 = vmatprep.mubr.f32.mxu1 %v6453_v48  ;;  %v6454_v0 = vsub.f32 %v6452_v46, %v6453_v48  ;;  %v6465_v1 = vand.u32 4294901760, %v6464_v15 }
 0x3ca   :  { %18164 = vmatmul.mubr.f32.vlgmr.msra.gmra.mxu1 %v6463_v21  ;;  %v19013_v15 = vpop.eup %19012 }
 0x3cb   :  { %18173 = vmatprep.mubr.f32.mxu1 %v6451_v35  ;;  %v6455_v25 = vand.u32 4294901760, %v6454_v0  ;;  %18172 = vmatpush3.msra.mxu1 %v19981_v13  ;;  %v19015_v2 = vpop.eup %19014 }
 0x3cc   :  { %18181 = vmatprep.subr.mxu1 %v20020_v59 }
 0x3cd   :  { %18148 = vmatprep.mubr.f32.mxu0 %v6455_v25 }
 0x3ce   :  { %18149 = vmatmul.mubr.f32.vlgmr.msra.gmra.mxu0 %v6465_v1  ;;  %18174 = vmatmul.mubr.f32.vlgmr.msra.gmra.mxu1 %v6461_v27 }
 0x3cf   :  { %18158 = vmatprep.mubr.f32.mxu0 %v6452_v46  ;;  %18157 = vmatpush3.msra.mxu0 %v19986_v52 }
 0x3d0   :  { %18166 = vmatprep.subr.mxu0 %v19991_v62  ;;  %18182 = vmatpush3.msra.mxu1 %v20020_v59 }
 0x3d1   :  { %18191 = vmatprep.subr.mxu1 %v20006_v38 }
 0x3d2   :  { %18159 = vmatmul.mubr.f32.vlgmr.msra.gmra.mxu0 %v6462_v63 }
 0x3d3   :  { %18168 = vmatprep.mubr.f32.mxu0 %v6451_v35  ;;  %18167 = vmatpush3.msra.mxu0 %v19991_v62  ;;  %v18026_v28 = vpop.f32.mrf.mxu0 }
 0x3d4   :  { %18176 = vmatprep.subr.mxu0 %v20006_v38 }
 0x3d5   :  { %v4906_v10 = vpop.f32.mrf.mxu0 }
 0x3d6   :  { %18169 = vmatmul.mubr.f32.vlgmr.msra.gmra.mxu0 %v6461_v27  ;;  %v20035_v27 = vand.u32 4294901760, %v36_v50 }
 0x3d7   :  { %18177 = vmatpush3.msra.mxu0 %v20006_v38  ;;  %v18040_v19 = vpop.f32.mrf.mxu0 }
 0x3d8   :  { %18186 = vmatprep.subr.mxu0 %v20009_v8  ;;  %v20038_v48 = vsub.f32 %v36_v50, %v20035_v27 }
 0x3d9   :  { %v5079_v39 = vpop.f32.mrf.mxu0 }
 0x3da   :  { %20956 = vst [vmem:[#allocation44_spill] sm:$0xff] %v20038_v48 }
 0x3db   :  { %v18033_v33 = vpop.f32.mrf.mxu1 }
 0x3dc   :  { %v5004_v7 = vadd.f32 %v18033_v33, %v18026_v28  ;;  %v4300_v33 = vpop.xlane.xlu0 %4299 }
 0x3dd   :  { %v4997_v29 = vpop.f32.mrf.mxu1  ;;  %19016 = vrcp.f32 %v4300_v33 }
 0x3de   :  { %v4998_v24 = vadd.f32 %v4997_v29, %v4906_v10  ;;  %v5087_v55 = vadd.f32 %v18040_v19, %v5004_v7  ;;  %v18054_v53 = vpop.f32.mrf.mxu0  ;;  %v20042_v19 = vand.u32 4294901760, %v20038_v48 }
 0x3e0   :  { %v18047_v51 = vpop.f32.mrf.mxu1  ;;  %v5080_v6 = vadd.f32 %v5079_v39, %v4998_v24  ;;  %v5246_v35 = vpop.f32.mrf.mxu0  ;;  %20957 = vst [vmem:[#allocation45_spill] sm:$0xff] %v20042_v19 }
 0x3e1   :  { %v5170_v34 = vadd.f32 %v18047_v51, %v5087_v55  ;;  %v4297_v55 = vpop.xlane.xlu1 %4296  ;;  %v7495_v51 = vsub.f32 %v20038_v48, %v20042_v19 }
 0x3e2   :  { %v5161_v31 = vpop.f32.mrf.mxu1  ;;  %19018 = vrcp.f32 %v4297_v55 }
 0x3e3   :  { %v5162_v26 = vadd.f32 %v5161_v31, %v5080_v6  ;;  %v5253_v63 = vadd.f32 %v18054_v53, %v5170_v34 }
 0x3e5   :  { %v18061_v49 = vpop.f32.mrf.mxu1  ;;  %v5247_v46 = vadd.f32 %v5246_v35, %v5162_v26 }
 0x3e6   :  { %v5332_v21 = vadd.f32 %v18061_v49, %v5253_v63 }
 0x3e7   :  { %v5325_v0 = vpop.f32.mrf.mxu1 }
 0x3e8   :  { %v6370_v25 = vmul.f32 %v19013_v15, %v5332_v21  ;;  %v5326_v1 = vadd.f32 %v5325_v0, %v5247_v46  ;;  %v20053_v46 = vand.u32 4294901760, %v7495_v51 }
 0x3e9   :  { %v18075_v28 = vpop.f32.mrf.mxu1 }
 0x3ea   :  { %v6878_v10 = vsel %vm2175_vm1, %v6370_v25, 0  ;;  %v6368_v42 = vmul.f32 %v19015_v2, %v5326_v1  ;;  %v37_v25 = vld [vmem:[%s20822_s2 + $0x18] sm:$0xff] }
 0x3eb   :  { %v20044_v7 = vand.u32 4294901760, %v6878_v10  ;;  %v5511_v39 = vpop.f32.mrf.mxu1 }
 0x3ec   :  { %v6875_v29 = vsel %vm2175_vm1, %v6368_v42, 0  ;;  %v18068_v24 = vpop.f32.mrf.mxu0 }
 0x3ed   :  { %v6957_v50 = vsub.f32 %v6878_v10, %v20044_v7  ;;  %v6946_v53 = vand.u32 4294901760, %v6875_v29  ;;  %v18089_v34 = vpop.f32.mrf.mxu1  ;;  %v5518_v35 = vadd.f32 %v18075_v28, %v18068_v24  ;;  %v20060_v24 = vand.u32 4294901760, %v37_v25 }
 0x3ee   :  { %v5420_v31 = vpop.f32.mrf.mxu0 }
 0x3ef   :  { %v6947_v6 = vsub.f32 %v6875_v29, %v6946_v53  ;;  %18183 = vmatprep.mubr.f32.mxu1 %v6946_v53  ;;  %v6958_v26 = vand.u32 4294901760, %v6957_v50  ;;  %v5675_v21 = vpop.f32.mrf.mxu1  ;;  %v5512_v1 = vadd.f32 %v5511_v39, %v5420_v31  ;;  %20958 = vst [vmem:[#allocation46_spill] sm:$0xff] %v20060_v24 }
 0x3f0   :  { %18184 = vmatmul.mubr.f32.vlgmr.msra.gmra.mxu1 %v20044_v7 }
 0x3f1   :  { %18192 = vmatpush3.msra.mxu1 %v20006_v38  ;;  %v6948_v63 = vand.u32 4294901760, %v6947_v6  ;;  %v6959_v49 = vsub.f32 %v6957_v50, %v6958_v26  ;;  %v18103_v55 = vpop.f32.mrf.mxu1 }
 0x3f2   :  { %18201 = vmatprep.subr.mxu1 %v20006_v38 }
 0x3f3   :  { %18193 = vmatprep.mubr.f32.mxu1 %v6948_v63  ;;  %v18082_v15 = vpop.f32.mrf.mxu0  ;;  %v6949_v0 = vsub.f32 %v6947_v6, %v6948_v63  ;;  %v6960_v29 = vand.u32 4294901760, %v6959_v49  ;;  %v19017_v49 = vpop.eup %19016 }
 0x3f4   :  { %v5601_v2 = vadd.f32 %v18082_v15, %v5518_v35  ;;  %18194 = vmatmul.mubr.f32.vlgmr.msra.gmra.mxu1 %v6958_v26  ;;  %v5839_v15 = vpop.f32.mrf.mxu1 }
 0x3f5   :  { %18203 = vmatprep.mubr.f32.mxu1 %v6946_v53  ;;  %v5593_v10 = vpop.f32.mrf.mxu0  ;;  %v6950_v42 = vand.u32 4294901760, %v6949_v0  ;;  %18202 = vmatpush3.msra.mxu1 %v20006_v38 }
 0x3f6   :  { %v5594_v28 = vadd.f32 %v5593_v10, %v5512_v1  ;;  %v5684_v33 = vadd.f32 %v18089_v34, %v5601_v2  ;;  %18211 = vmatprep.subr.mxu1 %v20053_v46  ;;  %v20067_v34 = vsub.f32 %v37_v25, %v20060_v24 }
 0x3f7   :  { %18178 = vmatprep.mubr.f32.mxu0 %v6950_v42  ;;  %v18096_v51 = vpop.f32.mrf.mxu0 }
 0x3f8   :  { %v5767_v63 = vadd.f32 %v18096_v51, %v5684_v33  ;;  %18179 = vmatmul.mubr.f32.vlgmr.msra.gmra.mxu0 %v6960_v29  ;;  %18204 = vmatmul.mubr.f32.vlgmr.msra.gmra.mxu1 %v20044_v7  ;;  %v5676_v39 = vadd.f32 %v5675_v21, %v5594_v28  ;;  %20959 = vst [vmem:[#allocation47_spill] sm:$0xff] %v20067_v34  ;;  %v20074_v10 = vand.u32 4294901760, %v20067_v34 }
 0x3f9   :  { %18188 = vmatprep.mubr.f32.mxu0 %v6947_v6  ;;  %v5760_v31 = vpop.f32.mrf.mxu0  ;;  %18187 = vmatpush3.msra.mxu0 %v20009_v8  ;;  %v19019_v6 = vpop.eup %19018 }
 0x3fa   :  { %v5846_v26 = vadd.f32 %v18103_v55, %v5767_v63  ;;  %v5761_v35 = vadd.f32 %v5760_v31, %v5676_v39  ;;  %18196 = vmatprep.subr.mxu0 %v20013_v11  ;;  %18212 = vmatpush3.msra.mxu1 %v20053_v46  ;;  %20960 = vst [vmem:[#allocation48_spill] sm:$0xff] %v20074_v10 }
 0x3fb   :  { %18221 = vmatprep.subr.mxu1 %v20035_v27 }
 0x3fc   :  { %v6374_v0 = vmul.f32 %v19017_v49, %v5846_v26  ;;  %v5840_v1 = vadd.f32 %v5839_v15, %v5761_v35  ;;  %18189 = vmatmul.mubr.f32.vlgmr.msra.gmra.mxu0 %v6957_v50  ;;  %v7990_v50 = vsub.f32 %v20067_v34, %v20074_v10  ;;  %v4306_v35 = vpop.xlane.xlu0 %4305  ;;  %v4303_v15 = vpop.xlane.xlu1 %4302 }
 0x3fd   :  { %18198 = vmatprep.mubr.f32.mxu0 %v6946_v53  ;;  %18197 = vmatpush3.msra.mxu0 %v20013_v11  ;;  %19020 = vrcp.f32 %v4306_v35 }
 0x3fe   :  { %v7373_v21 = vsel %vm2175_vm1, %v6374_v0, 0  ;;  %v6372_v2 = vmul.f32 %v19019_v6, %v5840_v1  ;;  %18206 = vmatprep.subr.mxu0 %v20035_v27  ;;  %19022 = vrcp.f32 %v4303_v15 }
 0x3ff   :  { %v7451_v25 = vand.u32 4294901760, %v7373_v21 }
 0x400   :  { %v7370_v42 = vsel %vm2175_vm1, %v6372_v2, 0  ;;  %18199 = vmatmul.mubr.f32.vlgmr.msra.gmra.mxu0 %v20044_v7  ;;  %v20084_v7 = vand.u32 4294901760, %v7990_v50 }
 0x401   :  { %v7452_v28 = vsub.f32 %v7373_v21, %v7451_v25  ;;  %v7441_v33 = vand.u32 4294901760, %v7370_v42  ;;  %18207 = vmatpush3.msra.mxu0 %v20035_v27 }
 0x402   :  { %18216 = vmatprep.subr.mxu0 %v20038_v48  ;;  %20961 = vst [vmem:[#allocation49_spill] sm:$0xff] %v20084_v7 }
 0x403   :  { %18213 = vmatprep.mubr.f32.mxu1 %v7441_v33  ;;  %v7442_v53 = vsub.f32 %v7370_v42, %v7441_v33  ;;  %v7453_v29 = vand.u32 4294901760, %v7452_v28 }
 0x404   :  { %18214 = vmatmul.mubr.f32.vlgmr.msra.gmra.mxu1 %v7451_v25 }
 0x405   :  { %18222 = vmatpush3.msra.mxu1 %v20035_v27  ;;  %v7443_v55 = vand.u32 4294901760, %v7442_v53  ;;  %v7454_v51 = vsub.f32 %v7452_v28, %v7453_v29 }
 0x406   :  { %18231 = vmatprep.subr.mxu1 %v20035_v27 }
 0x407   :  { %18223 = vmatprep.mubr.f32.mxu1 %v7443_v55  ;;  %v7444_v63 = vsub.f32 %v7442_v53, %v7443_v55  ;;  %v7455_v31 = vand.u32 4294901760, %v7454_v51 }
 0x408   :  { %18224 = vmatmul.mubr.f32.vlgmr.msra.gmra.mxu1 %v7453_v29 }
 0x409   :  { %18233 = vmatprep.mubr.f32.mxu1 %v7441_v33  ;;  %v7445_v39 = vand.u32 4294901760, %v7444_v63  ;;  %18232 = vmatpush3.msra.mxu1 %v20035_v27 }
 0x40a   :  { %18241 = vmatprep.subr.mxu1 %v20084_v7  ;;  %v19021_v35 = vpop.eup %19020 }
 0x40b   :  { %18208 = vmatprep.mubr.f32.mxu0 %v7445_v39 }
 0x40c   :  { %18209 = vmatmul.mubr.f32.vlgmr.msra.gmra.mxu0 %v7455_v31  ;;  %18234 = vmatmul.mubr.f32.vlgmr.msra.gmra.mxu1 %v7451_v25 }
 0x40d   :  { %18218 = vmatprep.mubr.f32.mxu0 %v7442_v53  ;;  %18217 = vmatpush3.msra.mxu0 %v20038_v48 }
 0x40e   :  { %18226 = vmatprep.subr.mxu0 %v20042_v19  ;;  %18242 = vmatpush3.msra.mxu1 %v20084_v7 }
 0x40f   :  { %18251 = vmatprep.subr.mxu1 %v20060_v24 }
 0x410   :  { %18219 = vmatmul.mubr.f32.vlgmr.msra.gmra.mxu0 %v7452_v28 }
 0x411   :  { %18228 = vmatprep.mubr.f32.mxu0 %v7441_v33  ;;  %18227 = vmatpush3.msra.mxu0 %v20042_v19 }
 0x412   :  { %18236 = vmatprep.subr.mxu0 %v20060_v24 }
 0x414   :  { %18229 = vmatmul.mubr.f32.vlgmr.msra.gmra.mxu0 %v7451_v25 }
 0x415   :  { %18237 = vmatpush3.msra.mxu0 %v20060_v24 }
 0x416   :  { %18246 = vmatprep.subr.mxu0 %v20067_v34 }
 0x418   :  { %v18117_v26 = vpop.f32.mrf.mxu1 }
 0x41a   :  { %v6025_v49 = vpop.f32.mrf.mxu1 }
 0x41c   :  { %v18131_v0 = vpop.f32.mrf.mxu1 }
 0x41e   :  { %v6189_v2 = vpop.f32.mrf.mxu1 }
 0x420   :  { %v18110_v1 = vpop.f32.mrf.mxu0  ;;  %v18145_v29 = vpop.f32.mrf.mxu1 }
 0x421   :  { %v6032_v21 = vadd.f32 %v18117_v26, %v18110_v1  ;;  %v16728_v26 = vld [vmem:[%s20820_s0 + $0x10] sm:$0xff] }
 0x422   :  { %v5934_v6 = vpop.f32.mrf.mxu0  ;;  %v6353_v7 = vpop.f32.mrf.mxu1 }
 0x423   :  { %v6026_v28 = vadd.f32 %v6025_v49, %v5934_v6  ;;  %v19023_v49 = vpop.eup %19022 }
 0x424   :  { %v18124_v42 = vpop.f32.mrf.mxu0 }
 0x425   :  { %v6115_v33 = vadd.f32 %v18124_v42, %v6032_v21 }
 0x426   :  { %v6107_v50 = vpop.f32.mrf.mxu0 }
 0x427   :  { %v6108_v25 = vadd.f32 %v6107_v50, %v6026_v28  ;;  %v6198_v53 = vadd.f32 %v18131_v0, %v6115_v33  ;;  %v8387_v0 = vsel %vm50_vm0, %v16728_v26, 0 }
 0x428   :  { %v18138_v55 = vpop.f32.mrf.mxu0  ;;  %v20102_v50 = vand.u32 4294901760, %v8387_v0 }
 0x429   :  { %v6281_v51 = vadd.f32 %v18138_v55, %v6198_v53  ;;  %v6190_v63 = vadd.f32 %v6189_v2, %v6108_v25  ;;  %v16729_v25 = vld [vmem:[%s20820_s0 + $0x18] sm:$0xff] }
 0x42a   :  { %v6274_v39 = vpop.f32.mrf.mxu0  ;;  %v8390_v55 = vsel %vm50_vm0, %v16729_v25, 0  ;;  %v20991_v25 = vld [vmem:[#allocation42_spill] sm:$0xff] }
 0x42b   :  { %v6360_v31 = vadd.f32 %v18145_v29, %v6281_v51  ;;  %v6275_v19 = vadd.f32 %v6274_v39, %v6190_v63  ;;  %v20109_v29 = vsub.f32 %v8387_v0, %v20102_v50  ;;  %v20113_v39 = vand.u32 4294901760, %v8390_v55  ;;  %v20986_v0 = vld [vmem:[#allocation29_spill] sm:$0xff] }
 0x42d   :  { %v6378_v15 = vmul.f32 %v19021_v35, %v6360_v31  ;;  %v6354_v1 = vadd.f32 %v6353_v7, %v6275_v19  ;;  %v20117_v35 = vand.u32 4294901760, %v20109_v29 }
 0x42f   :  { %v7868_v6 = vsel %vm2175_vm1, %v6378_v15, 0  ;;  %v6376_v21 = vmul.f32 %v19023_v49, %v6354_v1  ;;  %v20121_v15 = vsub.f32 %v8390_v55, %v20113_v39  ;;  %v8464_v1 = vsub.f32 %v20109_v29, %v20117_v35  ;;  %v20995_v55 = vld [vmem:[#allocation35_spill] sm:$0xff] }
 0x430   :  { %v7946_v42 = vand.u32 4294901760, %v7868_v6 }
 0x431   :  { %v7865_v2 = vsel %vm2175_vm1, %v6376_v21, 0  ;;  %v20132_v49 = vand.u32 4294901760, %v20121_v15  ;;  %v20985_v21 = vld [vmem:[#allocation28_spill] sm:$0xff] }
 0x432   :  { %v7947_v28 = vsub.f32 %v7868_v6, %v7946_v42  ;;  %v7936_v33 = vand.u32 4294901760, %v7865_v2  ;;  %v20135_v6 = vand.u32 4294901760, %v8464_v1 }
 0x434   :  { %18243 = vmatprep.mubr.f32.mxu1 %v7936_v33  ;;  %v7937_v53 = vsub.f32 %v7865_v2, %v7936_v33  ;;  %v7948_v19 = vand.u32 4294901760, %v7947_v28  ;;  %v20988_v2 = vld [vmem:[#allocation31_spill] sm:$0xff] }
 0x435   :  { %18244 = vmatmul.mubr.f32.vlgmr.msra.gmra.mxu1 %v7946_v42 }
 0x436   :  { %18252 = vmatpush3.msra.mxu1 %v20060_v24  ;;  %v7938_v7 = vand.u32 4294901760, %v7937_v53  ;;  %v7949_v51 = vsub.f32 %v7947_v28, %v7948_v19 }
 0x437   :  { %18261 = vmatprep.subr.mxu1 %v20060_v24 }
 0x438   :  { %18253 = vmatprep.mubr.f32.mxu1 %v7938_v7  ;;  %v7939_v63 = vsub.f32 %v7937_v53, %v7938_v7  ;;  %v7950_v26 = vand.u32 4294901760, %v7949_v51  ;;  %v20994_v7 = vld [vmem:[#allocation32_spill] sm:$0xff]  ;;  %v20996_v51 = vld [vmem:[#allocation37_spill] sm:$0xff] }
 0x439   :  { %18254 = vmatmul.mubr.f32.vlgmr.msra.gmra.mxu1 %v7948_v19  ;;  %v20993_v19 = vld [vmem:[#allocation30_spill] sm:$0xff] }
 0x43a   :  { %18263 = vmatprep.mubr.f32.mxu1 %v7936_v33  ;;  %v7940_v31 = vand.u32 4294901760, %v7939_v63  ;;  %18262 = vmatpush3.msra.mxu1 %v20060_v24  ;;  %v20997_v63 = vld [vmem:[#allocation34_spill] sm:$0xff] }
 0x43b   :  { %18277 = vmatprep.subr.mxu1 %v19194_v30 }
 0x43c   :  { %18238 = vmatprep.mubr.f32.mxu0 %v7940_v31  ;;  %v20998_v31 = vld [vmem:[#allocation36_spill] sm:$0xff] }
 0x43d   :  { %18239 = vmatmul.mubr.f32.vlgmr.msra.gmra.mxu0 %v7950_v26  ;;  %18264 = vmatmul.mubr.f32.vlgmr.msra.gmra.mxu1 %v7946_v42 }
 0x43e   :  { %18247 = vmatpush3.msra.mxu0 %v20067_v34  ;;  %18248 = vmatprep.mubr.f32.mxu0 %v7937_v53  ;;  %v20992_v53 = vld [vmem:[#allocation43_spill] sm:$0xff] }
 0x43f   :  { %18256 = vmatprep.subr.mxu0 %v20074_v10  ;;  %18278 = vmatpush3.msra.mxu1 %v19194_v30  ;;  %v8474_v30 = vsub.f32 %v20121_v15, %v20132_v49 }
 0x440   :  { %18279 = vmatprep.subr.mxu1 %v19198_v32  ;;  %18285 = vmatprep.mubr.f32.mxu1 %v20102_v50 }
 0x441   :  { %18249 = vmatmul.mubr.f32.vlgmr.msra.gmra.mxu0 %v7947_v28  ;;  %18280 = vmatpush3.msra.mxu1 %v19198_v32  ;;  %v20150_v32 = vand.u32 4294901760, %v8474_v30  ;;  %v20989_v28 = vld [vmem:[#allocation41_spill] sm:$0xff] }
 0x442   :  { %18257 = vmatpush3.msra.mxu0 %v20074_v10  ;;  %18258 = vmatprep.mubr.f32.mxu0 %v7936_v33  ;;  %v20990_v33 = vld [vmem:[#allocation33_spill] sm:$0xff] }
 0x443   :  { %18266 = vmatprep.subr.mxu0 %v19119_v3  ;;  %18281 = vmatprep.subr.mxu1 %v19209_v36 }
 0x444   :  { %18282 = vmatpush3.msra.mxu1 %v19209_v36  ;;  %v20974_v36 = vld [vmem:[#allocation17_spill] sm:$0xff] }
 0x445   :  { %18259 = vmatmul.mubr.f32.vlgmr.msra.gmra.mxu0 %v7946_v42  ;;  %18283 = vmatprep.subr.mxu1 %v19214_v37  ;;  %v20987_v42 = vld [vmem:[#allocation40_spill] sm:$0xff] }
 0x446   :  { %18267 = vmatpush3.msra.mxu0 %v19119_v3  ;;  %18274 = vmatprep.mubr.f32.mxu0 %v20135_v6 }
 0x447   :  { %18268 = vmatprep.subr.mxu0 %v19121_v4  ;;  %18284 = vmatpush3.msra.mxu1 %v19214_v37  ;;  %v20975_v37 = vld [vmem:[#allocation26_spill] sm:$0xff] }
 0x448   :  { %18269 = vmatpush3.msra.mxu0 %v19121_v4  ;;  %18286 = vmatmul.mubr.f32.vlgmr.msra.gmra.mxu1 %v20113_v39 }
 0x449   :  { %18270 = vmatprep.subr.mxu0 %v19123_v5  ;;  %18299 = vmatprep.subr.mxu1 %v19119_v3 }
 0x44a   :  { %18271 = vmatpush3.msra.mxu0 %v19123_v5  ;;  %18300 = vmatpush3.msra.mxu1 %v19119_v3 }
 0x44b   :  { %18272 = vmatprep.subr.mxu0 %v19134_v9  ;;  %18301 = vmatprep.subr.mxu1 %v19121_v4 }
 0x44c   :  { %18273 = vmatpush3.msra.mxu0 %v19134_v9  ;;  %18302 = vmatpush3.msra.mxu1 %v19121_v4 }
 0x44d   :  { %18275 = vmatmul.mubr.f32.vlgmr.msra.gmra.mxu0 %v20150_v32  ;;  %18288 = vmatprep.subr.mxu0 %v19140_v12 }
 0x44e   :  { %18289 = vmatpush3.msra.mxu0 %v19140_v12  ;;  %18303 = vmatprep.subr.mxu1 %v19123_v5  ;;  %v20966_v12 = vld [vmem:[#allocation8_spill] sm:$0xff] }
 0x44f   :  { %18290 = vmatprep.subr.mxu0 %v19145_v14  ;;  %18304 = vmatpush3.msra.mxu1 %v19123_v5 }
 0x450   :  { %18291 = vmatpush3.msra.mxu0 %v19145_v14  ;;  %18305 = vmatprep.subr.mxu1 %v19134_v9  ;;  %v20967_v14 = vld [vmem:[#allocation10_spill] sm:$0xff] }
 0x451   :  { %18292 = vmatprep.subr.mxu0 %v19151_v16  ;;  %18296 = vmatprep.mubr.f32.mxu0 %v20109_v29 }
 0x452   :  { %18293 = vmatpush3.msra.mxu0 %v19151_v16  ;;  %18306 = vmatpush3.msra.mxu1 %v19134_v9  ;;  %v20968_v16 = vld [vmem:[#allocation11_spill] sm:$0xff] }
 0x453   :  { %18294 = vmatprep.subr.mxu0 %v19154_v17  ;;  %18307 = vmatprep.mubr.f32.mxu1 %v20117_v35 }
 0x454   :  { %18295 = vmatpush3.msra.mxu0 %v19154_v17  ;;  %18321 = vmatprep.subr.mxu1 %v19119_v3  ;;  %v20969_v17 = vld [vmem:[#allocation12_spill] sm:$0xff] }
 0x455   :  { %18297 = vmatmul.mubr.f32.vlgmr.msra.gmra.mxu0 %v20121_v15  ;;  %18310 = vmatprep.subr.mxu0 %v19158_v18 }
 0x456   :  { %18308 = vmatmul.mubr.f32.vlgmr.msra.gmra.mxu1 %v20132_v49  ;;  %18311 = vmatpush3.msra.mxu0 %v19158_v18  ;;  %v20970_v18 = vld [vmem:[#allocation13_spill] sm:$0xff] }
 0x457   :  { %18322 = vmatpush3.msra.mxu1 %v19119_v3  ;;  %18312 = vmatprep.subr.mxu0 %v19164_v20  ;;  %v20962_v3 = vld [vmem:[#allocation5_spill] sm:$0xff] }
 0x458   :  { %18323 = vmatprep.subr.mxu1 %v19121_v4  ;;  %18313 = vmatpush3.msra.mxu0 %v19164_v20  ;;  %v20971_v20 = vld [vmem:[#allocation24_spill] sm:$0xff] }
 0x459   :  { %18324 = vmatpush3.msra.mxu1 %v19121_v4  ;;  %18314 = vmatprep.subr.mxu0 %v19172_v22  ;;  %v20963_v4 = vld [vmem:[#allocation7_spill] sm:$0xff] }
 0x45a   :  { %18325 = vmatprep.subr.mxu1 %v19123_v5  ;;  %18315 = vmatpush3.msra.mxu0 %v19172_v22  ;;  %v20972_v22 = vld [vmem:[#allocation15_spill] sm:$0xff] }
 0x45b   :  { %18326 = vmatpush3.msra.mxu1 %v19123_v5  ;;  %18316 = vmatprep.subr.mxu0 %v19175_v23  ;;  %v20964_v5 = vld [vmem:[#allocation9_spill] sm:$0xff] }
 0x45c   :  { %18327 = vmatprep.subr.mxu1 %v19134_v9  ;;  %18317 = vmatpush3.msra.mxu0 %v19175_v23  ;;  %v20973_v23 = vld [vmem:[#allocation25_spill] sm:$0xff] }
 0x45d   :  { %18318 = vmatprep.mubr.f32.mxu0 %v20102_v50  ;;  %18328 = vmatpush3.msra.mxu1 %v19134_v9  ;;  %v20965_v9 = vld [vmem:[#allocation6_spill] sm:$0xff] }
 0x45e   :  { %18329 = vmatprep.mubr.f32.mxu1 %v20102_v50  ;;  %18319 = vmatmul.mubr.f32.vlgmr.msra.gmra.mxu0 %v20113_v39 }
 0x45f   :  { %18330 = vmatmul.mubr.f32.vlgmr.msra.gmra.mxu1 %v20113_v39  ;;  %18332 = vmatprep.subr.mxu0 %v19236_v40 }
 0x460   :  { %18333 = vmatpush3.msra.mxu0 %v19236_v40  ;;  %18343 = vmatprep.subr.mxu1 %v19310_v56 }
 0x461   :  { %18334 = vmatprep.subr.mxu0 %v19242_v41  ;;  %18344 = vmatpush3.msra.mxu1 %v19310_v56  ;;  %v20981_v56 = vld [vmem:[#allocation18_spill] sm:$0xff] }
 0x462   :  { %18335 = vmatpush3.msra.mxu0 %v19242_v41  ;;  %18345 = vmatprep.subr.mxu1 %v19318_v58 }
 0x463   :  { %18336 = vmatprep.subr.mxu0 %v19259_v45  ;;  %18346 = vmatpush3.msra.mxu1 %v19318_v58  ;;  %v20982_v58 = vld [vmem:[#allocation20_spill] sm:$0xff] }
 0x464   :  { %18337 = vmatpush3.msra.mxu0 %v19259_v45  ;;  %18347 = vmatprep.subr.mxu1 %v19328_v60 }
 0x465   :  { %18338 = vmatprep.subr.mxu0 %v19268_v47  ;;  %18348 = vmatpush3.msra.mxu1 %v19328_v60  ;;  %v20983_v60 = vld [vmem:[#allocation22_spill] sm:$0xff] }
 0x466   :  { %18339 = vmatpush3.msra.mxu0 %v19268_v47  ;;  %18340 = vmatprep.mubr.f32.mxu0 %v20135_v6 }
 0x467   :  { %18349 = vmatprep.subr.mxu1 %v19334_v61  ;;  %18354 = vmatprep.subr.mxu0 %v19255_v44 }
 0x468   :  { %18341 = vmatmul.mubr.f32.vlgmr.msra.gmra.mxu0 %v20150_v32  ;;  %18350 = vmatpush3.msra.mxu1 %v19334_v61  ;;  %v20984_v61 = vld [vmem:[#allocation23_spill] sm:$0xff] }
 0x469   :  { %18351 = vmatprep.mubr.f32.mxu1 %v20102_v50  ;;  %18355 = vmatpush3.msra.mxu0 %v19255_v44  ;;  %v20978_v44 = vld [vmem:[#allocation16_spill] sm:$0xff] }
 0x46a   :  { %18352 = vmatmul.mubr.f32.vlgmr.msra.gmra.mxu1 %v20113_v39  ;;  %18356 = vmatprep.subr.mxu0 %v20962_v3 }
 0x46b   :  { %18365 = vmatprep.subr.mxu1 %v19236_v40  ;;  %18357 = vmatpush3.msra.mxu0 %v20962_v3 }
 0x46c   :  { %18366 = vmatpush3.msra.mxu1 %v19236_v40  ;;  %18358 = vmatprep.subr.mxu0 %v20963_v4 }
 0x46d   :  { %18367 = vmatprep.subr.mxu1 %v19242_v41  ;;  %18359 = vmatpush3.msra.mxu0 %v20963_v4 }
 0x46e   :  { %18368 = vmatpush3.msra.mxu1 %v19242_v41  ;;  %18360 = vmatprep.subr.mxu0 %v20964_v5 }
 0x46f   :  { %18369 = vmatprep.subr.mxu1 %v19259_v45  ;;  %18361 = vmatpush3.msra.mxu0 %v20964_v5 }
 0x470   :  { %18362 = vmatprep.mubr.f32.mxu0 %v20109_v29  ;;  %18370 = vmatpush3.msra.mxu1 %v19259_v45 }
 0x471   :  { %18363 = vmatmul.mubr.f32.vlgmr.msra.gmra.mxu0 %v20121_v15  ;;  %18371 = vmatprep.subr.mxu1 %v19268_v47 }
 0x472   :  { %18376 = vmatprep.subr.mxu0 %v20965_v9  ;;  %18372 = vmatpush3.msra.mxu1 %v19268_v47 }
 0x473   :  { %18373 = vmatprep.mubr.f32.mxu1 %v20117_v35  ;;  %18377 = vmatpush3.msra.mxu0 %v20965_v9 }
 0x474   :  { %18374 = vmatmul.mubr.f32.vlgmr.msra.gmra.mxu1 %v20132_v49  ;;  %18378 = vmatprep.subr.mxu0 %v20966_v12 }
 0x475   :  { %18387 = vmatprep.subr.mxu1 %v19236_v40  ;;  %18379 = vmatpush3.msra.mxu0 %v20966_v12 }
 0x476   :  { %18388 = vmatpush3.msra.mxu1 %v19236_v40  ;;  %18380 = vmatprep.subr.mxu0 %v20967_v14  ;;  %v20976_v40 = vld [vmem:[#allocation27_spill] sm:$0xff] }
 0x477   :  { %18389 = vmatprep.subr.mxu1 %v19242_v41  ;;  %18381 = vmatpush3.msra.mxu0 %v20967_v14 }
 0x478   :  { %18390 = vmatpush3.msra.mxu1 %v19242_v41  ;;  %18382 = vmatprep.subr.mxu0 %v20968_v16  ;;  %v20977_v41 = vld [vmem:[#allocation14_spill] sm:$0xff] }
 0x479   :  { %18391 = vmatprep.subr.mxu1 %v19259_v45  ;;  %18383 = vmatpush3.msra.mxu0 %v20968_v16 }
 0x47a   :  { %18384 = vmatprep.mubr.f32.mxu0 %v20102_v50  ;;  %18392 = vmatpush3.msra.mxu1 %v19259_v45  ;;  %v20979_v45 = vld [vmem:[#allocation19_spill] sm:$0xff] }
 0x47b   :  { %18385 = vmatmul.mubr.f32.vlgmr.msra.gmra.mxu0 %v20113_v39  ;;  %18393 = vmatprep.subr.mxu1 %v19268_v47 }
 0x47c   :  { %18398 = vmatprep.subr.mxu0 %v20969_v17  ;;  %18394 = vmatpush3.msra.mxu1 %v19268_v47  ;;  %v20980_v47 = vld [vmem:[#allocation21_spill] sm:$0xff] }
 0x47d   :  { %18395 = vmatprep.mubr.f32.mxu1 %v20102_v50  ;;  %18399 = vmatpush3.msra.mxu0 %v20969_v17 }
 0x47e   :  { %18396 = vmatmul.mubr.f32.vlgmr.msra.gmra.mxu1 %v20113_v39  ;;  %18400 = vmatprep.subr.mxu0 %v20970_v18 }
 0x47f   :  { %18409 = vmatprep.subr.mxu1 %v20971_v20  ;;  %18401 = vmatpush3.msra.mxu0 %v20970_v18 }
 0x480   :  { %18410 = vmatpush3.msra.mxu1 %v20971_v20  ;;  %18402 = vmatprep.subr.mxu0 %v20972_v22 }
 0x481   :  { %18411 = vmatprep.subr.mxu1 %v20973_v23  ;;  %18403 = vmatpush3.msra.mxu0 %v20972_v22 }
 0x482   :  { %18412 = vmatpush3.msra.mxu1 %v20973_v23  ;;  %18404 = vmatprep.subr.mxu0 %v20974_v36 }
 0x483   :  { %18413 = vmatprep.subr.mxu1 %v20975_v37  ;;  %18405 = vmatpush3.msra.mxu0 %v20974_v36 }
 0x484   :  { %18414 = vmatpush3.msra.mxu1 %v20975_v37  ;;  %18406 = vmatprep.mubr.f32.mxu0 %v20135_v6 }
 0x485   :  { %18415 = vmatprep.subr.mxu1 %v20976_v40  ;;  %18420 = vmatprep.subr.mxu0 %v20977_v41 }
 0x486   :  { %18407 = vmatmul.mubr.f32.vlgmr.msra.gmra.mxu0 %v20150_v32  ;;  %18416 = vmatpush3.msra.mxu1 %v20976_v40  ;;  %v18155_v26 = vpop.f32.mrf.mxu1 }
 0x487   :  { %18417 = vmatprep.mubr.f32.mxu1 %v20102_v50  ;;  %18421 = vmatpush3.msra.mxu0 %v20977_v41 }
 0x488   :  { %18418 = vmatmul.mubr.f32.vlgmr.msra.gmra.mxu1 %v20113_v39  ;;  %18422 = vmatprep.subr.mxu0 %v20978_v44 }
 0x489   :  { %18431 = vmatprep.subr.mxu1 %v20969_v17  ;;  %18423 = vmatpush3.msra.mxu0 %v20978_v44 }
 0x48a   :  { %18432 = vmatpush3.msra.mxu1 %v20969_v17  ;;  %18424 = vmatprep.subr.mxu0 %v20979_v45 }
 0x48b   :  { %18433 = vmatprep.subr.mxu1 %v20970_v18  ;;  %18425 = vmatpush3.msra.mxu0 %v20979_v45 }
 0x48c   :  { %18434 = vmatpush3.msra.mxu1 %v20970_v18  ;;  %18426 = vmatprep.subr.mxu0 %v20980_v47 }
 0x48d   :  { %18435 = vmatprep.subr.mxu1 %v20972_v22  ;;  %18427 = vmatpush3.msra.mxu0 %v20980_v47 }
 0x48e   :  { %18428 = vmatprep.mubr.f32.mxu0 %v20109_v29  ;;  %18436 = vmatpush3.msra.mxu1 %v20972_v22 }
 0x48f   :  { %18429 = vmatmul.mubr.f32.vlgmr.msra.gmra.mxu0 %v20121_v15  ;;  %18437 = vmatprep.subr.mxu1 %v20974_v36 }
 0x490   :  { %18442 = vmatprep.subr.mxu0 %v20981_v56  ;;  %18438 = vmatpush3.msra.mxu1 %v20974_v36 }
 0x491   :  { %18439 = vmatprep.mubr.f32.mxu1 %v20117_v35  ;;  %18443 = vmatpush3.msra.mxu0 %v20981_v56 }
 0x492   :  { %18440 = vmatmul.mubr.f32.vlgmr.msra.gmra.mxu1 %v20132_v49  ;;  %18444 = vmatprep.subr.mxu0 %v20982_v58 }
 0x493   :  { %18453 = vmatprep.subr.mxu1 %v20969_v17  ;;  %18445 = vmatpush3.msra.mxu0 %v20982_v58 }
 0x494   :  { %18454 = vmatpush3.msra.mxu1 %v20969_v17  ;;  %18446 = vmatprep.subr.mxu0 %v20983_v60 }
 0x495   :  { %18455 = vmatprep.subr.mxu1 %v20970_v18  ;;  %18447 = vmatpush3.msra.mxu0 %v20983_v60 }
 0x496   :  { %18456 = vmatpush3.msra.mxu1 %v20970_v18  ;;  %18448 = vmatprep.subr.mxu0 %v20984_v61 }
 0x497   :  { %18457 = vmatprep.subr.mxu1 %v20972_v22  ;;  %18449 = vmatpush3.msra.mxu0 %v20984_v61 }
 0x498   :  { %18450 = vmatprep.mubr.f32.mxu0 %v20102_v50  ;;  %18458 = vmatpush3.msra.mxu1 %v20972_v22 }
 0x499   :  { %18451 = vmatmul.mubr.f32.vlgmr.msra.gmra.mxu0 %v20113_v39  ;;  %18459 = vmatprep.subr.mxu1 %v20974_v36 }
 0x49a   :  { %18464 = vmatprep.subr.mxu0 %v20985_v21  ;;  %18460 = vmatpush3.msra.mxu1 %v20974_v36 }
 0x49b   :  { %18461 = vmatprep.mubr.f32.mxu1 %v20102_v50  ;;  %18465 = vmatpush3.msra.mxu0 %v20985_v21 }
 0x49c   :  { %18462 = vmatmul.mubr.f32.vlgmr.msra.gmra.mxu1 %v20113_v39  ;;  %18466 = vmatprep.subr.mxu0 %v20986_v0 }
 0x49d   :  { %18475 = vmatprep.subr.mxu1 %v20987_v42  ;;  %18467 = vmatpush3.msra.mxu0 %v20986_v0 }
 0x49e   :  { %18476 = vmatpush3.msra.mxu1 %v20987_v42  ;;  %18468 = vmatprep.subr.mxu0 %v20988_v2 }
 0x49f   :  { %18477 = vmatprep.subr.mxu1 %v20989_v28  ;;  %18469 = vmatpush3.msra.mxu0 %v20988_v2 }
 0x4a0   :  { %18478 = vmatpush3.msra.mxu1 %v20989_v28  ;;  %18470 = vmatprep.subr.mxu0 %v20990_v33 }
 0x4a1   :  { %18479 = vmatprep.subr.mxu1 %v20991_v25  ;;  %18471 = vmatpush3.msra.mxu0 %v20990_v33 }
 0x4a2   :  { %18480 = vmatpush3.msra.mxu1 %v20991_v25  ;;  %18472 = vmatprep.mubr.f32.mxu0 %v20135_v6 }
 0x4a3   :  { %18481 = vmatprep.subr.mxu1 %v20992_v53  ;;  %18486 = vmatprep.subr.mxu0 %v20993_v19 }
 0x4a4   :  { %18473 = vmatmul.mubr.f32.vlgmr.msra.gmra.mxu0 %v20150_v32  ;;  %18482 = vmatpush3.msra.mxu1 %v20992_v53 }
 0x4a5   :  { %18487 = vmatpush3.msra.mxu0 %v20993_v19  ;;  %18483 = vmatprep.mubr.f32.mxu1 %v20102_v50 }
 0x4a6   :  { %18488 = vmatprep.subr.mxu0 %v20994_v7  ;;  %18497 = vmatprep.subr.mxu1 %v20985_v21 }
 0x4a7   :  { %18484 = vmatmul.mubr.f32.vlgmr.msra.gmra.mxu1 %v20113_v39  ;;  %18489 = vmatpush3.msra.mxu0 %v20994_v7 }
 0x4a8   :  { %18498 = vmatpush3.msra.mxu1 %v20985_v21  ;;  %18490 = vmatprep.subr.mxu0 %v20995_v55 }
 0x4a9   :  { %18499 = vmatprep.subr.mxu1 %v20986_v0  ;;  %18491 = vmatpush3.msra.mxu0 %v20995_v55 }
 0x4aa   :  { %18500 = vmatpush3.msra.mxu1 %v20986_v0  ;;  %18492 = vmatprep.subr.mxu0 %v20996_v51 }
 0x4ab   :  { %18501 = vmatprep.subr.mxu1 %v20988_v2  ;;  %18493 = vmatpush3.msra.mxu0 %v20996_v51 }
 0x4ac   :  { %18502 = vmatpush3.msra.mxu1 %v20988_v2  ;;  %18494 = vmatprep.mubr.f32.mxu0 %v20109_v29  ;;  %v20999_v29 = vld [vmem:[#allocation38_spill] sm:$0xff] }
 0x4ad   :  { %18503 = vmatprep.subr.mxu1 %v20990_v33  ;;  %18508 = vmatprep.subr.mxu0 %v20997_v63 }
 0x4ae   :  { %18495 = vmatmul.mubr.f32.vlgmr.msra.gmra.mxu0 %v20121_v15  ;;  %18504 = vmatpush3.msra.mxu1 %v20990_v33  ;;  %v6543_v15 = vpop.f32.mrf.mxu1 }
 0x4af   :  { %18509 = vmatpush3.msra.mxu0 %v20997_v63  ;;  %18505 = vmatprep.mubr.f32.mxu1 %v20117_v35  ;;  %v21000_v35 = vld [vmem:[#allocation39_spill] sm:$0xff] }
 0x4b0   :  { %18510 = vmatprep.subr.mxu0 %v20998_v31  ;;  %18519 = vmatprep.subr.mxu1 %v20985_v21  ;;  %v18165_v1 = vpop.f32.mrf.mxu1 }
 0x4b1   :  { %18506 = vmatmul.mubr.f32.vlgmr.msra.gmra.mxu1 %v20132_v49  ;;  %18511 = vmatpush3.msra.mxu0 %v20998_v31  ;;  %v18150_v49 = vpop.f32.mrf.mxu0 }
 0x4b2   :  { %18520 = vmatpush3.msra.mxu1 %v20985_v21  ;;  %18512 = vmatprep.subr.mxu0 %v20999_v29  ;;  %v6704_v6 = vpop.f32.mrf.mxu1 }
 0x4b3   :  { %18521 = vmatprep.subr.mxu1 %v20986_v0  ;;  %18513 = vmatpush3.msra.mxu0 %v20999_v29  ;;  %v6457_v30 = vpop.f32.mrf.mxu0 }
 0x4b4   :  { %18522 = vmatpush3.msra.mxu1 %v20986_v0  ;;  %18514 = vmatprep.subr.mxu0 %v21000_v35  ;;  %v18175_v32 = vpop.f32.mrf.mxu1  ;;  %v6550_v0 = vadd.f32 %v18155_v26, %v18150_v49  ;;  %v6544_v53 = vadd.f32 %v6543_v15, %v6457_v30 }
 0x4b5   :  { %18523 = vmatprep.subr.mxu1 %v20988_v2  ;;  %18515 = vmatpush3.msra.mxu0 %v21000_v35  ;;  %v18160_v3 = vpop.f32.mrf.mxu0 }
 0x4b6   :  { %18516 = vmatprep.mubr.f32.mxu0 %v20102_v50  ;;  %18524 = vmatpush3.msra.mxu1 %v20988_v2  ;;  %v20376_v4 = vpop.f32.mrf.mxu1  ;;  %v6631_v19 = vadd.f32 %v18160_v3, %v6550_v0 }
 0x4b7   :  { %18517 = vmatmul.mubr.f32.vlgmr.msra.gmra.mxu0 %v20113_v39  ;;  %18525 = vmatprep.subr.mxu1 %v20990_v33  ;;  %v6623_v5 = vpop.f32.mrf.mxu0 }
 0x4b8   :  { %18526 = vmatpush3.msra.mxu1 %v20990_v33  ;;  %18527 = vmatprep.mubr.f32.mxu1 %v20102_v50  ;;  %v18185_v9 = vpop.f32.mrf.mxu1  ;;  %v6624_v31 = vadd.f32 %v6623_v5, %v6544_v53  ;;  %v6713_v34 = vadd.f32 %v18165_v1, %v6631_v19  ;;  %v16727_v19 = vld [vmem:[%s20823_s3] ss:$0 sm:$0xff] }
 0x4b9   :  { %18528 = vmatmul.mubr.f32.vlgmr.msra.gmra.mxu1 %v20113_v39  ;;  %v18170_v12 = vpop.f32.mrf.mxu0 }
 0x4ba   :  { %v7038_v14 = vpop.f32.mrf.mxu1  ;;  %v6705_v26 = vadd.f32 %v6704_v6, %v6624_v31 }
 0x4bb   :  { %v6786_v16 = vpop.f32.mrf.mxu0 }
 0x4bc   :  { %v18195_v17 = vpop.f32.mrf.mxu1 }
 0x4bd   :  { %v18180_v18 = vpop.f32.mrf.mxu0 }
 0x4be   :  { %v7199_v20 = vpop.f32.mrf.mxu1  ;;  %v7045_v21 = vadd.f32 %v18185_v9, %v18180_v18 }
 0x4bf   :  { %v6952_v22 = vpop.f32.mrf.mxu0 }
 0x4c0   :  { %v18205_v50 = vpop.f32.mrf.mxu1  ;;  %v7039_v28 = vadd.f32 %v7038_v14, %v6952_v22  ;;  %v6793_v22 = vadd.f32 %v18170_v12, %v6713_v34 }
 0x4c1   :  { %v18190_v23 = vpop.f32.mrf.mxu0 }
 0x4c2   :  { %v7359_v39 = vpop.f32.mrf.mxu1  ;;  %v7126_v33 = vadd.f32 %v18190_v23, %v7045_v21 }
 0x4c3   :  { %v7118_v36 = vpop.f32.mrf.mxu0 }
 0x4c4   :  { %v18215_v37 = vpop.f32.mrf.mxu1  ;;  %v7119_v55 = vadd.f32 %v7118_v36, %v7039_v28  ;;  %v7208_v35 = vadd.f32 %v18195_v17, %v7126_v33  ;;  %v6787_v36 = vadd.f32 %v6786_v16, %v6705_v26  ;;  %v6871_v17 = vadd.f32 %v18175_v32, %v6793_v22 }
 0x4c5   :  { %v18200_v40 = vpop.f32.mrf.mxu0 }
 0x4c6   :  { %v7533_v41 = vpop.f32.mrf.mxu1  ;;  %v7200_v48 = vadd.f32 %v7199_v20, %v7119_v55  ;;  %v7288_v18 = vadd.f32 %v18200_v40, %v7208_v35  ;;  %v6865_v40 = vadd.f32 %v20376_v4, %v6787_v36  ;;  %v8366_v16 = vsel %vm50_vm0, %v6871_v17, 0.0 }
 0x4c7   :  { %v7281_v44 = vpop.f32.mrf.mxu0 }
 0x4c8   :  { %v18225_v45 = vpop.f32.mrf.mxu1  ;;  %v7282_v30 = vadd.f32 %v7281_v44, %v7200_v48  ;;  %v8359_v4 = vsel %vm50_vm0, %v6865_v40, 0.0 }
 0x4ca   :  { %v7694_v56 = vpop.f32.mrf.mxu1 }
 0x4cc   :  { %v18210_v47 = vpop.f32.mrf.mxu0  ;;  %v18235_v60 = vpop.f32.mrf.mxu1 }
 0x4cd   :  { %v7540_v25 = vadd.f32 %v18215_v37, %v18210_v47 }
 0x4ce   :  { %v7447_v58 = vpop.f32.mrf.mxu0  ;;  %v7854_v42 = vpop.f32.mrf.mxu1 }
 0x4cf   :  { %v7534_v51 = vadd.f32 %v7533_v41, %v7447_v58  ;;  %v7366_v41 = vadd.f32 %v18205_v50, %v7288_v18 }
 0x4d0   :  { %v18220_v61 = vpop.f32.mrf.mxu0 }
 0x4d1   :  { %v7621_v63 = vadd.f32 %v18220_v61, %v7540_v25  ;;  %v7360_v61 = vadd.f32 %v7359_v39, %v7282_v30  ;;  %v8367_v34 = vsel %vm50_vm0, %v7366_v41, 0.0 }
 0x4d2   :  { %v7613_v2 = vpop.f32.mrf.mxu0 }
 0x4d3   :  { %v7614_v10 = vadd.f32 %v7613_v2, %v7534_v51  ;;  %v7703_v9 = vadd.f32 %v18225_v45, %v7621_v63  ;;  %v8360_v32 = vsel %vm50_vm0, %v7360_v61, 0.0 }
 0x4d4   :  { %v18230_v29 = vpop.f32.mrf.mxu0  ;;  %v8361_v33 = vadd.f32 %v8360_v32, %v8359_v4 }
 0x4d5   :  { %v7695_v14 = vadd.f32 %v7694_v56, %v7614_v10  ;;  %v7783_v3 = vadd.f32 %v18230_v29, %v7703_v9 }
 0x4d6   :  { %v7776_v49 = vpop.f32.mrf.mxu0 }
 0x4d7   :  { %v7777_v5 = vadd.f32 %v7776_v49, %v7695_v14  ;;  %v7861_v20 = vadd.f32 %v18235_v60, %v7783_v3 }
 0x4d9   :  { %v7855_v12 = vadd.f32 %v7854_v42, %v7777_v5  ;;  %v8369_v21 = vsel %vm50_vm0, %v7861_v20, 0.0 }
 0x4db   :  { %v8362_v2 = vsel %vm50_vm0, %v7855_v12, 0.0 }
 0x4dc   :  { %v8363_v51 = vadd.f32 %v8362_v2, %v8361_v33 }
 0x4f5   :  { %v18245_v7 = vpop.f32.mrf.mxu1 }
 0x4f7   :  { %v8028_v24 = vpop.f32.mrf.mxu1 }
 0x4f9   :  { %v18255_v23 = vpop.f32.mrf.mxu1 }
 0x4fb   :  { %v8189_v58 = vpop.f32.mrf.mxu1 }
 0x4fd   :  { %v18240_v15 = vpop.f32.mrf.mxu0  ;;  %v18265_v50 = vpop.f32.mrf.mxu1 }
 0x4fe   :  { %v8035_v47 = vadd.f32 %v18245_v7, %v18240_v15 }
 0x4ff   :  { %v7942_v37 = vpop.f32.mrf.mxu0  ;;  %v8349_v53 = vpop.f32.mrf.mxu1 }
 0x500   :  { %v8029_v45 = vadd.f32 %v8028_v24, %v7942_v37  ;;  %v8368_v24 = vadd.f32 %v8367_v34, %v8366_v16 }
 0x501   :  { %v18250_v1 = vpop.f32.mrf.mxu0 }
 0x502   :  { %v8116_v6 = vadd.f32 %v18250_v1, %v8035_v47  ;;  %v8370_v25 = vadd.f32 %v8369_v21, %v8368_v24 }
 0x503   :  { %v8108_v10 = vpop.f32.mrf.mxu0 }
 0x504   :  { %v8109_v48 = vadd.f32 %v8108_v10, %v8029_v45  ;;  %v8198_v44 = vadd.f32 %v18255_v23, %v8116_v6 }
 0x505   :  { %v18260_v56 = vpop.f32.mrf.mxu0 }
 0x506   :  { %v8278_v39 = vadd.f32 %v18260_v56, %v8198_v44  ;;  %v8190_v60 = vadd.f32 %v8189_v58, %v8109_v48 }
 0x507   :  { %v8271_v0 = vpop.f32.mrf.mxu0 }
 0x508   :  { %v8356_v28 = vadd.f32 %v18265_v50, %v8278_v39  ;;  %v8272_v42 = vadd.f32 %v8271_v0, %v8190_v60  ;;  %v18287_v49 = vpop.f32.mrf.mxu1 }
 0x50a   :  { %v8371_v7 = vsel %vm50_vm0, %v8356_v28, 0.0  ;;  %v8350_v55 = vadd.f32 %v8349_v53, %v8272_v42  ;;  %v8568_v22 = vpop.f32.mrf.mxu1 }
 0x50b   :  { %v8372_v63 = vadd.f32 %v8371_v7, %v8370_v25 }
 0x50c   :  { %v8364_v31 = vsel %vm50_vm0, %v8350_v55, 0.0 }
 0x50d   :  { %v8380_v29 = vadd.f32 %v16727_v19, %v8372_v63  ;;  %v8365_v35 = vadd.f32 %v8364_v31, %v8363_v51  ;;  %v18276_v26 = vpop.f32.mrf.mxu0 }
 0x50e   :  { %v8575_v23 = vadd.f32 %v18287_v49, %v18276_v26 }
 0x50f   :  { %8382 = vst.msk [vmem:[#allocation2 + $0x8] sm:$0xff] %vm50_vm0, %v8380_v29  ;;  %v8379_v9 = vadd.f32 %v16727_v19, %v8365_v35  ;;  %v8467_v18 = vpop.f32.mrf.mxu0 }
 0x510   :  { %v8569_v3 = vadd.f32 %v8568_v22, %v8467_v18 }
 0x511   :  { %8381 = vst.msk [vmem:[#allocation2] sm:$0xff] %vm50_vm0, %v8379_v9 }
 0x515   :  { %v18298_v14 = vpop.f32.mrf.mxu0 }
 0x516   :  { %v18309_v15 = vpop.f32.mrf.mxu1  ;;  %v8662_v36 = vadd.f32 %v18298_v14, %v8575_v23 }
 0x517   :  { %v8654_v30 = vpop.f32.mrf.mxu0 }
 0x518   :  { %v8655_v37 = vadd.f32 %v8654_v30, %v8569_v3  ;;  %v8738_v41 = vpop.f32.mrf.mxu1  ;;  %v8747_v5 = vadd.f32 %v18309_v15, %v8662_v36 }
 0x51a   :  { %v8739_v17 = vadd.f32 %v8738_v41, %v8655_v37 }
 0x51e   :  { %v18320_v47 = vpop.f32.mrf.mxu0 }
 0x51f   :  { %v8836_v58 = vadd.f32 %v18320_v47, %v8747_v5  ;;  %v18331_v1 = vpop.f32.mrf.mxu1 }
 0x520   :  { %v8829_v61 = vpop.f32.mrf.mxu0 }
 0x521   :  { %v20392_v20 = vadd.f32 %v18331_v1, %v8836_v58  ;;  %v8830_v45 = vadd.f32 %v8829_v61, %v8739_v17  ;;  %v8910_v6 = vpop.f32.mrf.mxu1 }
 0x523   :  { %v20394_v40 = vadd.f32 %v8910_v6, %v8830_v45  ;;  %10508 = vrot.lane.b32.xlu1 %v20392_v20, %s19079_s1 }
 0x525   :  { %v10510_v10 = vsel %vm2175_vm1, %v20394_v40, 0  ;;  %10506 = vrot.lane.b32.xlu0 %v20394_v40, %s19079_s1 }
 0x526   :  { %v20402_v34 = vand.u32 4294901760, %v10510_v10 }
 0x528   :  { %v20405_v12 = vsub.f32 %v10510_v10, %v20402_v34  ;;  %18541 = vmatprep.mubr.f32.mxu1 %v20402_v34  ;;  %v18342_v44 = vpop.f32.mrf.mxu0 }
 0x52a   :  { %v10587_v48 = vand.u32 4294901760, %v20405_v12  ;;  %v18353_v56 = vpop.f32.mrf.mxu1  ;;  %v8995_v32 = vpop.f32.mrf.mxu0 }
 0x52b   :  { %v9103_v39 = vadd.f32 %v18353_v56, %v18342_v44 }
 0x52c   :  { %v10588_v16 = vsub.f32 %v20405_v12, %v10587_v48  ;;  %v9096_v60 = vpop.f32.mrf.mxu1 }
 0x52d   :  { %v9097_v2 = vadd.f32 %v9096_v60, %v8995_v32 }
 0x52e   :  { %v10589_v50 = vand.u32 4294901760, %v10588_v16 }
 0x530   :  { %18534 = vmatprep.mubr.f32.mxu0 %v10589_v50 }
 0x531   :  { %v18364_v21 = vpop.f32.mrf.mxu0 }
 0x532   :  { %v9190_v24 = vadd.f32 %v18364_v21, %v9103_v39 }
 0x533   :  { %v9182_v0 = vpop.f32.mrf.mxu0 }
 0x534   :  { %v18375_v4 = vpop.f32.mrf.mxu1  ;;  %v9183_v28 = vadd.f32 %v9182_v0, %v9097_v2 }
 0x535   :  { %v9275_v42 = vadd.f32 %v18375_v4, %v9190_v24 }
 0x536   :  { %v9266_v33 = vpop.f32.mrf.mxu1 }
 0x537   :  { %v9267_v19 = vadd.f32 %v9266_v33, %v9183_v28 }
 0x53b   :  { %v18386_v25 = vpop.f32.mrf.mxu0 }
 0x53c   :  { %v9364_v53 = vadd.f32 %v18386_v25, %v9275_v42 }
 0x53d   :  { %v9357_v7 = vpop.f32.mrf.mxu0 }
 0x53e   :  { %v18397_v55 = vpop.f32.mrf.mxu1  ;;  %v9358_v51 = vadd.f32 %v9357_v7, %v9267_v19 }
 0x53f   :  { %v20412_v63 = vadd.f32 %v18397_v55, %v9364_v53 }
 0x540   :  { %v9438_v31 = vpop.f32.mrf.mxu1 }
 0x541   :  { %11024 = vrot.lane.b32.xlu1 %v20412_v63, %s19079_s1  ;;  %v20416_v29 = vadd.f32 %v9438_v31, %v9358_v51  ;;  %v10512_v31 = vsel %vm2175_vm1, %v20392_v20, 0 }
 0x545   :  { %11022 = vrot.lane.b32.xlu1 %v20416_v29, %s19079_s1 }
 0x546   :  { %v18408_v35 = vpop.f32.mrf.mxu0 }
 0x548   :  { %v18419_v9 = vpop.f32.mrf.mxu1  ;;  %v9523_v26 = vpop.f32.mrf.mxu0 }
 0x549   :  { %v9631_v14 = vadd.f32 %v18419_v9, %v18408_v35  ;;  %v20444_v35 = vand.u32 4294901760, %v10512_v31 }
 0x54a   :  { %v9624_v18 = vpop.f32.mrf.mxu1 }
 0x54b   :  { %v9625_v15 = vadd.f32 %v9624_v18, %v9523_v26  ;;  %v10596_v9 = vsub.f32 %v10512_v31, %v20444_v35 }
 0x54d   :  { %v10597_v18 = vand.u32 4294901760, %v10596_v9 }
 0x54f   :  { %v18430_v49 = vpop.f32.mrf.mxu0 }
 0x550   :  { %v9718_v30 = vadd.f32 %v18430_v49, %v9631_v14 }
 0x551   :  { %v9710_v22 = vpop.f32.mrf.mxu0 }
 0x552   :  { %v18441_v23 = vpop.f32.mrf.mxu1  ;;  %v9711_v3 = vadd.f32 %v9710_v22, %v9625_v15 }
 0x553   :  { %v9803_v37 = vadd.f32 %v18441_v23, %v9718_v30  ;;  %v10598_v30 = vsub.f32 %v10596_v9, %v10597_v18 }
 0x554   :  { %v9794_v36 = vpop.f32.mrf.mxu1 }
 0x555   :  { %v9795_v5 = vadd.f32 %v9794_v36, %v9711_v3 }
 0x559   :  { %v18452_v41 = vpop.f32.mrf.mxu0 }
 0x55a   :  { %v9892_v47 = vadd.f32 %v18452_v41, %v9803_v37  ;;  %v11026_v41 = vsel %vm2175_vm1, %v20416_v29, 0 }
 0x55b   :  { %v9885_v17 = vpop.f32.mrf.mxu0 }
 0x55c   :  { %v9886_v58 = vadd.f32 %v9885_v17, %v9795_v5  ;;  %v18463_v1 = vpop.f32.mrf.mxu1  ;;  %v10599_v5 = vand.u32 4294901760, %v10598_v30 }
 0x55d   :  { %v20420_v61 = vadd.f32 %v18463_v1, %v9892_v47 }
 0x55e   :  { %v9966_v45 = vpop.f32.mrf.mxu1 }
 0x55f   :  { %v20422_v6 = vadd.f32 %v9966_v45, %v9886_v58  ;;  %11540 = vrot.lane.b32.xlu0 %v20420_v61, %s19079_s1  ;;  %v20451_v58 = vand.u32 4294901760, %v11026_v41 }
 0x561   :  { %11538 = vrot.lane.b32.xlu1 %v20422_v6, %s19079_s1  ;;  %v20455_v45 = vsub.f32 %v11026_v41, %v20451_v58 }
 0x564   :  { %v18474_v10 = vpop.f32.mrf.mxu0 }
 0x566   :  { %v10051_v16 = vpop.f32.mrf.mxu0 }
 0x567   :  { %v18485_v44 = vpop.f32.mrf.mxu1 }
 0x568   :  { %v10159_v56 = vadd.f32 %v18485_v44, %v18474_v10  ;;  %v11103_v10 = vand.u32 4294901760, %v20455_v45  ;;  %v11028_v44 = vsel %vm2175_vm1, %v20412_v63, 0 }
 0x569   :  { %v10152_v50 = vpop.f32.mrf.mxu1 }
 0x56a   :  { %v10153_v32 = vadd.f32 %v10152_v50, %v10051_v16  ;;  %v20464_v16 = vand.u32 4294901760, %v11028_v44  ;;  %v11104_v50 = vsub.f32 %v20455_v45, %v11103_v10 }
 0x56e   :  { %v18496_v21 = vpop.f32.mrf.mxu0 }
 0x56f   :  { %v10246_v39 = vadd.f32 %v18496_v21, %v10159_v56 }
 0x570   :  { %v10238_v60 = vpop.f32.mrf.mxu0 }
 0x571   :  { %v18507_v24 = vpop.f32.mrf.mxu1  ;;  %v10239_v0 = vadd.f32 %v10238_v60, %v10153_v32 }
 0x572   :  { %v10331_v2 = vadd.f32 %v18507_v24, %v10246_v39 }
 0x573   :  { %v10322_v4 = vpop.f32.mrf.mxu1 }
 0x574   :  { %v10323_v28 = vadd.f32 %v10322_v4, %v10239_v0 }
 0x577   :  { %v18518_v42 = vpop.f32.mrf.mxu0 }
 0x578   :  { %v10420_v33 = vadd.f32 %v18518_v42, %v10331_v2  ;;  %v11542_v42 = vsel %vm2175_vm1, %v20422_v6, 0 }
 0x579   :  { %v10413_v25 = vpop.f32.mrf.mxu0  ;;  %v18529_v53 = vpop.f32.mrf.mxu1 }
 0x57a   :  { %v10414_v19 = vadd.f32 %v10413_v25, %v10323_v28  ;;  %v20428_v7 = vadd.f32 %v18529_v53, %v10420_v33 }
 0x57b   :  { %v10494_v55 = vpop.f32.mrf.mxu1 }
 0x57c   :  { %v20430_v51 = vadd.f32 %v10494_v55, %v10414_v19  ;;  %12056 = vrot.lane.b32.xlu0 %v20428_v7, %s19079_s1  ;;  %v20482_v19 = vand.u32 4294901760, %v11542_v42 }
 0x57e   :  { %12054 = vrot.lane.b32.xlu1 %v20430_v51, %s19079_s1 }
 0x580   :  { %12640 = vrot.lane.b32.xlu0 %v20394_v40, %s19080_s25 }
 0x582   :  { %12642 = vrot.lane.b32.xlu1 %v20392_v20, %s19080_s25 }
 0x586   :  { %13156 = vrot.lane.b32.xlu1 %v20412_v63, %s19080_s25  ;;  %v20470_v63 = vsub.f32 %v11028_v44, %v20464_v16 }
 0x588   :  { %v11113_v32 = vand.u32 4294901760, %v20470_v63 }
 0x58a   :  { %v11114_v0 = vsub.f32 %v20470_v63, %v11113_v32 }
 0x58c   :  { %v11115_v33 = vand.u32 4294901760, %v11114_v0 }
 0x595   :  { %v10509_v26 = vpop.permute.xlu1 %10508 }
 0x596   :  { %v10516_v49 = vsel %vm2175_vm1, %v10509_v26, 0  ;;  %v11544_v26 = vsel %vm2175_vm1, %v20420_v61, 0 }
 0x597   :  { %v10547_v14 = vand.u32 4294901760, %v10516_v49  ;;  %v10507_v22 = vpop.permute.xlu0 %10506 }
 0x598   :  { %v10514_v40 = vsel %vm2175_vm1, %v10507_v22, 0 }
 0x599   :  { %v10635_v23 = vsub.f32 %v10516_v49, %v10547_v14  ;;  %v10550_v15 = vand.u32 4294901760, %v10514_v40  ;;  %18530 = vmatprep.subr.mxu0 %v10547_v14  ;;  %v20496_v49 = vand.u32 4294901760, %v11544_v26 }
 0x59a   :  { %18531 = vmatpush3.xpose.msra.mxu0 %v10547_v14 }
 0x59b   :  { %v10642_v3 = vsub.f32 %v10514_v40, %v10550_v15  ;;  %18532 = vmatprep.subr.mxu0 %v10550_v15  ;;  %v10636_v20 = vand.u32 4294901760, %v10635_v23 }
 0x59d   :  { %v10637_v36 = vsub.f32 %v10635_v23, %v10636_v20  ;;  %v10643_v37 = vand.u32 4294901760, %v10642_v3 }
 0x59e   :  { %18533 = vmatpush3.xpose.msra.mxu0 %v10550_v15 }
 0x59f   :  { %18544 = vmatprep.subr.mxu0 %v10635_v23  ;;  %v10638_v47 = vand.u32 4294901760, %v10637_v36  ;;  %v10644_v17 = vsub.f32 %v10642_v3, %v10643_v37 }
 0x5a1   :  { %18535 = vmatmul.mubr.f32.vlgmr.msra.gmra.mxu0 %v10599_v5  ;;  %18537 = vmatprep.subr.mxu1 %v10638_v47  ;;  %v10645_v1 = vand.u32 4294901760, %v10644_v17 }
 0x5a2   :  { %18538 = vmatpush3.xpose.msra.mxu1 %v10638_v47  ;;  %18545 = vmatpush3.xpose.msra.mxu0 %v10635_v23 }
 0x5a3   :  { %18548 = vmatprep.mubr.f32.mxu0 %v20405_v12  ;;  %18539 = vmatprep.subr.mxu1 %v10645_v1  ;;  %v11105_v12 = vand.u32 4294901760, %v11104_v50 }
 0x5a4   :  { %18546 = vmatprep.subr.mxu0 %v10642_v3 }
 0x5a6   :  { %18540 = vmatpush3.xpose.msra.mxu1 %v10645_v1  ;;  %18547 = vmatpush3.xpose.msra.mxu0 %v10642_v3  ;;  %v12058_v1 = vsel %vm2175_vm1, %v20430_v51, 0 }
 0x5a7   :  { %18551 = vmatprep.subr.mxu1 %v10547_v14  ;;  %18558 = vmatprep.subr.mxu0 %v10636_v20  ;;  %v20514_v50 = vand.u32 4294901760, %v12058_v1 }
 0x5a9   :  { %18542 = vmatmul.mubr.f32.vlgmr.msra.gmra.mxu1 %v20444_v35  ;;  %18549 = vmatmul.mubr.f32.vlgmr.msra.gmra.mxu0 %v10596_v9 }
 0x5aa   :  { %18552 = vmatpush3.xpose.msra.mxu1 %v10547_v14  ;;  %18555 = vmatprep.mubr.f32.mxu1 %v10587_v48 }
 0x5ab   :  { %18559 = vmatpush3.xpose.msra.mxu0 %v10636_v20  ;;  %18562 = vmatprep.mubr.f32.mxu0 %v20402_v34 }
 0x5ac   :  { %18553 = vmatprep.subr.mxu1 %v10550_v15  ;;  %18560 = vmatprep.subr.mxu0 %v10643_v37 }
 0x5ae   :  { %18554 = vmatpush3.xpose.msra.mxu1 %v10550_v15 }
 0x5af   :  { %18561 = vmatpush3.xpose.msra.mxu0 %v10643_v37  ;;  %18565 = vmatprep.subr.mxu1 %v10547_v14 }
 0x5b1   :  { %18556 = vmatmul.mubr.f32.vlgmr.msra.gmra.mxu1 %v10597_v18 }
 0x5b2   :  { %18563 = vmatmul.mubr.f32.vlgmr.msra.gmra.mxu0 %v20444_v35  ;;  %18566 = vmatpush3.xpose.msra.mxu1 %v10547_v14  ;;  %v20502_v14 = vsub.f32 %v11544_v26, %v20496_v49 }
 0x5b3   :  { %v11025_v48 = vpop.permute.xlu1 %11024  ;;  %18569 = vmatprep.mubr.f32.mxu1 %v20402_v34  ;;  %18576 = vmatprep.mubr.f32.mxu0 %v11105_v12  ;;  %v12060_v12 = vsel %vm2175_vm1, %v20428_v7, 0 }
 0x5b4   :  { %v11032_v56 = vsel %vm2175_vm1, %v11025_v48, 0  ;;  %18567 = vmatprep.subr.mxu1 %v10550_v15 }
 0x5b5   :  { %v11063_v21 = vand.u32 4294901760, %v11032_v56 }
 0x5b6   :  { %18568 = vmatpush3.xpose.msra.mxu1 %v10550_v15  ;;  %v11629_v15 = vand.u32 4294901760, %v20502_v14 }
 0x5b7   :  { %v11151_v39 = vsub.f32 %v11032_v56, %v11063_v21  ;;  %v11023_v60 = vpop.permute.xlu1 %11022  ;;  %18572 = vmatprep.subr.mxu0 %v11063_v21  ;;  %v20528_v56 = vand.u32 4294901760, %v12060_v12 }
 0x5b8   :  { %v11030_v24 = vsel %vm2175_vm1, %v11023_v60, 0  ;;  %18573 = vmatpush3.xpose.msra.mxu0 %v11063_v21  ;;  %v11630_v41 = vsub.f32 %v20502_v14, %v11629_v15 }
 0x5b9   :  { %v11066_v4 = vand.u32 4294901760, %v11030_v24  ;;  %18570 = vmatmul.mubr.f32.vlgmr.msra.gmra.mxu1 %v20444_v35  ;;  %v11152_v34 = vand.u32 4294901760, %v11151_v39  ;;  %v20486_v35 = vsub.f32 %v11542_v42, %v20482_v19 }
 0x5ba   :  { %18583 = vmatprep.mubr.f32.mxu1 %v20451_v58 }
 0x5bb   :  { %v11158_v2 = vsub.f32 %v11030_v24, %v11066_v4  ;;  %18574 = vmatprep.subr.mxu0 %v11066_v4  ;;  %v11153_v28 = vsub.f32 %v11151_v39, %v11152_v34  ;;  %v11619_v9 = vand.u32 4294901760, %v20486_v35 }
 0x5bc   :  { %18575 = vmatpush3.xpose.msra.mxu0 %v11066_v4 }
 0x5bd   :  { %18586 = vmatprep.subr.mxu0 %v11151_v39  ;;  %v11154_v25 = vand.u32 4294901760, %v11153_v28  ;;  %v11159_v53 = vand.u32 4294901760, %v11158_v2  ;;  %v11620_v18 = vsub.f32 %v20486_v35, %v11619_v9 }
 0x5bf   :  { %18577 = vmatmul.mubr.f32.vlgmr.msra.gmra.mxu0 %v11115_v33  ;;  %18579 = vmatprep.subr.mxu1 %v11154_v25  ;;  %v11160_v55 = vsub.f32 %v11158_v2, %v11159_v53  ;;  %v11621_v22 = vand.u32 4294901760, %v11620_v18 }
 0x5c0   :  { %18580 = vmatpush3.xpose.msra.mxu1 %v11154_v25  ;;  %18587 = vmatpush3.xpose.msra.mxu0 %v11151_v39 }
 0x5c1   :  { %18590 = vmatprep.mubr.f32.mxu0 %v20455_v45  ;;  %18588 = vmatprep.subr.mxu0 %v11158_v2  ;;  %v11161_v31 = vand.u32 4294901760, %v11160_v55  ;;  %v11631_v45 = vand.u32 4294901760, %v11630_v41 }
 0x5c3   :  { %18581 = vmatprep.subr.mxu1 %v11161_v31 }
 0x5c4   :  { %18582 = vmatpush3.xpose.msra.mxu1 %v11161_v31  ;;  %18589 = vmatpush3.xpose.msra.mxu0 %v11158_v2 }
 0x5c5   :  { %18593 = vmatprep.subr.mxu1 %v11063_v21  ;;  %18600 = vmatprep.subr.mxu0 %v11152_v34 }
 0x5c7   :  { %18584 = vmatmul.mubr.f32.vlgmr.msra.gmra.mxu1 %v20464_v16  ;;  %18591 = vmatmul.mubr.f32.vlgmr.msra.gmra.mxu0 %v20470_v63 }
 0x5c8   :  { %18594 = vmatpush3.xpose.msra.mxu1 %v11063_v21  ;;  %18597 = vmatprep.mubr.f32.mxu1 %v11103_v10 }
 0x5c9   :  { %18601 = vmatpush3.xpose.msra.mxu0 %v11152_v34  ;;  %18604 = vmatprep.mubr.f32.mxu0 %v20451_v58 }
 0x5ca   :  { %18595 = vmatprep.subr.mxu1 %v11066_v4  ;;  %18602 = vmatprep.subr.mxu0 %v11159_v53 }
 0x5cc   :  { %18596 = vmatpush3.xpose.msra.mxu1 %v11066_v4 }
 0x5cd   :  { %18603 = vmatpush3.xpose.msra.mxu0 %v11159_v53  ;;  %18607 = vmatprep.subr.mxu1 %v11063_v21 }
 0x5cf   :  { %18598 = vmatmul.mubr.f32.vlgmr.msra.gmra.mxu1 %v11113_v32 }
 0x5d0   :  { %18605 = vmatmul.mubr.f32.vlgmr.msra.gmra.mxu0 %v20464_v16  ;;  %18608 = vmatpush3.xpose.msra.mxu1 %v11063_v21  ;;  %v20534_v21 = vsub.f32 %v12060_v12, %v20528_v56 }
 0x5d1   :  { %v11541_v40 = vpop.permute.xlu0 %11540  ;;  %18611 = vmatprep.mubr.f32.mxu1 %v20451_v58  ;;  %18618 = vmatprep.mubr.f32.mxu0 %v11621_v22 }
 0x5d2   :  { %v11548_v23 = vsel %vm2175_vm1, %v11541_v40, 0  ;;  %18609 = vmatprep.subr.mxu1 %v11066_v4  ;;  %v12145_v0 = vand.u32 4294901760, %v20534_v21 }
 0x5d3   :  { %v11579_v30 = vand.u32 4294901760, %v11548_v23  ;;  %v11539_v3 = vpop.permute.xlu1 %11538 }
 0x5d4   :  { %v11546_v20 = vsel %vm2175_vm1, %v11539_v3, 0  ;;  %18610 = vmatpush3.xpose.msra.mxu1 %v11066_v4  ;;  %v12146_v33 = vsub.f32 %v20534_v21, %v12145_v0 }
 0x5d5   :  { %v11667_v36 = vsub.f32 %v11548_v23, %v11579_v30  ;;  %v11582_v37 = vand.u32 4294901760, %v11546_v20  ;;  %18614 = vmatprep.subr.mxu0 %v11579_v30 }
 0x5d6   :  { %18615 = vmatpush3.xpose.msra.mxu0 %v11579_v30  ;;  %v12147_v31 = vand.u32 4294901760, %v12146_v33 }
 0x5d7   :  { %v11674_v5 = vsub.f32 %v11546_v20, %v11582_v37  ;;  %18616 = vmatprep.subr.mxu0 %v11582_v37  ;;  %18612 = vmatmul.mubr.f32.vlgmr.msra.gmra.mxu1 %v20464_v16  ;;  %v11668_v47 = vand.u32 4294901760, %v11667_v36  ;;  %v20518_v16 = vsub.f32 %v12058_v1, %v20514_v50 }
 0x5d8   :  { %18625 = vmatprep.mubr.f32.mxu1 %v20482_v19 }
 0x5d9   :  { %v11669_v17 = vsub.f32 %v11667_v36, %v11668_v47  ;;  %v11675_v58 = vand.u32 4294901760, %v11674_v5  ;;  %v12135_v48 = vand.u32 4294901760, %v20518_v16 }
 0x5da   :  { %18617 = vmatpush3.xpose.msra.mxu0 %v11582_v37 }
 0x5db   :  { %18628 = vmatprep.subr.mxu0 %v11667_v36  ;;  %v11670_v10 = vand.u32 4294901760, %v11669_v17  ;;  %v11676_v44 = vsub.f32 %v11674_v5, %v11675_v58  ;;  %v12136_v32 = vsub.f32 %v20518_v16, %v12135_v48 }
 0x5dd   :  { %18619 = vmatmul.mubr.f32.vlgmr.msra.gmra.mxu0 %v11631_v45  ;;  %18621 = vmatprep.subr.mxu1 %v11670_v10  ;;  %v11677_v63 = vand.u32 4294901760, %v11676_v44  ;;  %v12137_v39 = vand.u32 4294901760, %v12136_v32 }
 0x5de   :  { %18622 = vmatpush3.xpose.msra.mxu1 %v11670_v10  ;;  %18629 = vmatpush3.xpose.msra.mxu0 %v11667_v36 }
 0x5df   :  { %18632 = vmatprep.mubr.f32.mxu0 %v20486_v35  ;;  %18623 = vmatprep.subr.mxu1 %v11677_v63 }
 0x5e0   :  { %18630 = vmatprep.subr.mxu0 %v11674_v5 }
 0x5e2   :  { %18624 = vmatpush3.xpose.msra.mxu1 %v11677_v63  ;;  %18631 = vmatpush3.xpose.msra.mxu0 %v11674_v5 }
 0x5e3   :  { %18635 = vmatprep.subr.mxu1 %v11579_v30  ;;  %18642 = vmatprep.subr.mxu0 %v11668_v47 }
 0x5e5   :  { %18626 = vmatmul.mubr.f32.vlgmr.msra.gmra.mxu1 %v20496_v49  ;;  %18633 = vmatmul.mubr.f32.vlgmr.msra.gmra.mxu0 %v20502_v14 }
 0x5e6   :  { %18636 = vmatpush3.xpose.msra.mxu1 %v11579_v30  ;;  %18639 = vmatprep.mubr.f32.mxu1 %v11619_v9 }
 0x5e7   :  { %18643 = vmatpush3.xpose.msra.mxu0 %v11668_v47  ;;  %18646 = vmatprep.mubr.f32.mxu0 %v20482_v19 }
 0x5e8   :  { %18637 = vmatprep.subr.mxu1 %v11582_v37  ;;  %18644 = vmatprep.subr.mxu0 %v11675_v58 }
 0x5ea   :  { %18638 = vmatpush3.xpose.msra.mxu1 %v11582_v37 }
 0x5eb   :  { %18645 = vmatpush3.xpose.msra.mxu0 %v11675_v58  ;;  %18649 = vmatprep.subr.mxu1 %v11579_v30 }
 0x5ed   :  { %18640 = vmatmul.mubr.f32.vlgmr.msra.gmra.mxu1 %v11629_v15 }
 0x5ee   :  { %v12057_v60 = vpop.permute.xlu0 %12056  ;;  %18647 = vmatmul.mubr.f32.vlgmr.msra.gmra.mxu0 %v20496_v49  ;;  %18650 = vmatpush3.xpose.msra.mxu1 %v11579_v30 }
 0x5ef   :  { %v12064_v24 = vsel %vm2175_vm1, %v12057_v60, 0  ;;  %18653 = vmatprep.mubr.f32.mxu1 %v20482_v19  ;;  %18660 = vmatprep.mubr.f32.mxu0 %v12137_v39 }
 0x5f0   :  { %v12095_v4 = vand.u32 4294901760, %v12064_v24  ;;  %v12055_v34 = vpop.permute.xlu1 %12054  ;;  %18651 = vmatprep.subr.mxu1 %v11582_v37 }
 0x5f1   :  { %v12062_v2 = vsel %vm2175_vm1, %v12055_v34, 0 }
 0x5f2   :  { %v12183_v28 = vsub.f32 %v12064_v24, %v12095_v4  ;;  %v12098_v42 = vand.u32 4294901760, %v12062_v2  ;;  %18656 = vmatprep.subr.mxu0 %v12095_v4  ;;  %18652 = vmatpush3.xpose.msra.mxu1 %v11582_v37  ;;  %v12641_v14 = vpop.permute.xlu0 %12640 }
 0x5f3   :  { %18657 = vmatpush3.xpose.msra.mxu0 %v12095_v4  ;;  %v20547_v22 = vand.u32 4294901760, %v12641_v14 }
 0x5f4   :  { %v12190_v25 = vsub.f32 %v12062_v2, %v12098_v42  ;;  %18658 = vmatprep.subr.mxu0 %v12098_v42  ;;  %v12184_v53 = vand.u32 4294901760, %v12183_v28  ;;  %v12643_v18 = vpop.permute.xlu1 %12642 }
 0x5f5   :  { %18654 = vmatmul.mubr.f32.vlgmr.msra.gmra.mxu1 %v20496_v49  ;;  %v20545_v49 = vand.u32 4294901760, %v12643_v18  ;;  %v20558_v23 = vsub.f32 %v12641_v14, %v20547_v22 }
 0x5f6   :  { %v12185_v19 = vsub.f32 %v12183_v28, %v12184_v53  ;;  %18667 = vmatprep.mubr.f32.mxu1 %v20514_v50  ;;  %v12191_v55 = vand.u32 4294901760, %v12190_v25 }
 0x5f7   :  { %18659 = vmatpush3.xpose.msra.mxu0 %v12098_v42  ;;  %v20550_v40 = vsub.f32 %v12643_v18, %v20545_v49  ;;  %v20567_v3 = vand.u32 4294901760, %v20558_v23 }
 0x5f8   :  { %v12186_v35 = vand.u32 4294901760, %v12185_v19  ;;  %18670 = vmatprep.subr.mxu0 %v12183_v28  ;;  %v12192_v9 = vsub.f32 %v12190_v25, %v12191_v55 }
 0x5f9   :  { %v20561_v15 = vand.u32 4294901760, %v20550_v40  ;;  %v12778_v36 = vsub.f32 %v20558_v23, %v20567_v3 }
 0x5fa   :  { %18661 = vmatmul.mubr.f32.vlgmr.msra.gmra.mxu0 %v12147_v31  ;;  %18663 = vmatprep.subr.mxu1 %v12186_v35  ;;  %v12193_v26 = vand.u32 4294901760, %v12192_v9 }
 0x5fb   :  { %18664 = vmatpush3.xpose.msra.mxu1 %v12186_v35  ;;  %18671 = vmatpush3.xpose.msra.mxu0 %v12183_v28  ;;  %v12771_v30 = vsub.f32 %v20550_v40, %v20561_v15  ;;  %v12779_v37 = vand.u32 4294901760, %v12778_v36 }
 0x5fc   :  { %18674 = vmatprep.mubr.f32.mxu0 %v20518_v16  ;;  %18665 = vmatprep.subr.mxu1 %v12193_v26 }
 0x5fd   :  { %18672 = vmatprep.subr.mxu0 %v12190_v25  ;;  %v12772_v20 = vand.u32 4294901760, %v12771_v30 }
 0x5ff   :  { %18666 = vmatpush3.xpose.msra.mxu1 %v12193_v26  ;;  %18673 = vmatpush3.xpose.msra.mxu0 %v12190_v25 }
 0x600   :  { %18677 = vmatprep.subr.mxu1 %v12095_v4  ;;  %18684 = vmatprep.subr.mxu0 %v12184_v53 }
 0x602   :  { %18668 = vmatmul.mubr.f32.vlgmr.msra.gmra.mxu1 %v20528_v56  ;;  %18675 = vmatmul.mubr.f32.vlgmr.msra.gmra.mxu0 %v20534_v21 }
 0x603   :  { %18678 = vmatpush3.xpose.msra.mxu1 %v12095_v4  ;;  %18681 = vmatprep.mubr.f32.mxu1 %v12135_v48 }
 0x604   :  { %18685 = vmatpush3.xpose.msra.mxu0 %v12184_v53  ;;  %18688 = vmatprep.mubr.f32.mxu0 %v20514_v50 }
 0x605   :  { %18679 = vmatprep.subr.mxu1 %v12098_v42  ;;  %18686 = vmatprep.subr.mxu0 %v12191_v55 }
 0x607   :  { %18680 = vmatpush3.xpose.msra.mxu1 %v12098_v42 }
 0x608   :  { %18687 = vmatpush3.xpose.msra.mxu0 %v12191_v55  ;;  %18691 = vmatprep.subr.mxu1 %v12095_v4 }
 0x609   :  { %18698 = vmatprep.subr.mxu0 %v20545_v49 }
 0x60a   :  { %18682 = vmatmul.mubr.f32.vlgmr.msra.gmra.mxu1 %v12145_v0 }
 0x60b   :  { %18689 = vmatmul.mubr.f32.vlgmr.msra.gmra.mxu0 %v20528_v56  ;;  %18692 = vmatpush3.xpose.msra.mxu1 %v12095_v4 }
 0x60c   :  { %18695 = vmatprep.mubr.f32.mxu1 %v20514_v50  ;;  %18699 = vmatpush3.msra.mxu0 %v20545_v49 }
 0x60d   :  { %18693 = vmatprep.subr.mxu1 %v12098_v42  ;;  %18700 = vmatprep.subr.mxu0 %v20547_v22 }
 0x60e   :  { %18701 = vmatpush3.msra.mxu0 %v20547_v22 }
 0x60f   :  { %18712 = vmatprep.subr.mxu0 %v20550_v40  ;;  %18694 = vmatpush3.xpose.msra.mxu1 %v12098_v42 }
 0x610   :  { %18705 = vmatprep.subr.mxu1 %v12772_v20 }
 0x612   :  { %18696 = vmatmul.mubr.f32.vlgmr.msra.gmra.mxu1 %v20528_v56 }
 0x613   :  { %18706 = vmatpush3.msra.mxu1 %v12772_v20 }
 0x614   :  { %18707 = vmatprep.subr.mxu1 %v12779_v37 }
 0x615   :  { %18708 = vmatpush3.msra.mxu1 %v12779_v37 }
 0x616   :  { %18719 = vmatprep.subr.mxu1 %v20545_v49 }
 0x661   :  { %v18536_v41 = vpop.f32.mrf.mxu0 }
 0x662   :  { %v10602_v17 = vadd.f32 %v18536_v41, %v19818_v43 }
 0x663   :  { %v10591_v47 = vpop.f32.mrf.mxu0 }
 0x664   :  { %v10592_v1 = vadd.f32 %v10591_v47, %v19820_v54 }
 0x669   :  { %v18543_v5 = vpop.f32.mrf.mxu1  ;;  %v18550_v10 = vpop.f32.mrf.mxu0 }
 0x66a   :  { %v10689_v45 = vadd.f32 %v18543_v5, %v10602_v17 }
 0x66b   :  { %v10682_v58 = vpop.f32.mrf.mxu1  ;;  %v10764_v16 = vpop.f32.mrf.mxu0 }
 0x66c   :  { %v10683_v44 = vadd.f32 %v10682_v58, %v10592_v1  ;;  %v10772_v63 = vadd.f32 %v18550_v10, %v10689_v45 }
 0x66e   :  { %v10765_v48 = vadd.f32 %v10764_v16, %v10683_v44 }
 0x671   :  { %v18557_v50 = vpop.f32.mrf.mxu1 }
 0x672   :  { %v10855_v56 = vadd.f32 %v18557_v50, %v10772_v63  ;;  %v18564_v32 = vpop.f32.mrf.mxu0 }
 0x673   :  { %v10846_v12 = vpop.f32.mrf.mxu1 }
 0x674   :  { %v10847_v21 = vadd.f32 %v10846_v12, %v10765_v48  ;;  %v10938_v39 = vadd.f32 %v18564_v32, %v10855_v56  ;;  %v10931_v60 = vpop.f32.mrf.mxu0 }
 0x676   :  { %v10932_v0 = vadd.f32 %v10931_v60, %v10847_v21 }
 0x679   :  { %v18571_v24 = vpop.f32.mrf.mxu1 }
 0x67a   :  { %v20581_v4 = vadd.f32 %v18571_v24, %v10938_v39 }
 0x67b   :  { %v11010_v34 = vpop.f32.mrf.mxu1 }
 0x67c   :  { %v20583_v2 = vadd.f32 %v11010_v34, %v10932_v0  ;;  %v12571_v28 = vsel %vm4234_vm4, %v20581_v4, -inf }
 0x67d   :  { %12572 = vmax.xlane.f32.xlu1 %v12571_v28 }
 0x67e   :  { %v12568_v42 = vsel %vm4234_vm4, %v20583_v2, -inf }
 0x67f   :  { %12569 = vmax.xlane.f32.xlu0 %v12568_v42  ;;  %v18578_v33 = vpop.f32.mrf.mxu0 }
 0x680   :  { %v11118_v19 = vadd.f32 %v18578_v33, %v19818_v43 }
 0x681   :  { %v11107_v53 = vpop.f32.mrf.mxu0 }
 0x682   :  { %v11108_v31 = vadd.f32 %v11107_v53, %v19820_v54 }
 0x687   :  { %v18585_v25 = vpop.f32.mrf.mxu1  ;;  %v18592_v9 = vpop.f32.mrf.mxu0 }
 0x688   :  { %v11205_v35 = vadd.f32 %v18585_v25, %v11118_v19 }
 0x689   :  { %v11198_v55 = vpop.f32.mrf.mxu1  ;;  %v11280_v30 = vpop.f32.mrf.mxu0 }
 0x68a   :  { %v11199_v26 = vadd.f32 %v11198_v55, %v11108_v31  ;;  %v11288_v14 = vadd.f32 %v18592_v9, %v11205_v35 }
 0x68c   :  { %v11281_v36 = vadd.f32 %v11280_v30, %v11199_v26 }
 0x68e   :  { %13670 = vrot.lane.b32.xlu1 %v20420_v61, %s19080_s25 }
 0x68f   :  { %v18599_v18 = vpop.f32.mrf.mxu1 }
 0x690   :  { %v11371_v37 = vadd.f32 %v18599_v18, %v11288_v14  ;;  %v18606_v41 = vpop.f32.mrf.mxu0 }
 0x691   :  { %v11362_v20 = vpop.f32.mrf.mxu1 }
 0x692   :  { %v11363_v5 = vadd.f32 %v11362_v20, %v11281_v36  ;;  %v11454_v47 = vadd.f32 %v18606_v41, %v11371_v37  ;;  %v11447_v17 = vpop.f32.mrf.mxu0 }
 0x694   :  { %v11448_v1 = vadd.f32 %v11447_v17, %v11363_v5 }
 0x697   :  { %v18613_v58 = vpop.f32.mrf.mxu1 }
 0x698   :  { %v20593_v45 = vadd.f32 %v18613_v58, %v11454_v47 }
 0x699   :  { %v11526_v10 = vpop.f32.mrf.mxu1 }
 0x69a   :  { %v20595_v44 = vadd.f32 %v11526_v10, %v11448_v1  ;;  %v12577_v61 = vsel %vm4234_vm4, %v20593_v45, -inf }
 0x69b   :  { %12578 = vmax.xlane.f32.xlu0 %v12577_v61 }
 0x69c   :  { %v12574_v50 = vsel %vm4234_vm4, %v20595_v44, -inf }
 0x69d   :  { %v18620_v63 = vpop.f32.mrf.mxu0 }
 0x69e   :  { %v11634_v48 = vadd.f32 %v18620_v63, %v19818_v43 }
 0x69f   :  { %12575 = vmax.xlane.f32.xlu0 %v12574_v50  ;;  %v11623_v12 = vpop.f32.mrf.mxu0 }
 0x6a0   :  { %v11624_v32 = vadd.f32 %v11623_v12, %v19820_v54 }
 0x6a5   :  { %v18627_v16 = vpop.f32.mrf.mxu1  ;;  %v18634_v39 = vpop.f32.mrf.mxu0 }
 0x6a6   :  { %v11721_v21 = vadd.f32 %v18627_v16, %v11634_v48 }
 0x6a7   :  { %v11714_v56 = vpop.f32.mrf.mxu1  ;;  %v11796_v34 = vpop.f32.mrf.mxu0 }
 0x6a8   :  { %v11715_v60 = vadd.f32 %v11714_v56, %v11624_v32  ;;  %v11804_v0 = vadd.f32 %v18634_v39, %v11721_v21 }
 0x6aa   :  { %v11797_v42 = vadd.f32 %v11796_v34, %v11715_v60 }
 0x6ad   :  { %v18641_v24 = vpop.f32.mrf.mxu1 }
 0x6ae   :  { %v11887_v33 = vadd.f32 %v18641_v24, %v11804_v0  ;;  %v18648_v25 = vpop.f32.mrf.mxu0  ;;  %v13157_v0 = vpop.permute.xlu1 %13156 }
 0x6af   :  { %v11878_v28 = vpop.f32.mrf.mxu1 }
 0x6b0   :  { %v11879_v53 = vadd.f32 %v11878_v28, %v11797_v42  ;;  %v11970_v19 = vadd.f32 %v18648_v25, %v11887_v33  ;;  %v11963_v55 = vpop.f32.mrf.mxu0 }
 0x6b2   :  { %v11964_v35 = vadd.f32 %v11963_v55, %v11879_v53 }
 0x6b5   :  { %v18655_v31 = vpop.f32.mrf.mxu1 }
 0x6b6   :  { %v20603_v9 = vadd.f32 %v18655_v31, %v11970_v19  ;;  %v20631_v19 = vand.u32 4294901760, %v13157_v0 }
 0x6b7   :  { %v12042_v26 = vpop.f32.mrf.mxu1 }
 0x6b8   :  { %v20605_v18 = vadd.f32 %v12042_v26, %v11964_v35  ;;  %v12583_v14 = vsel %vm4234_vm4, %v20603_v9, -inf  ;;  %v20635_v35 = vsub.f32 %v13157_v0, %v20631_v19 }
 0x6b9   :  { %12584 = vmax.xlane.f32.xlu0 %v12583_v14 }
 0x6ba   :  { %v12580_v30 = vsel %vm4234_vm4, %v20605_v18, -inf  ;;  %v18662_v20 = vpop.f32.mrf.mxu0 }
 0x6bb   :  { %12581 = vmax.xlane.f32.xlu1 %v12580_v30  ;;  %v12150_v41 = vadd.f32 %v18662_v20, %v19818_v43  ;;  %v20639_v20 = vand.u32 4294901760, %v20635_v35 }
 0x6bc   :  { %v12139_v37 = vpop.f32.mrf.mxu0 }
 0x6bd   :  { %v12140_v47 = vadd.f32 %v12139_v37, %v19820_v54 }
 0x6c2   :  { %v18669_v36 = vpop.f32.mrf.mxu1  ;;  %v18676_v58 = vpop.f32.mrf.mxu0 }
 0x6c3   :  { %v12237_v17 = vadd.f32 %v18669_v36, %v12150_v41 }
 0x6c4   :  { %v12230_v5 = vpop.f32.mrf.mxu1  ;;  %v12312_v50 = vpop.f32.mrf.mxu0 }
 0x6c5   :  { %v12231_v10 = vadd.f32 %v12230_v5, %v12140_v47  ;;  %v12320_v61 = vadd.f32 %v18676_v58, %v12237_v17  ;;  %v13285_v5 = vsub.f32 %v20635_v35, %v20639_v20 }
 0x6c7   :  { %v12313_v16 = vadd.f32 %v12312_v50, %v12231_v10 }
 0x6ca   :  { %v18683_v1 = vpop.f32.mrf.mxu1 }
 0x6cb   :  { %v18690_v12 = vpop.f32.mrf.mxu0 }
 0x6cc   :  { %13668 = vrot.lane.b32.xlu1 %v20422_v6, %s19080_s25  ;;  %v12394_v63 = vpop.f32.mrf.mxu1  ;;  %v12403_v6 = vadd.f32 %v18683_v1, %v12320_v61  ;;  %v13286_v61 = vand.u32 4294901760, %v13285_v5 }
 0x6cd   :  { %v12479_v32 = vpop.f32.mrf.mxu0 }
 0x6ce   :  { %v12486_v56 = vadd.f32 %v18690_v12, %v12403_v6 }
 0x6cf   :  { %13154 = vrot.lane.b32.xlu0 %v20416_v29, %s19080_s25  ;;  %v12395_v29 = vadd.f32 %v12394_v63, %v12313_v16 }
 0x6d1   :  { %v12480_v39 = vadd.f32 %v12479_v32, %v12395_v29 }
 0x6d2   :  { %v18697_v48 = vpop.f32.mrf.mxu1 }
 0x6d3   :  { %v20617_v43 = vadd.f32 %v18697_v48, %v12486_v56 }
 0x6d4   :  { %v12558_v21 = vpop.f32.mrf.mxu1 }
 0x6d5   :  { %v20619_v60 = vadd.f32 %v12558_v21, %v12480_v39  ;;  %v12589_v54 = vsel %vm4234_vm4, %v20617_v43, -inf }
 0x6d7   :  { %v12586_v24 = vsel %vm4234_vm4, %v20619_v60, -inf }
 0x6ee   :  { %12590 = vmax.xlane.f32.xlu0 %v12589_v54 }
 0x6f0   :  { %12587 = vmax.xlane.f32.xlu1 %v12586_v24 }
 0x701   :  { %14182 = vrot.lane.b32.xlu1 %v20430_v51, %s19080_s25 }
 0x704   :  { %14184 = vrot.lane.b32.xlu0 %v20428_v7, %s19080_s25 }
 0x706   :  { %v12573_v34 = vpop.xlane.xlu1 %12572 }
 0x707   :  { %v12593_v28 = vsub.f32 %v20581_v4, %v12573_v34 }
 0x708   :  { %v12570_v42 = vpop.xlane.xlu0 %12569 }
 0x709   :  { %v12602_v33 = vmul.f32 1.442695, %v12593_v28  ;;  %v12592_v25 = vsub.f32 %v20583_v2, %v12570_v42 }
 0x70a   :  { %v13671_v56 = vpop.permute.xlu1 %13670 }
 0x70b   :  { %19024 = vpow2.f32 %v12602_v33  ;;  %v12600_v53 = vmul.f32 1.442695, %v12592_v25 }
 0x70d   :  { %19026 = vpow2.f32 %v12600_v53 }
 0x718   :  { %v19025_v55 = vpop.eup %19024 }
 0x719   :  { %v12650_v31 = vsel %vm4234_vm4, %v19025_v55, 0  ;;  %v12619_v17 = vsel %vm4234_vm4, %v19025_v55, 0.0 }
 0x71a   :  { %v19027_v51 = vpop.eup %19026  ;;  %v12729_v7 = vand.u32 4294901760, %v12650_v31 }
 0x71b   :  { %v12647_v26 = vsel %vm4234_vm4, %v19027_v51, 0  ;;  %v12616_v36 = vsel %vm4234_vm4, %v19027_v51, 0.0 }
 0x71c   :  { %v12719_v4 = vand.u32 4294901760, %v12647_v26  ;;  %v12730_v14 = vsub.f32 %v12650_v31, %v12729_v7 }
 0x71e   :  { %18709 = vmatprep.mubr.f32.mxu1 %v12719_v4  ;;  %v12720_v30 = vsub.f32 %v12647_v26, %v12719_v4  ;;  %v12731_v2 = vand.u32 4294901760, %v12730_v14  ;;  %v20680_v26 = vand.u32 4294901760, %v13671_v56 }
 0x71f   :  { %18710 = vmatmul.mubr.f32.vlgmr.msra.gmra.mxu1 %v12729_v7 }
 0x720   :  { %18720 = vmatpush3.msra.mxu1 %v20545_v49  ;;  %v12721_v37 = vand.u32 4294901760, %v12720_v30  ;;  %v12732_v47 = vsub.f32 %v12730_v14, %v12731_v2 }
 0x721   :  { %18721 = vmatprep.subr.mxu1 %v20547_v22 }
 0x722   :  { %18722 = vmatpush3.msra.mxu1 %v20547_v22  ;;  %18723 = vmatprep.mubr.f32.mxu1 %v12721_v37  ;;  %v12722_v41 = vsub.f32 %v12720_v30, %v12721_v37  ;;  %v12733_v50 = vand.u32 4294901760, %v12732_v47 }
 0x723   :  { %12617 = vadd.xlane.f32.xlu0 %v12616_v36  ;;  %18733 = vmatprep.subr.mxu1 %v20545_v49 }
 0x724   :  { %v12579_v58 = vpop.xlane.xlu0 %12578  ;;  %18724 = vmatmul.mubr.f32.vlgmr.msra.gmra.mxu1 %v12731_v2  ;;  %v12723_v1 = vand.u32 4294901760, %v12722_v41 }
 0x725   :  { %12620 = vadd.xlane.f32.xlu1 %v12619_v17  ;;  %v12595_v10 = vsub.f32 %v20593_v45, %v12579_v58  ;;  %18734 = vmatpush3.msra.mxu1 %v20545_v49 }
 0x726   :  { %18735 = vmatprep.subr.mxu1 %v20547_v22  ;;  %18737 = vmatprep.mubr.f32.mxu1 %v12719_v4 }
 0x727   :  { %v12606_v63 = vmul.f32 1.442695, %v12595_v10  ;;  %18736 = vmatpush3.msra.mxu1 %v20547_v22  ;;  %18702 = vmatprep.mubr.f32.mxu0 %v12723_v1 }
 0x728   :  { %v12576_v16 = vpop.xlane.xlu0 %12575  ;;  %18747 = vmatprep.subr.mxu1 %v13286_v61  ;;  %18703 = vmatmul.mubr.f32.vlgmr.msra.gmra.mxu0 %v12733_v50 }
 0x729   :  { %19028 = vpow2.f32 %v12606_v63  ;;  %v12594_v6 = vsub.f32 %v20595_v44, %v12576_v16  ;;  %18713 = vmatpush3.msra.mxu0 %v20550_v40  ;;  %18738 = vmatmul.mubr.f32.vlgmr.msra.gmra.mxu1 %v12729_v7 }
 0x72a   :  { %18748 = vmatpush3.msra.mxu1 %v13286_v61  ;;  %18714 = vmatprep.subr.mxu0 %v20558_v23 }
 0x72b   :  { %v12604_v49 = vmul.f32 1.442695, %v12594_v6  ;;  %18716 = vmatprep.mubr.f32.mxu0 %v12720_v30  ;;  %18715 = vmatpush3.msra.mxu0 %v20558_v23 }
 0x72c   :  { %18726 = vmatprep.subr.mxu0 %v20561_v15  ;;  %18717 = vmatmul.mubr.f32.vlgmr.msra.gmra.mxu0 %v12730_v14  ;;  %v20687_v14 = vsub.f32 %v13671_v56, %v20680_v26 }
 0x72d   :  { %19030 = vpow2.f32 %v12604_v49  ;;  %18727 = vmatpush3.msra.mxu0 %v20561_v15  ;;  %18730 = vmatprep.mubr.f32.mxu0 %v12719_v4 }
 0x72e   :  { %18728 = vmatprep.subr.mxu0 %v20567_v3  ;;  %v20699_v2 = vand.u32 4294901760, %v20687_v14 }
 0x72f   :  { %18729 = vmatpush3.msra.mxu0 %v20567_v3 }
 0x730   :  { %18740 = vmatprep.subr.mxu0 %v20631_v19  ;;  %18731 = vmatmul.mubr.f32.vlgmr.msra.gmra.mxu0 %v12729_v7  ;;  %v13799_v17 = vsub.f32 %v20687_v14, %v20699_v2 }
 0x731   :  { %18741 = vmatpush3.msra.mxu0 %v20631_v19 }
 0x732   :  { %v13800_v6 = vand.u32 4294901760, %v13799_v17 }
 0x736   :  { %v19029_v22 = vpop.eup %19028 }
 0x737   :  { %v13164_v40 = vsel %vm4234_vm4, %v19029_v22, 0  ;;  %v12625_v29 = vsel %vm4234_vm4, %v19029_v22, 0.0 }
 0x738   :  { %v20664_v23 = vand.u32 4294901760, %v13164_v40 }
 0x73a   :  { %v19031_v45 = vpop.eup %19030  ;;  %v20671_v3 = vsub.f32 %v13164_v40, %v20664_v23 }
 0x73b   :  { %v12622_v44 = vsel %vm4234_vm4, %v19031_v45, 0.0  ;;  %v13161_v15 = vsel %vm4234_vm4, %v19031_v45, 0 }
 0x73c   :  { %12623 = vadd.xlane.f32.xlu0 %v12622_v44  ;;  %v20668_v12 = vand.u32 4294901760, %v13161_v15  ;;  %v13245_v21 = vand.u32 4294901760, %v20671_v3 }
 0x73e   :  { %18751 = vmatprep.mubr.f32.mxu1 %v20668_v12  ;;  %v13234_v48 = vsub.f32 %v13161_v15, %v20668_v12  ;;  %v13246_v33 = vsub.f32 %v20671_v3, %v13245_v21 }
 0x740   :  { %12626 = vadd.xlane.f32.xlu0 %v12625_v29  ;;  %v13235_v32 = vand.u32 4294901760, %v13234_v48  ;;  %v13247_v51 = vand.u32 4294901760, %v13246_v33 }
 0x742   :  { %v12585_v39 = vpop.xlane.xlu0 %12584  ;;  %v13236_v54 = vsub.f32 %v13234_v48, %v13235_v32 }
 0x743   :  { %v12597_v24 = vsub.f32 %v20603_v9, %v12585_v39 }
 0x744   :  { %v12582_v0 = vpop.xlane.xlu1 %12581  ;;  %v13237_v34 = vand.u32 4294901760, %v13236_v54 }
 0x745   :  { %v12610_v28 = vmul.f32 1.442695, %v12597_v24  ;;  %v12596_v42 = vsub.f32 %v20605_v18, %v12582_v0 }
 0x746   :  { %v13155_v25 = vpop.permute.xlu0 %13154  ;;  %18744 = vmatprep.mubr.f32.mxu0 %v13237_v34 }
 0x747   :  { %19032 = vpow2.f32 %v12610_v28  ;;  %v13198_v53 = vand.u32 4294901760, %v13155_v25  ;;  %v12608_v55 = vmul.f32 1.442695, %v12596_v42 }
 0x748   :  { %v13669_v7 = vpop.permute.xlu1 %13668 }
 0x749   :  { %v13290_v31 = vsub.f32 %v13155_v25, %v13198_v53  ;;  %19034 = vpow2.f32 %v12608_v55  ;;  %18742 = vmatprep.subr.mxu0 %v13198_v53  ;;  %v20684_v18 = vand.u32 4294901760, %v13669_v7 }
 0x74a   :  { %18743 = vmatpush3.msra.mxu0 %v13198_v53 }
 0x74b   :  { %18754 = vmatprep.subr.mxu0 %v20635_v35  ;;  %18745 = vmatmul.mubr.f32.vlgmr.msra.gmra.mxu0 %v13247_v51  ;;  %v13291_v9 = vand.u32 4294901760, %v13290_v31 }
 0x74c   :  { %18755 = vmatpush3.msra.mxu0 %v20635_v35  ;;  %18758 = vmatprep.mubr.f32.mxu0 %v13234_v48  ;;  %v20694_v35 = vsub.f32 %v13669_v7, %v20684_v18 }
 0x74d   :  { %18756 = vmatprep.subr.mxu0 %v13290_v31  ;;  %v13292_v4 = vsub.f32 %v13290_v31, %v13291_v9 }
 0x74e   :  { %18757 = vmatpush3.msra.mxu0 %v13290_v31  ;;  %v13805_v37 = vand.u32 4294901760, %v20694_v35 }
 0x74f   :  { %18768 = vmatprep.subr.mxu0 %v20639_v20  ;;  %v13293_v30 = vand.u32 4294901760, %v13292_v4  ;;  %18759 = vmatmul.mubr.f32.vlgmr.msra.gmra.mxu0 %v20671_v3 }
 0x750   :  { %18769 = vmatpush3.msra.mxu0 %v20639_v20  ;;  %18772 = vmatprep.mubr.f32.mxu0 %v20668_v12  ;;  %v13806_v50 = vsub.f32 %v20694_v35, %v13805_v37 }
 0x751   :  { %18749 = vmatprep.subr.mxu1 %v13293_v30  ;;  %18770 = vmatprep.subr.mxu0 %v13291_v9 }
 0x752   :  { %18750 = vmatpush3.msra.mxu1 %v13293_v30  ;;  %18771 = vmatpush3.msra.mxu0 %v13291_v9  ;;  %v13807_v22 = vand.u32 4294901760, %v13806_v50 }
 0x753   :  { %18752 = vmatmul.mubr.f32.vlgmr.msra.gmra.mxu1 %v20664_v23  ;;  %18761 = vmatprep.subr.mxu1 %v20631_v19 }
 0x754   :  { %v19033_v36 = vpop.eup %19032  ;;  %18762 = vmatpush3.msra.mxu1 %v20631_v19  ;;  %18765 = vmatprep.mubr.f32.mxu1 %v13235_v32 }
 0x755   :  { %18782 = vmatprep.subr.mxu0 %v20680_v26  ;;  %18763 = vmatprep.subr.mxu1 %v13198_v53  ;;  %v12631_v20 = vsel %vm4234_vm4, %v19033_v36, 0.0  ;;  %v13678_v41 = vsel %vm4234_vm4, %v19033_v36, 0 }
 0x756   :  { %v19035_v5 = vpop.eup %19034  ;;  %18773 = vmatmul.mubr.f32.vlgmr.msra.gmra.mxu0 %v20664_v23  ;;  %12632 = vadd.xlane.f32.xlu0 %v12631_v20  ;;  %v13757_v47 = vand.u32 4294901760, %v13678_v41 }
 0x757   :  { %18783 = vmatpush3.msra.mxu0 %v20680_v26  ;;  %18764 = vmatpush3.msra.mxu1 %v13198_v53  ;;  %v13675_v58 = vsel %vm4234_vm4, %v19035_v5, 0  ;;  %v12628_v61 = vsel %vm4234_vm4, %v19035_v5, 0.0 }
 0x758   :  { %18784 = vmatprep.subr.mxu0 %v20684_v18  ;;  %18766 = vmatmul.mubr.f32.vlgmr.msra.gmra.mxu1 %v13245_v21  ;;  %v13747_v1 = vand.u32 4294901760, %v13675_v58  ;;  %v13758_v10 = vsub.f32 %v13678_v41, %v13757_v47 }
 0x759   :  { %18775 = vmatprep.subr.mxu1 %v20631_v19  ;;  %18785 = vmatpush3.msra.mxu0 %v20684_v18 }
 0x75a   :  { %18776 = vmatpush3.msra.mxu1 %v20631_v19  ;;  %18779 = vmatprep.mubr.f32.mxu1 %v20668_v12  ;;  %v13748_v63 = vsub.f32 %v13675_v58, %v13747_v1  ;;  %v13759_v16 = vand.u32 4294901760, %v13758_v10 }
 0x75b   :  { %18796 = vmatprep.subr.mxu0 %v20687_v14  ;;  %18777 = vmatprep.subr.mxu1 %v13198_v53 }
 0x75c   :  { %18778 = vmatpush3.msra.mxu1 %v13198_v53  ;;  %12629 = vadd.xlane.f32.xlu1 %v12628_v61  ;;  %v13749_v49 = vand.u32 4294901760, %v13748_v63  ;;  %v13760_v45 = vsub.f32 %v13758_v10, %v13759_v16 }
 0x75d   :  { %18780 = vmatmul.mubr.f32.vlgmr.msra.gmra.mxu1 %v20664_v23  ;;  %18789 = vmatprep.subr.mxu1 %v13800_v6 }
 0x75e   :  { %18790 = vmatpush3.msra.mxu1 %v13800_v6  ;;  %18793 = vmatprep.mubr.f32.mxu1 %v13747_v1  ;;  %v13750_v40 = vsub.f32 %v13748_v63, %v13749_v49  ;;  %v13761_v44 = vand.u32 4294901760, %v13760_v45 }
 0x75f   :  { %18791 = vmatprep.subr.mxu1 %v13807_v22 }
 0x760   :  { %18792 = vmatpush3.msra.mxu1 %v13807_v22  ;;  %v13751_v19 = vand.u32 4294901760, %v13750_v40 }
 0x761   :  { %18794 = vmatmul.mubr.f32.vlgmr.msra.gmra.mxu1 %v13757_v47  ;;  %18803 = vmatprep.subr.mxu1 %v20680_v26 }
 0x762   :  { %18804 = vmatpush3.msra.mxu1 %v20680_v26  ;;  %18807 = vmatprep.mubr.f32.mxu1 %v13749_v49 }
 0x763   :  { %18805 = vmatprep.subr.mxu1 %v20684_v18  ;;  %18786 = vmatprep.mubr.f32.mxu0 %v13751_v19 }
 0x764   :  { %18806 = vmatpush3.msra.mxu1 %v20684_v18  ;;  %18787 = vmatmul.mubr.f32.vlgmr.msra.gmra.mxu0 %v13761_v44 }
 0x765   :  { %18808 = vmatmul.mubr.f32.vlgmr.msra.gmra.mxu1 %v13759_v16  ;;  %18817 = vmatprep.subr.mxu1 %v20680_v26 }
 0x766   :  { %18818 = vmatpush3.msra.mxu1 %v20680_v26  ;;  %18821 = vmatprep.mubr.f32.mxu1 %v13747_v1 }
 0x767   :  { %18819 = vmatprep.subr.mxu1 %v20684_v18  ;;  %18797 = vmatpush3.msra.mxu0 %v20687_v14 }
 0x768   :  { %18820 = vmatpush3.msra.mxu1 %v20684_v18  ;;  %18798 = vmatprep.subr.mxu0 %v20694_v35 }
 0x769   :  { %18800 = vmatprep.mubr.f32.mxu0 %v13748_v63  ;;  %18822 = vmatmul.mubr.f32.vlgmr.msra.gmra.mxu1 %v13757_v47 }
 0x76a   :  { %18799 = vmatpush3.msra.mxu0 %v20694_v35 }
 0x76b   :  { %18810 = vmatprep.subr.mxu0 %v20699_v2  ;;  %18801 = vmatmul.mubr.f32.vlgmr.msra.gmra.mxu0 %v13758_v10 }
 0x76c   :  { %18811 = vmatpush3.msra.mxu0 %v20699_v2  ;;  %18814 = vmatprep.mubr.f32.mxu0 %v13747_v1 }
 0x76d   :  { %18812 = vmatprep.subr.mxu0 %v13805_v37 }
 0x76e   :  { %18813 = vmatpush3.msra.mxu0 %v13805_v37 }
 0x76f   :  { %18815 = vmatmul.mubr.f32.vlgmr.msra.gmra.mxu0 %v13757_v47 }
 0x777   :  { %v12591_v23 = vpop.xlane.xlu0 %12590 }
 0x778   :  { %v12599_v15 = vsub.f32 %v20617_v43, %v12591_v23 }
 0x779   :  { %v12588_v12 = vpop.xlane.xlu1 %12587 }
 0x77a   :  { %v12614_v3 = vmul.f32 1.442695, %v12599_v15  ;;  %v12598_v48 = vsub.f32 %v20619_v60, %v12588_v12 }
 0x77b   :  { %v14185_v29 = vpop.permute.xlu0 %14184 }
 0x77c   :  { %19036 = vpow2.f32 %v12614_v3  ;;  %v14223_v56 = vand.u32 4294901760, %v14185_v29  ;;  %v12612_v32 = vmul.f32 1.442695, %v12598_v48 }
 0x77d   :  { %v14183_v21 = vpop.permute.xlu1 %14182 }
 0x77e   :  { %v14311_v39 = vsub.f32 %v14185_v29, %v14223_v56  ;;  %19038 = vpow2.f32 %v12612_v32  ;;  %18824 = vmatprep.subr.mxu0 %v14223_v56  ;;  %v14226_v54 = vand.u32 4294901760, %v14183_v21 }
 0x77f   :  { %18825 = vmatpush3.msra.mxu0 %v14223_v56 }
 0x780   :  { %v14318_v24 = vsub.f32 %v14183_v21, %v14226_v54  ;;  %18826 = vmatprep.subr.mxu0 %v14226_v54  ;;  %v14312_v0 = vand.u32 4294901760, %v14311_v39 }
 0x781   :  { %18827 = vmatpush3.msra.mxu0 %v14226_v54 }
 0x782   :  { %18838 = vmatprep.subr.mxu0 %v14311_v39  ;;  %v14313_v43 = vsub.f32 %v14311_v39, %v14312_v0  ;;  %v14319_v34 = vand.u32 4294901760, %v14318_v24 }
 0x784   :  { %v14314_v28 = vand.u32 4294901760, %v14313_v43  ;;  %v14320_v42 = vsub.f32 %v14318_v24, %v14319_v34 }
 0x786   :  { %18831 = vmatprep.subr.mxu1 %v14314_v28  ;;  %v14321_v60 = vand.u32 4294901760, %v14320_v42 }
 0x787   :  { %18832 = vmatpush3.msra.mxu1 %v14314_v28 }
 0x788   :  { %18833 = vmatprep.subr.mxu1 %v14321_v60 }
 0x789   :  { %v19037_v33 = vpop.eup %19036  ;;  %18834 = vmatpush3.msra.mxu1 %v14321_v60 }
 0x78a   :  { %v12637_v25 = vsel %vm4234_vm4, %v19037_v33, 0.0  ;;  %18845 = vmatprep.subr.mxu1 %v14223_v56  ;;  %v14192_v53 = vsel %vm4234_vm4, %v19037_v33, 0 }
 0x78b   :  { %v19039_v55 = vpop.eup %19038  ;;  %12638 = vadd.xlane.f32.xlu0 %v12637_v25  ;;  %v14271_v31 = vand.u32 4294901760, %v14192_v53 }
 0x78c   :  { %v12634_v51 = vsel %vm4234_vm4, %v19039_v55, 0.0  ;;  %v14189_v7 = vsel %vm4234_vm4, %v19039_v55, 0 }
 0x78d   :  { %12635 = vadd.xlane.f32.xlu1 %v12634_v51  ;;  %v14261_v26 = vand.u32 4294901760, %v14189_v7  ;;  %v14272_v9 = vsub.f32 %v14192_v53, %v14271_v31 }
 0x78f   :  { %18835 = vmatprep.mubr.f32.mxu1 %v14261_v26  ;;  %v14262_v18 = vsub.f32 %v14189_v7, %v14261_v26  ;;  %v14273_v4 = vand.u32 4294901760, %v14272_v9 }
 0x790   :  { %18836 = vmatmul.mubr.f32.vlgmr.msra.gmra.mxu1 %v14271_v31 }
 0x791   :  { %18846 = vmatpush3.msra.mxu1 %v14223_v56  ;;  %v14263_v14 = vand.u32 4294901760, %v14262_v18  ;;  %v14274_v30 = vsub.f32 %v14272_v9, %v14273_v4 }
 0x792   :  { %18847 = vmatprep.subr.mxu1 %v14226_v54 }
 0x793   :  { %18848 = vmatpush3.msra.mxu1 %v14226_v54  ;;  %18849 = vmatprep.mubr.f32.mxu1 %v14263_v14  ;;  %v14264_v35 = vsub.f32 %v14262_v18, %v14263_v14  ;;  %v14275_v36 = vand.u32 4294901760, %v14274_v30 }
 0x794   :  { %18859 = vmatprep.subr.mxu1 %v14223_v56  ;;  %18850 = vmatmul.mubr.f32.vlgmr.msra.gmra.mxu1 %v14273_v4 }
 0x795   :  { %18860 = vmatpush3.msra.mxu1 %v14223_v56  ;;  %18863 = vmatprep.mubr.f32.mxu1 %v14261_v26  ;;  %v14265_v2 = vand.u32 4294901760, %v14264_v35 }
 0x796   :  { %18861 = vmatprep.subr.mxu1 %v14226_v54 }
 0x797   :  { %18862 = vmatpush3.msra.mxu1 %v14226_v54  ;;  %18828 = vmatprep.mubr.f32.mxu0 %v14265_v2 }
 0x798   :  { %18829 = vmatmul.mubr.f32.vlgmr.msra.gmra.mxu0 %v14275_v36  ;;  %18864 = vmatmul.mubr.f32.vlgmr.msra.gmra.mxu1 %v14271_v31 }
 0x799   :  { %18839 = vmatpush3.msra.mxu0 %v14311_v39  ;;  %18842 = vmatprep.mubr.f32.mxu0 %v14262_v18 }
 0x79a   :  { %18840 = vmatprep.subr.mxu0 %v14318_v24  ;;  %18871 = vmatprep.subr.mxu1 %v19995_v57 }
 0x79b   :  { %18841 = vmatpush3.msra.mxu0 %v14318_v24  ;;  %18872 = vmatpush3.msra.mxu1 %v19995_v57 }
 0x79c   :  { %18852 = vmatprep.subr.mxu0 %v14312_v0  ;;  %18843 = vmatmul.mubr.f32.vlgmr.msra.gmra.mxu0 %v14272_v9 }
 0x79d   :  { %18853 = vmatpush3.msra.mxu0 %v14312_v0  ;;  %18856 = vmatprep.mubr.f32.mxu0 %v14261_v26 }
 0x79e   :  { %18854 = vmatprep.subr.mxu0 %v14319_v34  ;;  %18881 = vmatprep.subr.mxu1 %v19981_v13 }
 0x79f   :  { %18855 = vmatpush3.msra.mxu0 %v14319_v34 }
 0x7a0   :  { %18857 = vmatmul.mubr.f32.vlgmr.msra.gmra.mxu0 %v14271_v31  ;;  %18866 = vmatprep.subr.mxu0 %v19981_v13 }
 0x7a1   :  { %18867 = vmatpush3.msra.mxu0 %v19981_v13 }
 0x7a2   :  { %18876 = vmatprep.subr.mxu0 %v19986_v52 }
 0x7ac   :  { %v12618_v5 = vpop.xlane.xlu0 %12617 }
 0x7ae   :  { %v12621_v37 = vpop.xlane.xlu1 %12620 }
 0x7af   :  { %19040 = vrcp.f32 %v12621_v37 }
 0x7b0   :  { %19042 = vrcp.f32 %v12618_v5 }
 0x7bc   :  { %v19041_v15 = vpop.eup %19040 }
 0x7bd   :  { %v19043_v29 = vpop.eup %19042 }
 0x7c5   :  { %v12624_v25 = vpop.xlane.xlu0 %12623 }
 0x7c9   :  { %v12627_v55 = vpop.xlane.xlu0 %12626 }
 0x7ca   :  { %19044 = vrcp.f32 %v12627_v55 }
 0x7cb   :  { %19046 = vrcp.f32 %v12624_v25 }
 0x7d7   :  { %v19045_v5 = vpop.eup %19044 }
 0x7df   :  { %v18711_v20 = vpop.f32.mrf.mxu1 }
 0x7e1   :  { %v12816_v41 = vpop.f32.mrf.mxu1 }
 0x7e4   :  { %v18725_v57 = vpop.f32.mrf.mxu1 }
 0x7e6   :  { %v12980_v1 = vpop.f32.mrf.mxu1 }
 0x7e8   :  { %v18704_v47 = vpop.f32.mrf.mxu0 }
 0x7e9   :  { %v12823_v58 = vadd.f32 %v18711_v20, %v18704_v47  ;;  %v18739_v49 = vpop.f32.mrf.mxu1 }
 0x7ea   :  { %v12725_v17 = vpop.f32.mrf.mxu0 }
 0x7eb   :  { %v12817_v61 = vadd.f32 %v12816_v41, %v12725_v17  ;;  %v13144_v12 = vpop.f32.mrf.mxu1 }
 0x7ec   :  { %v18718_v10 = vpop.f32.mrf.mxu0 }
 0x7ed   :  { %v12906_v50 = vadd.f32 %v18718_v10, %v12823_v58  ;;  %v19047_v58 = vpop.eup %19046 }
 0x7ee   :  { %v12898_v63 = vpop.f32.mrf.mxu0 }
 0x7ef   :  { %v12899_v16 = vadd.f32 %v12898_v63, %v12817_v61  ;;  %v12989_v6 = vadd.f32 %v18725_v57, %v12906_v50  ;;  %v12633_v50 = vpop.xlane.xlu0 %12632 }
 0x7f0   :  { %v18732_v22 = vpop.f32.mrf.mxu0  ;;  %19048 = vrcp.f32 %v12633_v50 }
 0x7f1   :  { %v13072_v40 = vadd.f32 %v18732_v22, %v12989_v6  ;;  %v12981_v45 = vadd.f32 %v12980_v1, %v12899_v16  ;;  %v12630_v22 = vpop.xlane.xlu1 %12629 }
 0x7f2   :  { %v13065_v19 = vpop.f32.mrf.mxu0  ;;  %19050 = vrcp.f32 %v12630_v22 }
 0x7f3   :  { %v13151_v44 = vadd.f32 %v18739_v49, %v13072_v40  ;;  %v13066_v23 = vadd.f32 %v13065_v19, %v12981_v45 }
 0x7f5   :  { %v14699_v3 = vmul.f32 %v19041_v15, %v13151_v44  ;;  %v13145_v48 = vadd.f32 %v13144_v12, %v13066_v23 }
 0x7f7   :  { %v14716_v56 = vsel %vm2175_vm1, %v14699_v3, 0  ;;  %v14697_v32 = vmul.f32 %v19043_v29, %v13145_v48 }
 0x7f8   :  { %v14794_v21 = vand.u32 4294901760, %v14716_v56 }
 0x7f9   :  { %v14713_v39 = vsel %vm2175_vm1, %v14697_v32, 0 }
 0x7fa   :  { %v14795_v54 = vsub.f32 %v14716_v56, %v14794_v21  ;;  %v14784_v24 = vand.u32 4294901760, %v14713_v39 }
 0x7fc   :  { %v14796_v0 = vand.u32 4294901760, %v14795_v54  ;;  %v14785_v43 = vsub.f32 %v14713_v39, %v14784_v24  ;;  %18873 = vmatprep.mubr.f32.mxu1 %v14784_v24 }
 0x7fd   :  { %18874 = vmatmul.mubr.f32.vlgmr.msra.gmra.mxu1 %v14794_v21 }
 0x7fe   :  { %18882 = vmatpush3.msra.mxu1 %v19981_v13  ;;  %v14786_v34 = vand.u32 4294901760, %v14785_v43  ;;  %v14797_v28 = vsub.f32 %v14795_v54, %v14796_v0 }
 0x7ff   :  { %18891 = vmatprep.subr.mxu1 %v19981_v13 }
 0x800   :  { %18883 = vmatprep.mubr.f32.mxu1 %v14786_v34  ;;  %v14787_v42 = vsub.f32 %v14785_v43, %v14786_v34  ;;  %v14798_v33 = vand.u32 4294901760, %v14797_v28 }
 0x801   :  { %18884 = vmatmul.mubr.f32.vlgmr.msra.gmra.mxu1 %v14796_v0 }
 0x802   :  { %18893 = vmatprep.mubr.f32.mxu1 %v14784_v24  ;;  %v14788_v60 = vand.u32 4294901760, %v14787_v42  ;;  %18892 = vmatpush3.msra.mxu1 %v19981_v13 }
 0x803   :  { %18901 = vmatprep.subr.mxu1 %v20020_v59 }
 0x804   :  { %18868 = vmatprep.mubr.f32.mxu0 %v14788_v60 }
 0x805   :  { %18869 = vmatmul.mubr.f32.vlgmr.msra.gmra.mxu0 %v14798_v33  ;;  %18894 = vmatmul.mubr.f32.vlgmr.msra.gmra.mxu1 %v14794_v21 }
 0x806   :  { %18878 = vmatprep.mubr.f32.mxu0 %v14785_v43  ;;  %18877 = vmatpush3.msra.mxu0 %v19986_v52 }
 0x807   :  { %18886 = vmatprep.subr.mxu0 %v19991_v62  ;;  %18902 = vmatpush3.msra.mxu1 %v20020_v59 }
 0x808   :  { %18911 = vmatprep.subr.mxu1 %v20006_v38 }
 0x809   :  { %18879 = vmatmul.mubr.f32.vlgmr.msra.gmra.mxu0 %v14795_v54 }
 0x80a   :  { %18888 = vmatprep.mubr.f32.mxu0 %v14784_v24  ;;  %18887 = vmatpush3.msra.mxu0 %v19991_v62 }
 0x80b   :  { %v18746_v13 = vpop.f32.mrf.mxu0  ;;  %18896 = vmatprep.subr.mxu0 %v20006_v38 }
 0x80d   :  { %v13239_v53 = vpop.f32.mrf.mxu0  ;;  %18889 = vmatmul.mubr.f32.vlgmr.msra.gmra.mxu0 %v14794_v21 }
 0x80e   :  { %18897 = vmatpush3.msra.mxu0 %v20006_v38 }
 0x80f   :  { %18906 = vmatprep.subr.mxu0 %v20009_v8  ;;  %v18760_v52 = vpop.f32.mrf.mxu0 }
 0x811   :  { %v13412_v51 = vpop.f32.mrf.mxu0 }
 0x813   :  { %v18753_v59 = vpop.f32.mrf.mxu1 }
 0x814   :  { %v13337_v31 = vadd.f32 %v18753_v59, %v18746_v13 }
 0x815   :  { %v13330_v7 = vpop.f32.mrf.mxu1 }
 0x816   :  { %v13331_v26 = vadd.f32 %v13330_v7, %v13239_v53  ;;  %v13420_v9 = vadd.f32 %v18760_v52, %v13337_v31  ;;  %v18774_v62 = vpop.f32.mrf.mxu0 }
 0x818   :  { %v18767_v18 = vpop.f32.mrf.mxu1  ;;  %v13413_v4 = vadd.f32 %v13412_v51, %v13331_v26  ;;  %v13579_v36 = vpop.f32.mrf.mxu0 }
 0x819   :  { %v13503_v14 = vadd.f32 %v18767_v18, %v13420_v9 }
 0x81a   :  { %v13494_v30 = vpop.f32.mrf.mxu1 }
 0x81b   :  { %v13495_v35 = vadd.f32 %v13494_v30, %v13413_v4  ;;  %v13586_v2 = vadd.f32 %v18774_v62, %v13503_v14  ;;  %v21001_v62 = vld [vmem:[#allocation44_spill] sm:$0xff] }
 0x81d   :  { %v18781_v20 = vpop.f32.mrf.mxu1  ;;  %v13580_v37 = vadd.f32 %v13579_v36, %v13495_v35  ;;  %v21002_v36 = vld [vmem:[#allocation49_spill] sm:$0xff] }
 0x81e   :  { %v13665_v41 = vadd.f32 %v18781_v20, %v13586_v2  ;;  %v21003_v20 = vld [vmem:[#allocation45_spill] sm:$0xff] }
 0x81f   :  { %v13658_v57 = vpop.f32.mrf.mxu1 }
 0x820   :  { %v14703_v47 = vmul.f32 %v19045_v5, %v13665_v41  ;;  %v13659_v17 = vadd.f32 %v13658_v57, %v13580_v37  ;;  %v21004_v37 = vld [vmem:[#allocation46_spill] sm:$0xff]  ;;  %v12639_v5 = vpop.xlane.xlu0 %12638 }
 0x821   :  { %v18795_v1 = vpop.f32.mrf.mxu1  ;;  %19052 = vrcp.f32 %v12639_v5 }
 0x822   :  { %v15211_v10 = vsel %vm2175_vm1, %v14703_v47, 0  ;;  %v14701_v61 = vmul.f32 %v19047_v58, %v13659_v17  ;;  %v12636_v47 = vpop.xlane.xlu1 %12635 }
 0x823   :  { %v20760_v63 = vand.u32 4294901760, %v15211_v10  ;;  %v13844_v16 = vpop.f32.mrf.mxu1  ;;  %19054 = vrcp.f32 %v12636_v47 }
 0x824   :  { %v15208_v6 = vsel %vm2175_vm1, %v14701_v61, 0  ;;  %v18788_v49 = vpop.f32.mrf.mxu0 }
 0x825   :  { %v15290_v40 = vsub.f32 %v15211_v10, %v20760_v63  ;;  %v15279_v45 = vand.u32 4294901760, %v15208_v6  ;;  %v18809_v23 = vpop.f32.mrf.mxu1  ;;  %v13851_v48 = vadd.f32 %v18795_v1, %v18788_v49 }
 0x826   :  { %v13753_v15 = vpop.f32.mrf.mxu0 }
 0x827   :  { %v15291_v19 = vand.u32 4294901760, %v15290_v40  ;;  %v15280_v44 = vsub.f32 %v15208_v6, %v15279_v45  ;;  %18903 = vmatprep.mubr.f32.mxu1 %v15279_v45  ;;  %v14008_v29 = vpop.f32.mrf.mxu1  ;;  %v13845_v21 = vadd.f32 %v13844_v16, %v13753_v15 }
 0x828   :  { %18904 = vmatmul.mubr.f32.vlgmr.msra.gmra.mxu1 %v20760_v63 }
 0x829   :  { %18912 = vmatpush3.msra.mxu1 %v20006_v38  ;;  %v15281_v12 = vand.u32 4294901760, %v15280_v44  ;;  %v15292_v3 = vsub.f32 %v15290_v40, %v15291_v19  ;;  %v18823_v28 = vpop.f32.mrf.mxu1 }
 0x82a   :  { %18921 = vmatprep.subr.mxu1 %v20006_v38 }
 0x82b   :  { %18913 = vmatprep.mubr.f32.mxu1 %v15281_v12  ;;  %v18802_v56 = vpop.f32.mrf.mxu0  ;;  %v15282_v32 = vsub.f32 %v15280_v44, %v15281_v12  ;;  %v15293_v0 = vand.u32 4294901760, %v15292_v3  ;;  %v14172_v55 = vpop.f32.mrf.mxu1 }
 0x82c   :  { %v13934_v39 = vadd.f32 %v18802_v56, %v13851_v48  ;;  %18914 = vmatmul.mubr.f32.vlgmr.msra.gmra.mxu1 %v15291_v19 }
 0x82d   :  { %18923 = vmatprep.mubr.f32.mxu1 %v15279_v45  ;;  %v13926_v54 = vpop.f32.mrf.mxu0  ;;  %v15283_v24 = vand.u32 4294901760, %v15282_v32  ;;  %18922 = vmatpush3.msra.mxu1 %v20006_v38  ;;  %v19049_v38 = vpop.eup %19048 }
 0x82e   :  { %v13927_v43 = vadd.f32 %v13926_v54, %v13845_v21  ;;  %v14017_v34 = vadd.f32 %v18809_v23, %v13934_v39  ;;  %18931 = vmatprep.subr.mxu1 %v20053_v46  ;;  %v19051_v31 = vpop.eup %19050 }
 0x82f   :  { %18898 = vmatprep.mubr.f32.mxu0 %v15283_v24  ;;  %v18816_v42 = vpop.f32.mrf.mxu0  ;;  %v19053_v3 = vpop.eup %19052 }
 0x830   :  { %v14100_v60 = vadd.f32 %v18816_v42, %v14017_v34  ;;  %18899 = vmatmul.mubr.f32.vlgmr.msra.gmra.mxu0 %v15293_v0  ;;  %18924 = vmatmul.mubr.f32.vlgmr.msra.gmra.mxu1 %v20760_v63  ;;  %v14009_v33 = vadd.f32 %v14008_v29, %v13927_v43  ;;  %v19055_v32 = vpop.eup %19054 }
 0x831   :  { %18908 = vmatprep.mubr.f32.mxu0 %v15280_v44  ;;  %v14093_v25 = vpop.f32.mrf.mxu0  ;;  %18907 = vmatpush3.msra.mxu0 %v20009_v8 }
 0x832   :  { %v14179_v13 = vadd.f32 %v18823_v28, %v14100_v60  ;;  %v14094_v53 = vadd.f32 %v14093_v25, %v14009_v33  ;;  %18916 = vmatprep.subr.mxu0 %v20013_v11  ;;  %18932 = vmatpush3.msra.mxu1 %v20053_v46 }
 0x833   :  { %18941 = vmatprep.subr.mxu1 %v20035_v27 }
 0x834   :  { %v14707_v52 = vmul.f32 %v19049_v38, %v14179_v13  ;;  %v14173_v59 = vadd.f32 %v14172_v55, %v14094_v53  ;;  %18909 = vmatmul.mubr.f32.vlgmr.msra.gmra.mxu0 %v15290_v40  ;;  %v21006_v53 = vld [vmem:[#allocation48_spill] sm:$0xff] }
 0x835   :  { %18918 = vmatprep.mubr.f32.mxu0 %v15279_v45  ;;  %18917 = vmatpush3.msra.mxu0 %v20013_v11 }
 0x836   :  { %v15706_v51 = vsel %vm2175_vm1, %v14707_v52, 0  ;;  %v14705_v8 = vmul.f32 %v19051_v31, %v14173_v59  ;;  %18926 = vmatprep.subr.mxu0 %v20035_v27 }
 0x837   :  { %v15784_v7 = vand.u32 4294901760, %v15706_v51 }
 0x838   :  { %v15703_v26 = vsel %vm2175_vm1, %v14705_v8, 0  ;;  %18919 = vmatmul.mubr.f32.vlgmr.msra.gmra.mxu0 %v20760_v63 }
 0x839   :  { %v15785_v46 = vsub.f32 %v15706_v51, %v15784_v7  ;;  %v15774_v9 = vand.u32 4294901760, %v15703_v26  ;;  %18927 = vmatpush3.msra.mxu0 %v20035_v27 }
 0x83a   :  { %18936 = vmatprep.subr.mxu0 %v21001_v62 }
 0x83b   :  { %v15786_v18 = vand.u32 4294901760, %v15785_v46  ;;  %v15775_v4 = vsub.f32 %v15703_v26, %v15774_v9  ;;  %18933 = vmatprep.mubr.f32.mxu1 %v15774_v9 }
 0x83c   :  { %18934 = vmatmul.mubr.f32.vlgmr.msra.gmra.mxu1 %v15784_v7 }
 0x83d   :  { %18942 = vmatpush3.msra.mxu1 %v20035_v27  ;;  %v15776_v11 = vand.u32 4294901760, %v15775_v4  ;;  %v15787_v14 = vsub.f32 %v15785_v46, %v15786_v18 }
 0x83e   :  { %18951 = vmatprep.subr.mxu1 %v20035_v27 }
 0x83f   :  { %18943 = vmatprep.mubr.f32.mxu1 %v15776_v11  ;;  %v15777_v30 = vsub.f32 %v15775_v4, %v15776_v11  ;;  %v15788_v2 = vand.u32 4294901760, %v15787_v14 }
 0x840   :  { %18944 = vmatmul.mubr.f32.vlgmr.msra.gmra.mxu1 %v15786_v18 }
 0x841   :  { %18953 = vmatprep.mubr.f32.mxu1 %v15774_v9  ;;  %v15778_v35 = vand.u32 4294901760, %v15777_v30  ;;  %18952 = vmatpush3.msra.mxu1 %v20035_v27  ;;  %v21005_v27 = vld [vmem:[#allocation47_spill] sm:$0xff] }
 0x842   :  { %18961 = vmatprep.subr.mxu1 %v21002_v36 }
 0x843   :  { %18928 = vmatprep.mubr.f32.mxu0 %v15778_v35 }
 0x844   :  { %18929 = vmatmul.mubr.f32.vlgmr.msra.gmra.mxu0 %v15788_v2  ;;  %18954 = vmatmul.mubr.f32.vlgmr.msra.gmra.mxu1 %v15784_v7 }
 0x845   :  { %18938 = vmatprep.mubr.f32.mxu0 %v15775_v4  ;;  %18937 = vmatpush3.msra.mxu0 %v21001_v62 }
 0x846   :  { %18946 = vmatprep.subr.mxu0 %v21003_v20  ;;  %18962 = vmatpush3.msra.mxu1 %v21002_v36 }
 0x847   :  { %18971 = vmatprep.subr.mxu1 %v21004_v37 }
 0x848   :  { %18939 = vmatmul.mubr.f32.vlgmr.msra.gmra.mxu0 %v15785_v46 }
 0x849   :  { %18948 = vmatprep.mubr.f32.mxu0 %v15774_v9  ;;  %18947 = vmatpush3.msra.mxu0 %v21003_v20 }
 0x84a   :  { %18956 = vmatprep.subr.mxu0 %v21004_v37 }
 0x84c   :  { %18949 = vmatmul.mubr.f32.vlgmr.msra.gmra.mxu0 %v15784_v7 }
 0x84d   :  { %18957 = vmatpush3.msra.mxu0 %v21004_v37 }
 0x84e   :  { %18966 = vmatprep.subr.mxu0 %v21005_v27 }
 0x850   :  { %v18837_v41 = vpop.f32.mrf.mxu1 }
 0x852   :  { %v14358_v57 = vpop.f32.mrf.mxu1 }
 0x854   :  { %v18851_v17 = vpop.f32.mrf.mxu1 }
 0x856   :  { %v14522_v61 = vpop.f32.mrf.mxu1 }
 0x858   :  { %v18830_v58 = vpop.f32.mrf.mxu0  ;;  %v18865_v40 = vpop.f32.mrf.mxu1 }
 0x859   :  { %v14365_v10 = vadd.f32 %v18837_v41, %v18830_v58 }
 0x85a   :  { %v14267_v1 = vpop.f32.mrf.mxu0  ;;  %v14686_v48 = vpop.f32.mrf.mxu1 }
 0x85b   :  { %v14359_v63 = vadd.f32 %v14358_v57, %v14267_v1 }
 0x85c   :  { %v18844_v50 = vpop.f32.mrf.mxu0 }
 0x85d   :  { %v14448_v16 = vadd.f32 %v18844_v50, %v14365_v10 }
 0x85e   :  { %v14440_v6 = vpop.f32.mrf.mxu0 }
 0x85f   :  { %v14441_v49 = vadd.f32 %v14440_v6, %v14359_v63  ;;  %v14531_v22 = vadd.f32 %v18851_v17, %v14448_v16 }
 0x860   :  { %v18858_v45 = vpop.f32.mrf.mxu0 }
 0x861   :  { %v14614_v19 = vadd.f32 %v18858_v45, %v14531_v22  ;;  %v14523_v44 = vadd.f32 %v14522_v61, %v14441_v49 }
 0x862   :  { %v14607_v23 = vpop.f32.mrf.mxu0 }
 0x863   :  { %v14693_v15 = vadd.f32 %v18865_v40, %v14614_v19  ;;  %v14608_v12 = vadd.f32 %v14607_v23, %v14523_v44 }
 0x865   :  { %v14711_v29 = vmul.f32 %v19053_v3, %v14693_v15  ;;  %v14687_v56 = vadd.f32 %v14686_v48, %v14608_v12 }
 0x867   :  { %v16201_v21 = vsel %vm2175_vm1, %v14711_v29, 0  ;;  %v14709_v39 = vmul.f32 %v19055_v32, %v14687_v56 }
 0x868   :  { %v16279_v54 = vand.u32 4294901760, %v16201_v21 }
 0x869   :  { %v16198_v24 = vsel %vm2175_vm1, %v14709_v39, 0 }
 0x86a   :  { %v16280_v0 = vsub.f32 %v16201_v21, %v16279_v54  ;;  %v16269_v43 = vand.u32 4294901760, %v16198_v24 }
 0x86c   :  { %v16281_v34 = vand.u32 4294901760, %v16280_v0  ;;  %v16270_v28 = vsub.f32 %v16198_v24, %v16269_v43  ;;  %18963 = vmatprep.mubr.f32.mxu1 %v16269_v43 }
 0x86d   :  { %18964 = vmatmul.mubr.f32.vlgmr.msra.gmra.mxu1 %v16279_v54 }
 0x86e   :  { %18972 = vmatpush3.msra.mxu1 %v21004_v37  ;;  %v16271_v42 = vand.u32 4294901760, %v16270_v28  ;;  %v16282_v60 = vsub.f32 %v16280_v0, %v16281_v34 }
 0x86f   :  { %18981 = vmatprep.subr.mxu1 %v21004_v37 }
 0x870   :  { %18973 = vmatprep.mubr.f32.mxu1 %v16271_v42  ;;  %v16272_v33 = vsub.f32 %v16270_v28, %v16271_v42  ;;  %v16283_v13 = vand.u32 4294901760, %v16282_v60 }
 0x871   :  { %18974 = vmatmul.mubr.f32.vlgmr.msra.gmra.mxu1 %v16281_v34 }
 0x872   :  { %18983 = vmatprep.mubr.f32.mxu1 %v16269_v43  ;;  %v16273_v25 = vand.u32 4294901760, %v16272_v33  ;;  %18982 = vmatpush3.msra.mxu1 %v21004_v37 }
 0x874   :  { %18958 = vmatprep.mubr.f32.mxu0 %v16273_v25 }
 0x875   :  { %18959 = vmatmul.mubr.f32.vlgmr.msra.gmra.mxu0 %v16283_v13  ;;  %18984 = vmatmul.mubr.f32.vlgmr.msra.gmra.mxu1 %v16279_v54 }
 0x876   :  { %18967 = vmatpush3.msra.mxu0 %v21005_v27  ;;  %18968 = vmatprep.mubr.f32.mxu0 %v16270_v28 }
 0x877   :  { %18976 = vmatprep.subr.mxu0 %v21006_v53 }
 0x879   :  { %18969 = vmatmul.mubr.f32.vlgmr.msra.gmra.mxu0 %v16280_v0 }
 0x87a   :  { %18977 = vmatpush3.msra.mxu0 %v21006_v53  ;;  %18978 = vmatprep.mubr.f32.mxu0 %v16269_v43 }
 0x87d   :  { %18979 = vmatmul.mubr.f32.vlgmr.msra.gmra.mxu0 %v16279_v54 }
 0x8bd   :  { %v18875_v38 = vpop.f32.mrf.mxu1 }
 0x8bf   :  { %v14876_v55 = vpop.f32.mrf.mxu1 }
 0x8c1   :  { %v18885_v52 = vpop.f32.mrf.mxu1 }
 0x8c3   :  { %v15037_v31 = vpop.f32.mrf.mxu1 }
 0x8c5   :  { %v18870_v59 = vpop.f32.mrf.mxu0  ;;  %v18895_v8 = vpop.f32.mrf.mxu1 }
 0x8c6   :  { %v14883_v63 = vadd.f32 %v18875_v38, %v18870_v59 }
 0x8c7   :  { %v14790_v51 = vpop.f32.mrf.mxu0  ;;  %v20801_v26 = vpop.f32.mrf.mxu1 }
 0x8c8   :  { %v14877_v45 = vadd.f32 %v14876_v55, %v14790_v51 }
 0x8c9   :  { %v18880_v7 = vpop.f32.mrf.mxu0 }
 0x8ca   :  { %v14964_v19 = vadd.f32 %v18880_v7, %v14883_v63 }
 0x8cb   :  { %v14956_v46 = vpop.f32.mrf.mxu0 }
 0x8cc   :  { %v14957_v3 = vadd.f32 %v14956_v46, %v14877_v45  ;;  %v15046_v32 = vadd.f32 %v18885_v52, %v14964_v19 }
 0x8cd   :  { %v18890_v62 = vpop.f32.mrf.mxu0 }
 0x8ce   :  { %v15038_v24 = vadd.f32 %v15037_v31, %v14957_v3  ;;  %v15126_v28 = vadd.f32 %v18890_v62, %v15046_v32 }
 0x8cf   :  { %v15119_v4 = vpop.f32.mrf.mxu0 }
 0x8d0   :  { %v15120_v13 = vadd.f32 %v15119_v4, %v15038_v24  ;;  %v15204_v51 = vadd.f32 %v18895_v8, %v15126_v28 }
 0x8d2   :  { %v16699_v4 = vsel %vm50_vm0, %v15204_v51, 0.0 }
 0x8e8   :  { %v18905_v9 = vpop.f32.mrf.mxu1 }
 0x8ea   :  { %v15371_v18 = vpop.f32.mrf.mxu1 }
 0x8ec   :  { %v18915_v11 = vpop.f32.mrf.mxu1 }
 0x8ee   :  { %v15532_v30 = vpop.f32.mrf.mxu1 }
 0x8f0   :  { %v18900_v14 = vpop.f32.mrf.mxu0  ;;  %v18925_v2 = vpop.f32.mrf.mxu1 }
 0x8f1   :  { %v15378_v50 = vadd.f32 %v18905_v9, %v18900_v14 }
 0x8f2   :  { %v15285_v35 = vpop.f32.mrf.mxu0  ;;  %v15692_v20 = vpop.f32.mrf.mxu1 }
 0x8f3   :  { %v15372_v49 = vadd.f32 %v15371_v18, %v15285_v35 }
 0x8f4   :  { %v18910_v36 = vpop.f32.mrf.mxu0 }
 0x8f5   :  { %v15459_v22 = vadd.f32 %v18910_v36, %v15378_v50 }
 0x8f6   :  { %v15451_v37 = vpop.f32.mrf.mxu0 }
 0x8f7   :  { %v15452_v23 = vadd.f32 %v15451_v37, %v15372_v49  ;;  %v15541_v29 = vadd.f32 %v18915_v11, %v15459_v22  ;;  %v15198_v11 = vadd.f32 %v20801_v26, %v15120_v13  ;;  %v19056_v22 = vld [vmem:[%s20823_s3] ss:$0 sm:$0xff] }
 0x8f8   :  { %v18920_v41 = vpop.f32.mrf.mxu0 }
 0x8f9   :  { %v15533_v39 = vadd.f32 %v15532_v30, %v15452_v23  ;;  %v15621_v43 = vadd.f32 %v18920_v41, %v15541_v29  ;;  %v16692_v26 = vsel %vm50_vm0, %v15198_v11, 0.0 }
 0x8fa   :  { %v15614_v57 = vpop.f32.mrf.mxu0 }
 0x8fb   :  { %v15615_v33 = vadd.f32 %v15614_v57, %v15533_v39  ;;  %v15699_v38 = vadd.f32 %v18925_v2, %v15621_v43 }
 0x8fc   :  { %v18935_v27 = vpop.f32.mrf.mxu1 }
 0x8fd   :  { %v15693_v46 = vadd.f32 %v15692_v20, %v15615_v33  ;;  %v16700_v62 = vsel %vm50_vm0, %v15699_v38, 0.0 }
 0x8fe   :  { %v15866_v5 = vpop.f32.mrf.mxu1 }
 0x8ff   :  { %v16693_v8 = vsel %vm50_vm0, %v15693_v46, 0.0 }
 0x900   :  { %v18945_v47 = vpop.f32.mrf.mxu1 }
 0x902   :  { %v16027_v58 = vpop.f32.mrf.mxu1 }
 0x904   :  { %v18930_v17 = vpop.f32.mrf.mxu0  ;;  %v18955_v10 = vpop.f32.mrf.mxu1 }
 0x905   :  { %v15873_v40 = vadd.f32 %v18935_v27, %v18930_v17 }
 0x906   :  { %v15780_v1 = vpop.f32.mrf.mxu0  ;;  %v16187_v16 = vpop.f32.mrf.mxu1 }
 0x907   :  { %v15867_v15 = vadd.f32 %v15866_v5, %v15780_v1  ;;  %v16701_v5 = vadd.f32 %v16700_v62, %v16699_v4  ;;  %v16694_v1 = vadd.f32 %v16693_v8, %v16692_v26 }
 0x908   :  { %v18940_v61 = vpop.f32.mrf.mxu0 }
 0x909   :  { %v15954_v12 = vadd.f32 %v18940_v61, %v15873_v40 }
 0x90a   :  { %v15946_v6 = vpop.f32.mrf.mxu0 }
 0x90b   :  { %v15947_v56 = vadd.f32 %v15946_v6, %v15867_v15  ;;  %v16036_v54 = vadd.f32 %v18945_v47, %v15954_v12 }
 0x90c   :  { %v18950_v48 = vpop.f32.mrf.mxu0 }
 0x90d   :  { %v16028_v34 = vadd.f32 %v16027_v58, %v15947_v56  ;;  %v16116_v25 = vadd.f32 %v18950_v48, %v16036_v54 }
 0x90e   :  { %v16109_v0 = vpop.f32.mrf.mxu0 }
 0x90f   :  { %v16110_v55 = vadd.f32 %v16109_v0, %v16028_v34  ;;  %v16194_v9 = vadd.f32 %v18955_v10, %v16116_v25 }
 0x911   :  { %v16188_v30 = vadd.f32 %v16187_v16, %v16110_v55  ;;  %v16702_v27 = vsel %vm50_vm0, %v16194_v9, 0.0 }
 0x912   :  { %v16703_v10 = vadd.f32 %v16702_v27, %v16701_v5 }
 0x913   :  { %v16695_v47 = vsel %vm50_vm0, %v16188_v30, 0.0 }
 0x914   :  { %v16696_v16 = vadd.f32 %v16695_v47, %v16694_v1 }
 0x92d   :  { %v18965_v44 = vpop.f32.mrf.mxu1 }
 0x92f   :  { %v16361_v21 = vpop.f32.mrf.mxu1 }
 0x931   :  { %v18975_v42 = vpop.f32.mrf.mxu1 }
 0x933   :  { %v16522_v7 = vpop.f32.mrf.mxu1 }
 0x935   :  { %v18960_v60 = vpop.f32.mrf.mxu0  ;;  %v18985_v2 = vpop.f32.mrf.mxu1 }
 0x936   :  { %v16368_v59 = vadd.f32 %v18965_v44, %v18960_v60 }
 0x937   :  { %v16275_v53 = vpop.f32.mrf.mxu0  ;;  %v16682_v61 = vpop.f32.mrf.mxu1 }
 0x938   :  { %v16362_v18 = vadd.f32 %v16361_v21, %v16275_v53 }
 0x939   :  { %v18970_v52 = vpop.f32.mrf.mxu0 }
 0x93a   :  { %v16449_v31 = vadd.f32 %v18970_v52, %v16368_v59 }
 0x93b   :  { %v16441_v14 = vpop.f32.mrf.mxu0 }
 0x93c   :  { %v16442_v35 = vadd.f32 %v16441_v14, %v16362_v18  ;;  %v16531_v36 = vadd.f32 %v18975_v42, %v16449_v31 }
 0x93d   :  { %v18980_v37 = vpop.f32.mrf.mxu0 }
 0x93e   :  { %v16611_v20 = vadd.f32 %v18980_v37, %v16531_v36  ;;  %v16523_v41 = vadd.f32 %v16522_v7, %v16442_v35 }
 0x93f   :  { %v16604_v57 = vpop.f32.mrf.mxu0 }
 0x940   :  { %v16689_v17 = vadd.f32 %v18985_v2, %v16611_v20  ;;  %v16605_v58 = vadd.f32 %v16604_v57, %v16523_v41 }
 0x942   :  { %v16704_v50 = vsel %vm50_vm0, %v16689_v17, 0.0  ;;  %v16683_v63 = vadd.f32 %v16682_v61, %v16605_v58 }
 0x943   :  { %v16705_v6 = vadd.f32 %v16704_v50, %v16703_v10 }
 0x944   :  { %v16697_v49 = vsel %vm50_vm0, %v16683_v63, 0.0 }
 0x945   :  { %v16707_v40 = vadd.f32 %v19056_v22, %v16705_v6  ;;  %v16698_v45 = vadd.f32 %v16697_v49, %v16696_v16 }
 0x947   :  { %16710 = vst.msk [vmem:[#allocation2 + $0x18] sm:$0xff] %vm50_vm0, %v16707_v40  ;;  %v16706_v19 = vadd.f32 %v19056_v22, %v16698_v45 }
 0x949   :  { %16709 = vst.msk [vmem:[#allocation2 + $0x10] sm:$0xff] %vm50_vm0, %v16706_v19 }
 0x94a   :  { %19068 = shalt.err (!%p19065_p4)
}
 0x94b   :  { %s19083_s17 = smov 128   ;;  %s19084_s18 = smov 8  }
 0x94c   :  { %16722 = dma.vmem_to_hbm [thread:$0]  %s16717_s13, 512, %s20824_s4, [#allocation3], %s19083_s17, %s19083_s17, %s19084_s18  }
 0x94d   :  { %19077 = dma.done.wait [#allocation3], 512  }
 0x94e   :  { %19078 = vsyncadd [#allocation3], 4294966784 }
 0x94f   :  { %16726 = vsyncpa [#allocation3], 1 }

</bundles_post_ra>
